<compile_context>
chip_gen: v7x
topology: tpu7x:2x2x1
jax: 0.10.0
libtpu: 0.0.40
codegen_flags: <defaults>
</compile_context>

<pallas_src>
import numpy as np
import jax
import jax.numpy as jnp
from jax.experimental import pallas as pl
from jax.experimental.pallas import tpu as pltpu

INPUT_SIZE = 3
HIDDEN = 100          # logical hidden size (PyTorch module)
HP = 128              # lane-padded hidden size used inside the kernel
LAYERS = 3
SEQ_LEN = 12
MLP_HID = 256
OUT_PAD = 128         # lane-padded output width (only column 0 is meaningful)
NEG_SLOPE = 0.01      # nn.LeakyReLU default


def rnn_mlp_kernel(x_ref, wih_ref, whh_ref, b_ref,
                   w1_ref, b1_ref, w2_ref, b2_ref,
                   out_ref, seq_ref):
    TB = out_ref.shape[0]            # batch-tile size (multiple of 8)
    RT, _ = seq_ref.shape            # RT = SEQ_LEN * TB (time-major flattened rows)
    L = wih_ref.shape[0]
    T = RT // TB
    MLP = b1_ref.shape[1]

    # MLP-head accumulator; bias is added once after accumulation.
    h1 = jnp.zeros((TB, MLP), jnp.float32)

    for l in range(L):
        wih = wih_ref[l]             # (HP, HP), pre-transposed, zero-padded
        whh = whh_ref[l]             # (HP, HP), pre-transposed, zero-padded
        last = l == L - 1

        # Hoisted, time-independent input projection for all T steps at once:
        # one (T*TB, HP) x (HP, HP) MXU matmul + one broadcast bias add.
        src = x_ref[...] if l == 0 else seq_ref[...]      # (T*TB, HP)
        seq_ref[...] = (jnp.dot(src, wih, preferred_element_type=jnp.float32)
                        + b_ref[l])                       # b_ref[l]: (1, HP)

        # Serialized recurrence: h_t = tanh(proj_t + h_{t-1} @ W_hh^T)
        h = jnp.zeros((TB, HP), jnp.float32)
        for t in range(T):
            rows = slice(t * TB, (t + 1) * TB)            # static, 8-aligned
            h = jnp.tanh(seq_ref[rows, :]
                         + jnp.dot(h, whh, preferred_element_type=jnp.float32))
            if last:
                # Fused MLP head: flattened (T*H) @ W1^T expressed as per-step blocks.
                h1 = h1 + jnp.dot(h, w1_ref[t], preferred_element_type=jnp.float32)
            else:
                seq_ref[rows, :] = h                      # feed next layer

    h1 = h1 + b1_ref[...]
    h1 = jnp.where(h1 > 0, h1, NEG_SLOPE * h1)            # LeakyReLU
    out_ref[...] = (jnp.dot(h1, w2_ref[...], preferred_element_type=jnp.float32)
                    + b2_ref[...])                        # (TB, 128); col 0 is the result


def _pad2(w, rows, cols):
    out = jnp.zeros((rows, cols), jnp.float32)
    return out.at[:w.shape[0], :w.shape[1]].set(w)


def _round_up(a, m):
    return ((a + m - 1) // m) * m


def init_params(key):
    """Deterministic init matching the PyTorch module's parameter shapes."""
    ks = jax.random.split(key, 16)
    k_rnn = 1.0 / np.sqrt(HIDDEN)

    def u(k, shape, bound):
        return jax.random.uniform(k, shape, jnp.float32, -bound, bound)

    raw_rnn = []
    idx = 0
    for l in range(LAYERS):
        in_dim = INPUT_SIZE if l == 0 else HIDDEN
        w_ih = u(ks[idx], (HIDDEN, in_dim), k_rnn); idx += 1
        w_hh = u(ks[idx], (HIDDEN, HIDDEN), k_rnn); idx += 1
        b_ih = u(ks[idx], (HIDDEN,), k_rnn); idx += 1
        b_hh = u(ks[idx], (HIDDEN,), k_rnn); idx += 1
        raw_rnn.append((w_ih, w_hh, b_ih, b_hh))

    k_fc1 = 1.0 / np.sqrt(SEQ_LEN * HIDDEN)
    w1 = u(ks[idx], (MLP_HID, SEQ_LEN * HIDDEN), k_fc1); idx += 1
    b1 = u(ks[idx], (MLP_HID,), k_fc1); idx += 1
    k_fc2 = 1.0 / np.sqrt(MLP_HID)
    w2 = u(ks[idx], (1, MLP_HID), k_fc2); idx += 1
    b2 = u(ks[idx], (1,), k_fc2); idx += 1

    raw = {'rnn': raw_rnn, 'w1': w1, 'b1': b1, 'w2': w2, 'b2': b2}

    # --- pack: pre-transpose, pre-sum biases, zero-pad to lane/sublane-friendly shapes ---
    wih_t, whh_t, bias = [], [], []
    for (w_ih, w_hh, b_ih, b_hh) in raw_rnn:
        wih_t.append(_pad2(w_ih.T, HP, HP))                          # (HP, HP)
        whh_t.append(_pad2(w_hh.T, HP, HP))                          # (HP, HP)
        bias.append(_pad2((b_ih + b_hh).reshape(1, HIDDEN), 1, HP))  # (1, HP)

    # W1^T split into per-timestep (HIDDEN, 256) blocks, padded to (HP, 256).
    w1_blocks = w1.T.reshape(SEQ_LEN, HIDDEN, MLP_HID)
    w1_t = jnp.zeros((SEQ_LEN, HP, MLP_HID), jnp.float32).at[:, :HIDDEN, :].set(w1_blocks)

    packed = {
        'wih_t': jnp.stack(wih_t),                 # (L, HP, HP)
        'whh_t': jnp.stack(whh_t),                 # (L, HP, HP)
        'bias': jnp.stack(bias),                   # (L, 1, HP)
        'w1_t': w1_t,                              # (T, HP, 256)
        'b1': b1.reshape(1, MLP_HID),              # (1, 256)
        'w2_t': _pad2(w2.T, MLP_HID, OUT_PAD),     # (256, 128) — only column 0 nonzero
        'b2': _pad2(b2.reshape(1, 1), 1, OUT_PAD), # (1, 128)   — only column 0 nonzero
    }
    return raw, packed


def rnn_model_forward(x, packed, tile_b=256):
    B = x.shape[0]
    # Batch tile: multiple of 8 (sublane aligned), capped so large batches split
    # into several grid tiles (megacore on v7x) and VMEM stays modest.
    TB = _round_up(min(tile_b, max(B, 1)), 8)
    Bp = _round_up(B, TB)
    nt = Bp // TB

    # Zero-pad features 3 -> HP and batch B -> Bp, then lay each batch tile out
    # time-major and flattened: row (t*TB + b) of tile i holds x[i*TB + b, t, :].
    x_pad = jnp.zeros((Bp, SEQ_LEN, HP), jnp.float32).at[:B, :, :INPUT_SIZE].set(x)
    x_tiles = (x_pad.reshape(nt, TB, SEQ_LEN, HP)
               .transpose(0, 2, 1, 3)
               .reshape(nt, SEQ_LEN * TB, HP))

    const3 = lambda i: (0, 0, 0)
    const2 = lambda i: (0, 0)
    out = pl.pallas_call(
        rnn_mlp_kernel,
        out_shape=jax.ShapeDtypeStruct((nt, TB, OUT_PAD), jnp.float32),
        grid=(nt,),
        in_specs=[
            pl.BlockSpec((None, SEQ_LEN * TB, HP), lambda i: (i, 0, 0)),  # x tile
            pl.BlockSpec((LAYERS, HP, HP), const3),                       # W_ih^T stack
            pl.BlockSpec((LAYERS, HP, HP), const3),                       # W_hh^T stack
            pl.BlockSpec((LAYERS, 1, HP), const3),                        # b_ih + b_hh
            pl.BlockSpec((SEQ_LEN, HP, MLP_HID), const3),                 # W1^T blocks
            pl.BlockSpec((1, MLP_HID), const2),                           # b1
            pl.BlockSpec((MLP_HID, OUT_PAD), const2),                     # W2^T (padded)
            pl.BlockSpec((1, OUT_PAD), const2),                           # b2 (padded)
        ],
        out_specs=pl.BlockSpec((None, TB, OUT_PAD), lambda i: (i, 0, 0)),
        scratch_shapes=[pltpu.VMEM((SEQ_LEN * TB, HP), jnp.float32)],
        compiler_params=pltpu.CompilerParams(dimension_semantics=("parallel",)),
    )(x_tiles, packed['wih_t'], packed['whh_t'], packed['bias'],
      packed['w1_t'], packed['b1'], packed['w2_t'], packed['b2'])

    return out.reshape(Bp, OUT_PAD)[:B, :1]


def reference_forward(x, raw):
    """Pure-JAX reference mirroring the PyTorch forward (h0 = zeros)."""
    B = x.shape[0]
    seq = x
    for (w_ih, w_hh, b_ih, b_hh) in raw['rnn']:
        h = jnp.zeros((B, HIDDEN), jnp.float32)
        outs = []
        for t in range(SEQ_LEN):
            h = jnp.tanh(seq[:, t, :] @ w_ih.T + b_ih + h @ w_hh.T + b_hh)
            outs.append(h)
        seq = jnp.stack(outs, axis=1)
    flat = seq.reshape(B, -1)
    h1 = flat @ raw['w1'].T + raw['b1']
    h1 = jnp.where(h1 > 0, h1, NEG_SLOPE * h1)
    return h1 @ raw['w2'].T + raw['b2']


if __name__ == "__main__":
    key = jax.random.PRNGKey(0)
    k_param, k_x = jax.random.split(key)
    raw, packed = init_params(k_param)

    B = 2
    x = jax.random.normal(k_x, (B, SEQ_LEN, INPUT_SIZE), jnp.float32)

    y = rnn_model_forward(x, packed)
    y = jax.block_until_ready(y)

    y_ref = reference_forward(x, raw)
    np.testing.assert_allclose(np.asarray(y), np.asarray(y_ref), rtol=1e-4, atol=1e-4)
    assert y.shape == (B, 1)
    print("KERNEL_OK")
</pallas_src>

<mosaic_0001>
module attributes {stable_mosaic.version = 11 : i64} {
  func.func @rnn_mlp_kernel(%arg0: i32, %arg1: memref<1x96x128xf32, #tpu.memory_space<vmem>>, %arg2: memref<3x128x128xf32, #tpu.memory_space<vmem>>, %arg3: memref<3x128x128xf32, #tpu.memory_space<vmem>>, %arg4: memref<3x1x128xf32, #tpu.memory_space<vmem>>, %arg5: memref<12x128x256xf32, #tpu.memory_space<vmem>>, %arg6: memref<1x256xf32, #tpu.memory_space<vmem>>, %arg7: memref<256x128xf32, #tpu.memory_space<vmem>>, %arg8: memref<1x128xf32, #tpu.memory_space<vmem>>, %arg9: memref<1x8x128xf32, #tpu.memory_space<vmem>>, %arg10: memref<96x128xf32, #tpu.memory_space<vmem>>) attributes {dimension_semantics = [#tpu.dimension_semantics<parallel>], iteration_bounds = array<i64: 1>, scalar_prefetch = 0 : i64, scratch_operands = 1 : i64, tpu.core_type = #tpu.core_type<tc>, window_params = [{transform_indices = @transform_0, window_bounds = array<i64: 1, 96, 128>}, {pipeline_mode = #tpu.pipeline_mode<synchronous>, transform_indices = @transform_1, window_bounds = array<i64: 3, 128, 128>}, {pipeline_mode = #tpu.pipeline_mode<synchronous>, transform_indices = @transform_2, window_bounds = array<i64: 3, 128, 128>}, {pipeline_mode = #tpu.pipeline_mode<synchronous>, transform_indices = @transform_3, window_bounds = array<i64: 3, 1, 128>}, {pipeline_mode = #tpu.pipeline_mode<synchronous>, transform_indices = @transform_4, window_bounds = array<i64: 12, 128, 256>}, {pipeline_mode = #tpu.pipeline_mode<synchronous>, transform_indices = @transform_5, window_bounds = array<i64: 1, 256>}, {pipeline_mode = #tpu.pipeline_mode<synchronous>, transform_indices = @transform_6, window_bounds = array<i64: 256, 128>}, {pipeline_mode = #tpu.pipeline_mode<synchronous>, transform_indices = @transform_7, window_bounds = array<i64: 1, 128>}, {transform_indices = @transform_8, window_bounds = array<i64: 1, 8, 128>}]} {
    %cst = arith.constant 0.000000e+00 : f32
    %0 = vector.broadcast %cst : f32 to vector<8x256xf32>
    %c0 = arith.constant 0 : index
    %c0_0 = arith.constant 0 : index
    %c0_1 = arith.constant 0 : index
    %1 = vector.load %arg2[%c0, %c0_0, %c0_1] : memref<3x128x128xf32, #tpu.memory_space<vmem>>, vector<1x128x128xf32>
    %2 = vector.shape_cast %1 : vector<1x128x128xf32> to vector<128x128xf32>
    %c0_2 = arith.constant 0 : index
    %c0_3 = arith.constant 0 : index
    %c0_4 = arith.constant 0 : index
    %3 = vector.load %arg3[%c0_2, %c0_3, %c0_4] : memref<3x128x128xf32, #tpu.memory_space<vmem>>, vector<1x128x128xf32>
    %4 = vector.shape_cast %3 : vector<1x128x128xf32> to vector<128x128xf32>
    %c0_5 = arith.constant 0 : index
    %c0_6 = arith.constant 0 : index
    %c0_7 = arith.constant 0 : index
    %5 = vector.load %arg1[%c0_5, %c0_6, %c0_7] : memref<1x96x128xf32, #tpu.memory_space<vmem>>, vector<1x96x128xf32>
    %6 = vector.shape_cast %5 : vector<1x96x128xf32> to vector<96x128xf32>
    %cst_8 = arith.constant dense<0.000000e+00> : vector<96x128xf32>
    %7 = tpu.matmul %6, %2, %cst_8 {dimension_numbers = #tpu.dot_dimension_numbers<[1], [0], [0], [1], [0, 0, 1, 1], [], []>} : vector<96x128xf32>, vector<128x128xf32>, vector<96x128xf32> -> vector<96x128xf32>
    %c0_9 = arith.constant 0 : index
    %c0_10 = arith.constant 0 : index
    %c0_11 = arith.constant 0 : index
    %8 = vector.load %arg4[%c0_9, %c0_10, %c0_11] : memref<3x1x128xf32, #tpu.memory_space<vmem>>, vector<1x1x128xf32>
    %9 = vector.shape_cast %8 : vector<1x1x128xf32> to vector<1x128xf32>
    %10 = vector.broadcast %9 : vector<1x128xf32> to vector<96x128xf32>
    %11 = arith.addf %7, %10 : vector<96x128xf32>
    %c0_12 = arith.constant 0 : index
    %c0_13 = arith.constant 0 : index
    %12 = vector.load %arg10[%c0_12, %c0_13] : memref<96x128xf32, #tpu.memory_space<vmem>>, vector<96x128xf32>
    tpu.vector_store %arg10[%c0_12, %c0_13], %11 {strides = array<i32>} : memref<96x128xf32, #tpu.memory_space<vmem>>, vector<96x128xf32>,
    %cst_14 = arith.constant 0.000000e+00 : f32
    %13 = vector.broadcast %cst_14 : f32 to vector<8x128xf32>
    %c0_15 = arith.constant 0 : index
    %c0_16 = arith.constant 0 : index
    %14 = vector.load %arg10[%c0_15, %c0_16] : memref<96x128xf32, #tpu.memory_space<vmem>>, vector<8x128xf32>
    %cst_17 = arith.constant dense<0.000000e+00> : vector<8x128xf32>
    %15 = tpu.matmul %13, %4, %cst_17 {dimension_numbers = #tpu.dot_dimension_numbers<[1], [0], [0], [1], [0, 0, 1, 1], [], []>} : vector<8x128xf32>, vector<128x128xf32>, vector<8x128xf32> -> vector<8x128xf32>
    %16 = arith.addf %14, %15 : vector<8x128xf32>
    %17 = math.tanh %16 : vector<8x128xf32>
    %c0_18 = arith.constant 0 : index
    %c0_19 = arith.constant 0 : index
    %18 = vector.load %arg10[%c0_18, %c0_19] : memref<96x128xf32, #tpu.memory_space<vmem>>, vector<8x128xf32>
    tpu.vector_store %arg10[%c0_18, %c0_19], %17 {strides = array<i32>} : memref<96x128xf32, #tpu.memory_space<vmem>>, vector<8x128xf32>,
    %c8 = arith.constant 8 : index
    %c0_20 = arith.constant 0 : index
    %19 = vector.load %arg10[%c8, %c0_20] : memref<96x128xf32, #tpu.memory_space<vmem>>, vector<8x128xf32>
    %cst_21 = arith.constant dense<0.000000e+00> : vector<8x128xf32>
    %20 = tpu.matmul %17, %4, %cst_21 {dimension_numbers = #tpu.dot_dimension_numbers<[1], [0], [0], [1], [0, 0, 1, 1], [], []>} : vector<8x128xf32>, vector<128x128xf32>, vector<8x128xf32> -> vector<8x128xf32>
    %21 = arith.addf %19, %20 : vector<8x128xf32>
    %22 = math.tanh %21 : vector<8x128xf32>
    %c8_22 = arith.constant 8 : index
    %c0_23 = arith.constant 0 : index
    %23 = vector.load %arg10[%c8_22, %c0_23] : memref<96x128xf32, #tpu.memory_space<vmem>>, vector<8x128xf32>
    tpu.vector_store %arg10[%c8_22, %c0_23], %22 {strides = array<i32>} : memref<96x128xf32, #tpu.memory_space<vmem>>, vector<8x128xf32>,
    %c16 = arith.constant 16 : index
    %c0_24 = arith.constant 0 : index
    %24 = vector.load %arg10[%c16, %c0_24] : memref<96x128xf32, #tpu.memory_space<vmem>>, vector<8x128xf32>
    %cst_25 = arith.constant dense<0.000000e+00> : vector<8x128xf32>
    %25 = tpu.matmul %22, %4, %cst_25 {dimension_numbers = #tpu.dot_dimension_numbers<[1], [0], [0], [1], [0, 0, 1, 1], [], []>} : vector<8x128xf32>, vector<128x128xf32>, vector<8x128xf32> -> vector<8x128xf32>
    %26 = arith.addf %24, %25 : vector<8x128xf32>
    %27 = math.tanh %26 : vector<8x128xf32>
    %c16_26 = arith.constant 16 : index
    %c0_27 = arith.constant 0 : index
    %28 = vector.load %arg10[%c16_26, %c0_27] : memref<96x128xf32, #tpu.memory_space<vmem>>, vector<8x128xf32>
    tpu.vector_store %arg10[%c16_26, %c0_27], %27 {strides = array<i32>} : memref<96x128xf32, #tpu.memory_space<vmem>>, vector<8x128xf32>,
    %c24 = arith.constant 24 : index
    %c0_28 = arith.constant 0 : index
    %29 = vector.load %arg10[%c24, %c0_28] : memref<96x128xf32, #tpu.memory_space<vmem>>, vector<8x128xf32>
    %cst_29 = arith.constant dense<0.000000e+00> : vector<8x128xf32>
    %30 = tpu.matmul %27, %4, %cst_29 {dimension_numbers = #tpu.dot_dimension_numbers<[1], [0], [0], [1], [0, 0, 1, 1], [], []>} : vector<8x128xf32>, vector<128x128xf32>, vector<8x128xf32> -> vector<8x128xf32>
    %31 = arith.addf %29, %30 : vector<8x128xf32>
    %32 = math.tanh %31 : vector<8x128xf32>
    %c24_30 = arith.constant 24 : index
    %c0_31 = arith.constant 0 : index
    %33 = vector.load %arg10[%c24_30, %c0_31] : memref<96x128xf32, #tpu.memory_space<vmem>>, vector<8x128xf32>
    tpu.vector_store %arg10[%c24_30, %c0_31], %32 {strides = array<i32>} : memref<96x128xf32, #tpu.memory_space<vmem>>, vector<8x128xf32>,
    %c32 = arith.constant 32 : index
    %c0_32 = arith.constant 0 : index
    %34 = vector.load %arg10[%c32, %c0_32] : memref<96x128xf32, #tpu.memory_space<vmem>>, vector<8x128xf32>
    %cst_33 = arith.constant dense<0.000000e+00> : vector<8x128xf32>
    %35 = tpu.matmul %32, %4, %cst_33 {dimension_numbers = #tpu.dot_dimension_numbers<[1], [0], [0], [1], [0, 0, 1, 1], [], []>} : vector<8x128xf32>, vector<128x128xf32>, vector<8x128xf32> -> vector<8x128xf32>
    %36 = arith.addf %34, %35 : vector<8x128xf32>
    %37 = math.tanh %36 : vector<8x128xf32>
    %c32_34 = arith.constant 32 : index
    %c0_35 = arith.constant 0 : index
    %38 = vector.load %arg10[%c32_34, %c0_35] : memref<96x128xf32, #tpu.memory_space<vmem>>, vector<8x128xf32>
    tpu.vector_store %arg10[%c32_34, %c0_35], %37 {strides = array<i32>} : memref<96x128xf32, #tpu.memory_space<vmem>>, vector<8x128xf32>,
    %c40 = arith.constant 40 : index
    %c0_36 = arith.constant 0 : index
    %39 = vector.load %arg10[%c40, %c0_36] : memref<96x128xf32, #tpu.memory_space<vmem>>, vector<8x128xf32>
    %cst_37 = arith.constant dense<0.000000e+00> : vector<8x128xf32>
    %40 = tpu.matmul %37, %4, %cst_37 {dimension_numbers = #tpu.dot_dimension_numbers<[1], [0], [0], [1], [0, 0, 1, 1], [], []>} : vector<8x128xf32>, vector<128x128xf32>, vector<8x128xf32> -> vector<8x128xf32>
    %41 = arith.addf %39, %40 : vector<8x128xf32>
    %42 = math.tanh %41 : vector<8x128xf32>
    %c40_38 = arith.constant 40 : index
    %c0_39 = arith.constant 0 : index
    %43 = vector.load %arg10[%c40_38, %c0_39] : memref<96x128xf32, #tpu.memory_space<vmem>>, vector<8x128xf32>
    tpu.vector_store %arg10[%c40_38, %c0_39], %42 {strides = array<i32>} : memref<96x128xf32, #tpu.memory_space<vmem>>, vector<8x128xf32>,
    %c48 = arith.constant 48 : index
    %c0_40 = arith.constant 0 : index
    %44 = vector.load %arg10[%c48, %c0_40] : memref<96x128xf32, #tpu.memory_space<vmem>>, vector<8x128xf32>
    %cst_41 = arith.constant dense<0.000000e+00> : vector<8x128xf32>
    %45 = tpu.matmul %42, %4, %cst_41 {dimension_numbers = #tpu.dot_dimension_numbers<[1], [0], [0], [1], [0, 0, 1, 1], [], []>} : vector<8x128xf32>, vector<128x128xf32>, vector<8x128xf32> -> vector<8x128xf32>
    %46 = arith.addf %44, %45 : vector<8x128xf32>
    %47 = math.tanh %46 : vector<8x128xf32>
    %c48_42 = arith.constant 48 : index
    %c0_43 = arith.constant 0 : index
    %48 = vector.load %arg10[%c48_42, %c0_43] : memref<96x128xf32, #tpu.memory_space<vmem>>, vector<8x128xf32>
    tpu.vector_store %arg10[%c48_42, %c0_43], %47 {strides = array<i32>} : memref<96x128xf32, #tpu.memory_space<vmem>>, vector<8x128xf32>,
    %c56 = arith.constant 56 : index
    %c0_44 = arith.constant 0 : index
    %49 = vector.load %arg10[%c56, %c0_44] : memref<96x128xf32, #tpu.memory_space<vmem>>, vector<8x128xf32>
    %cst_45 = arith.constant dense<0.000000e+00> : vector<8x128xf32>
    %50 = tpu.matmul %47, %4, %cst_45 {dimension_numbers = #tpu.dot_dimension_numbers<[1], [0], [0], [1], [0, 0, 1, 1], [], []>} : vector<8x128xf32>, vector<128x128xf32>, vector<8x128xf32> -> vector<8x128xf32>
    %51 = arith.addf %49, %50 : vector<8x128xf32>
    %52 = math.tanh %51 : vector<8x128xf32>
    %c56_46 = arith.constant 56 : index
    %c0_47 = arith.constant 0 : index
    %53 = vector.load %arg10[%c56_46, %c0_47] : memref<96x128xf32, #tpu.memory_space<vmem>>, vector<8x128xf32>
    tpu.vector_store %arg10[%c56_46, %c0_47], %52 {strides = array<i32>} : memref<96x128xf32, #tpu.memory_space<vmem>>, vector<8x128xf32>,
    %c64 = arith.constant 64 : index
    %c0_48 = arith.constant 0 : index
    %54 = vector.load %arg10[%c64, %c0_48] : memref<96x128xf32, #tpu.memory_space<vmem>>, vector<8x128xf32>
    %cst_49 = arith.constant dense<0.000000e+00> : vector<8x128xf32>
    %55 = tpu.matmul %52, %4, %cst_49 {dimension_numbers = #tpu.dot_dimension_numbers<[1], [0], [0], [1], [0, 0, 1, 1], [], []>} : vector<8x128xf32>, vector<128x128xf32>, vector<8x128xf32> -> vector<8x128xf32>
    %56 = arith.addf %54, %55 : vector<8x128xf32>
    %57 = math.tanh %56 : vector<8x128xf32>
    %c64_50 = arith.constant 64 : index
    %c0_51 = arith.constant 0 : index
    %58 = vector.load %arg10[%c64_50, %c0_51] : memref<96x128xf32, #tpu.memory_space<vmem>>, vector<8x128xf32>
    tpu.vector_store %arg10[%c64_50, %c0_51], %57 {strides = array<i32>} : memref<96x128xf32, #tpu.memory_space<vmem>>, vector<8x128xf32>,
    %c72 = arith.constant 72 : index
    %c0_52 = arith.constant 0 : index
    %59 = vector.load %arg10[%c72, %c0_52] : memref<96x128xf32, #tpu.memory_space<vmem>>, vector<8x128xf32>
    %cst_53 = arith.constant dense<0.000000e+00> : vector<8x128xf32>
    %60 = tpu.matmul %57, %4, %cst_53 {dimension_numbers = #tpu.dot_dimension_numbers<[1], [0], [0], [1], [0, 0, 1, 1], [], []>} : vector<8x128xf32>, vector<128x128xf32>, vector<8x128xf32> -> vector<8x128xf32>
    %61 = arith.addf %59, %60 : vector<8x128xf32>
    %62 = math.tanh %61 : vector<8x128xf32>
    %c72_54 = arith.constant 72 : index
    %c0_55 = arith.constant 0 : index
    %63 = vector.load %arg10[%c72_54, %c0_55] : memref<96x128xf32, #tpu.memory_space<vmem>>, vector<8x128xf32>
    tpu.vector_store %arg10[%c72_54, %c0_55], %62 {strides = array<i32>} : memref<96x128xf32, #tpu.memory_space<vmem>>, vector<8x128xf32>,
    %c80 = arith.constant 80 : index
    %c0_56 = arith.constant 0 : index
    %64 = vector.load %arg10[%c80, %c0_56] : memref<96x128xf32, #tpu.memory_space<vmem>>, vector<8x128xf32>
    %cst_57 = arith.constant dense<0.000000e+00> : vector<8x128xf32>
    %65 = tpu.matmul %62, %4, %cst_57 {dimension_numbers = #tpu.dot_dimension_numbers<[1], [0], [0], [1], [0, 0, 1, 1], [], []>} : vector<8x128xf32>, vector<128x128xf32>, vector<8x128xf32> -> vector<8x128xf32>
    %66 = arith.addf %64, %65 : vector<8x128xf32>
    %67 = math.tanh %66 : vector<8x128xf32>
    %c80_58 = arith.constant 80 : index
    %c0_59 = arith.constant 0 : index
    %68 = vector.load %arg10[%c80_58, %c0_59] : memref<96x128xf32, #tpu.memory_space<vmem>>, vector<8x128xf32>
    tpu.vector_store %arg10[%c80_58, %c0_59], %67 {strides = array<i32>} : memref<96x128xf32, #tpu.memory_space<vmem>>, vector<8x128xf32>,
    %c88 = arith.constant 88 : index
    %c0_60 = arith.constant 0 : index
    %69 = vector.load %arg10[%c88, %c0_60] : memref<96x128xf32, #tpu.memory_space<vmem>>, vector<8x128xf32>
    %cst_61 = arith.constant dense<0.000000e+00> : vector<8x128xf32>
    %70 = tpu.matmul %67, %4, %cst_61 {dimension_numbers = #tpu.dot_dimension_numbers<[1], [0], [0], [1], [0, 0, 1, 1], [], []>} : vector<8x128xf32>, vector<128x128xf32>, vector<8x128xf32> -> vector<8x128xf32>
    %71 = arith.addf %69, %70 : vector<8x128xf32>
    %72 = math.tanh %71 : vector<8x128xf32>
    %c88_62 = arith.constant 88 : index
    %c0_63 = arith.constant 0 : index
    %73 = vector.load %arg10[%c88_62, %c0_63] : memref<96x128xf32, #tpu.memory_space<vmem>>, vector<8x128xf32>
    tpu.vector_store %arg10[%c88_62, %c0_63], %72 {strides = array<i32>} : memref<96x128xf32, #tpu.memory_space<vmem>>, vector<8x128xf32>,
    %c1 = arith.constant 1 : index
    %c0_64 = arith.constant 0 : index
    %c0_65 = arith.constant 0 : index
    %74 = vector.load %arg2[%c1, %c0_64, %c0_65] : memref<3x128x128xf32, #tpu.memory_space<vmem>>, vector<1x128x128xf32>
    %75 = vector.shape_cast %74 : vector<1x128x128xf32> to vector<128x128xf32>
    %c1_66 = arith.constant 1 : index
    %c0_67 = arith.constant 0 : index
    %c0_68 = arith.constant 0 : index
    %76 = vector.load %arg3[%c1_66, %c0_67, %c0_68] : memref<3x128x128xf32, #tpu.memory_space<vmem>>, vector<1x128x128xf32>
    %77 = vector.shape_cast %76 : vector<1x128x128xf32> to vector<128x128xf32>
    %c0_69 = arith.constant 0 : index
    %c0_70 = arith.constant 0 : index
    %78 = vector.load %arg10[%c0_69, %c0_70] : memref<96x128xf32, #tpu.memory_space<vmem>>, vector<96x128xf32>
    %cst_71 = arith.constant dense<0.000000e+00> : vector<96x128xf32>
    %79 = tpu.matmul %78, %75, %cst_71 {dimension_numbers = #tpu.dot_dimension_numbers<[1], [0], [0], [1], [0, 0, 1, 1], [], []>} : vector<96x128xf32>, vector<128x128xf32>, vector<96x128xf32> -> vector<96x128xf32>
    %c1_72 = arith.constant 1 : index
    %c0_73 = arith.constant 0 : index
    %c0_74 = arith.constant 0 : index
    %80 = vector.load %arg4[%c1_72, %c0_73, %c0_74] : memref<3x1x128xf32, #tpu.memory_space<vmem>>, vector<1x1x128xf32>
    %81 = vector.shape_cast %80 : vector<1x1x128xf32> to vector<1x128xf32>
    %82 = vector.broadcast %81 : vector<1x128xf32> to vector<96x128xf32>
    %83 = arith.addf %79, %82 : vector<96x128xf32>
    %c0_75 = arith.constant 0 : index
    %c0_76 = arith.constant 0 : index
    %84 = vector.load %arg10[%c0_75, %c0_76] : memref<96x128xf32, #tpu.memory_space<vmem>>, vector<96x128xf32>
    tpu.vector_store %arg10[%c0_75, %c0_76], %83 {strides = array<i32>} : memref<96x128xf32, #tpu.memory_space<vmem>>, vector<96x128xf32>,
    %cst_77 = arith.constant 0.000000e+00 : f32
    %85 = vector.broadcast %cst_77 : f32 to vector<8x128xf32>
    %c0_78 = arith.constant 0 : index
    %c0_79 = arith.constant 0 : index
    %86 = vector.load %arg10[%c0_78, %c0_79] : memref<96x128xf32, #tpu.memory_space<vmem>>, vector<8x128xf32>
    %cst_80 = arith.constant dense<0.000000e+00> : vector<8x128xf32>
    %87 = tpu.matmul %85, %77, %cst_80 {dimension_numbers = #tpu.dot_dimension_numbers<[1], [0], [0], [1], [0, 0, 1, 1], [], []>} : vector<8x128xf32>, vector<128x128xf32>, vector<8x128xf32> -> vector<8x128xf32>
    %88 = arith.addf %86, %87 : vector<8x128xf32>
    %89 = math.tanh %88 : vector<8x128xf32>
    %c0_81 = arith.constant 0 : index
    %c0_82 = arith.constant 0 : index
    %90 = vector.load %arg10[%c0_81, %c0_82] : memref<96x128xf32, #tpu.memory_space<vmem>>, vector<8x128xf32>
    tpu.vector_store %arg10[%c0_81, %c0_82], %89 {strides = array<i32>} : memref<96x128xf32, #tpu.memory_space<vmem>>, vector<8x128xf32>,
    %c8_83 = arith.constant 8 : index
    %c0_84 = arith.constant 0 : index
    %91 = vector.load %arg10[%c8_83, %c0_84] : memref<96x128xf32, #tpu.memory_space<vmem>>, vector<8x128xf32>
    %cst_85 = arith.constant dense<0.000000e+00> : vector<8x128xf32>
    %92 = tpu.matmul %89, %77, %cst_85 {dimension_numbers = #tpu.dot_dimension_numbers<[1], [0], [0], [1], [0, 0, 1, 1], [], []>} : vector<8x128xf32>, vector<128x128xf32>, vector<8x128xf32> -> vector<8x128xf32>
    %93 = arith.addf %91, %92 : vector<8x128xf32>
    %94 = math.tanh %93 : vector<8x128xf32>
    %c8_86 = arith.constant 8 : index
    %c0_87 = arith.constant 0 : index
    %95 = vector.load %arg10[%c8_86, %c0_87] : memref<96x128xf32, #tpu.memory_space<vmem>>, vector<8x128xf32>
    tpu.vector_store %arg10[%c8_86, %c0_87], %94 {strides = array<i32>} : memref<96x128xf32, #tpu.memory_space<vmem>>, vector<8x128xf32>,
    %c16_88 = arith.constant 16 : index
    %c0_89 = arith.constant 0 : index
    %96 = vector.load %arg10[%c16_88, %c0_89] : memref<96x128xf32, #tpu.memory_space<vmem>>, vector<8x128xf32>
    %cst_90 = arith.constant dense<0.000000e+00> : vector<8x128xf32>
    %97 = tpu.matmul %94, %77, %cst_90 {dimension_numbers = #tpu.dot_dimension_numbers<[1], [0], [0], [1], [0, 0, 1, 1], [], []>} : vector<8x128xf32>, vector<128x128xf32>, vector<8x128xf32> -> vector<8x128xf32>
    %98 = arith.addf %96, %97 : vector<8x128xf32>
    %99 = math.tanh %98 : vector<8x128xf32>
    %c16_91 = arith.constant 16 : index
    %c0_92 = arith.constant 0 : index
    %100 = vector.load %arg10[%c16_91, %c0_92] : memref<96x128xf32, #tpu.memory_space<vmem>>, vector<8x128xf32>
    tpu.vector_store %arg10[%c16_91, %c0_92], %99 {strides = array<i32>} : memref<96x128xf32, #tpu.memory_space<vmem>>, vector<8x128xf32>,
    %c24_93 = arith.constant 24 : index
    %c0_94 = arith.constant 0 : index
    %101 = vector.load %arg10[%c24_93, %c0_94] : memref<96x128xf32, #tpu.memory_space<vmem>>, vector<8x128xf32>
    %cst_95 = arith.constant dense<0.000000e+00> : vector<8x128xf32>
    %102 = tpu.matmul %99, %77, %cst_95 {dimension_numbers = #tpu.dot_dimension_numbers<[1], [0], [0], [1], [0, 0, 1, 1], [], []>} : vector<8x128xf32>, vector<128x128xf32>, vector<8x128xf32> -> vector<8x128xf32>
    %103 = arith.addf %101, %102 : vector<8x128xf32>
    %104 = math.tanh %103 : vector<8x128xf32>
    %c24_96 = arith.constant 24 : index
    %c0_97 = arith.constant 0 : index
    %105 = vector.load %arg10[%c24_96, %c0_97] : memref<96x128xf32, #tpu.memory_space<vmem>>, vector<8x128xf32>
    tpu.vector_store %arg10[%c24_96, %c0_97], %104 {strides = array<i32>} : memref<96x128xf32, #tpu.memory_space<vmem>>, vector<8x128xf32>,
    %c32_98 = arith.constant 32 : index
    %c0_99 = arith.constant 0 : index
    %106 = vector.load %arg10[%c32_98, %c0_99] : memref<96x128xf32, #tpu.memory_space<vmem>>, vector<8x128xf32>
    %cst_100 = arith.constant dense<0.000000e+00> : vector<8x128xf32>
    %107 = tpu.matmul %104, %77, %cst_100 {dimension_numbers = #tpu.dot_dimension_numbers<[1], [0], [0], [1], [0, 0, 1, 1], [], []>} : vector<8x128xf32>, vector<128x128xf32>, vector<8x128xf32> -> vector<8x128xf32>
    %108 = arith.addf %106, %107 : vector<8x128xf32>
    %109 = math.tanh %108 : vector<8x128xf32>
    %c32_101 = arith.constant 32 : index
    %c0_102 = arith.constant 0 : index
    %110 = vector.load %arg10[%c32_101, %c0_102] : memref<96x128xf32, #tpu.memory_space<vmem>>, vector<8x128xf32>
    tpu.vector_store %arg10[%c32_101, %c0_102], %109 {strides = array<i32>} : memref<96x128xf32, #tpu.memory_space<vmem>>, vector<8x128xf32>,
    %c40_103 = arith.constant 40 : index
    %c0_104 = arith.constant 0 : index
    %111 = vector.load %arg10[%c40_103, %c0_104] : memref<96x128xf32, #tpu.memory_space<vmem>>, vector<8x128xf32>
    %cst_105 = arith.constant dense<0.000000e+00> : vector<8x128xf32>
    %112 = tpu.matmul %109, %77, %cst_105 {dimension_numbers = #tpu.dot_dimension_numbers<[1], [0], [0], [1], [0, 0, 1, 1], [], []>} : vector<8x128xf32>, vector<128x128xf32>, vector<8x128xf32> -> vector<8x128xf32>
    %113 = arith.addf %111, %112 : vector<8x128xf32>
    %114 = math.tanh %113 : vector<8x128xf32>
    %c40_106 = arith.constant 40 : index
    %c0_107 = arith.constant 0 : index
    %115 = vector.load %arg10[%c40_106, %c0_107] : memref<96x128xf32, #tpu.memory_space<vmem>>, vector<8x128xf32>
    tpu.vector_store %arg10[%c40_106, %c0_107], %114 {strides = array<i32>} : memref<96x128xf32, #tpu.memory_space<vmem>>, vector<8x128xf32>,
    %c48_108 = arith.constant 48 : index
    %c0_109 = arith.constant 0 : index
    %116 = vector.load %arg10[%c48_108, %c0_109] : memref<96x128xf32, #tpu.memory_space<vmem>>, vector<8x128xf32>
    %cst_110 = arith.constant dense<0.000000e+00> : vector<8x128xf32>
    %117 = tpu.matmul %114, %77, %cst_110 {dimension_numbers = #tpu.dot_dimension_numbers<[1], [0], [0], [1], [0, 0, 1, 1], [], []>} : vector<8x128xf32>, vector<128x128xf32>, vector<8x128xf32> -> vector<8x128xf32>
    %118 = arith.addf %116, %117 : vector<8x128xf32>
    %119 = math.tanh %118 : vector<8x128xf32>
    %c48_111 = arith.constant 48 : index
    %c0_112 = arith.constant 0 : index
    %120 = vector.load %arg10[%c48_111, %c0_112] : memref<96x128xf32, #tpu.memory_space<vmem>>, vector<8x128xf32>
    tpu.vector_store %arg10[%c48_111, %c0_112], %119 {strides = array<i32>} : memref<96x128xf32, #tpu.memory_space<vmem>>, vector<8x128xf32>,
    %c56_113 = arith.constant 56 : index
    %c0_114 = arith.constant 0 : index
    %121 = vector.load %arg10[%c56_113, %c0_114] : memref<96x128xf32, #tpu.memory_space<vmem>>, vector<8x128xf32>
    %cst_115 = arith.constant dense<0.000000e+00> : vector<8x128xf32>
    %122 = tpu.matmul %119, %77, %cst_115 {dimension_numbers = #tpu.dot_dimension_numbers<[1], [0], [0], [1], [0, 0, 1, 1], [], []>} : vector<8x128xf32>, vector<128x128xf32>, vector<8x128xf32> -> vector<8x128xf32>
    %123 = arith.addf %121, %122 : vector<8x128xf32>
    %124 = math.tanh %123 : vector<8x128xf32>
    %c56_116 = arith.constant 56 : index
    %c0_117 = arith.constant 0 : index
    %125 = vector.load %arg10[%c56_116, %c0_117] : memref<96x128xf32, #tpu.memory_space<vmem>>, vector<8x128xf32>
    tpu.vector_store %arg10[%c56_116, %c0_117], %124 {strides = array<i32>} : memref<96x128xf32, #tpu.memory_space<vmem>>, vector<8x128xf32>,
    %c64_118 = arith.constant 64 : index
    %c0_119 = arith.constant 0 : index
    %126 = vector.load %arg10[%c64_118, %c0_119] : memref<96x128xf32, #tpu.memory_space<vmem>>, vector<8x128xf32>
    %cst_120 = arith.constant dense<0.000000e+00> : vector<8x128xf32>
    %127 = tpu.matmul %124, %77, %cst_120 {dimension_numbers = #tpu.dot_dimension_numbers<[1], [0], [0], [1], [0, 0, 1, 1], [], []>} : vector<8x128xf32>, vector<128x128xf32>, vector<8x128xf32> -> vector<8x128xf32>
    %128 = arith.addf %126, %127 : vector<8x128xf32>
    %129 = math.tanh %128 : vector<8x128xf32>
    %c64_121 = arith.constant 64 : index
    %c0_122 = arith.constant 0 : index
    %130 = vector.load %arg10[%c64_121, %c0_122] : memref<96x128xf32, #tpu.memory_space<vmem>>, vector<8x128xf32>
    tpu.vector_store %arg10[%c64_121, %c0_122], %129 {strides = array<i32>} : memref<96x128xf32, #tpu.memory_space<vmem>>, vector<8x128xf32>,
    %c72_123 = arith.constant 72 : index
    %c0_124 = arith.constant 0 : index
    %131 = vector.load %arg10[%c72_123, %c0_124] : memref<96x128xf32, #tpu.memory_space<vmem>>, vector<8x128xf32>
    %cst_125 = arith.constant dense<0.000000e+00> : vector<8x128xf32>
    %132 = tpu.matmul %129, %77, %cst_125 {dimension_numbers = #tpu.dot_dimension_numbers<[1], [0], [0], [1], [0, 0, 1, 1], [], []>} : vector<8x128xf32>, vector<128x128xf32>, vector<8x128xf32> -> vector<8x128xf32>
    %133 = arith.addf %131, %132 : vector<8x128xf32>
    %134 = math.tanh %133 : vector<8x128xf32>
    %c72_126 = arith.constant 72 : index
    %c0_127 = arith.constant 0 : index
    %135 = vector.load %arg10[%c72_126, %c0_127] : memref<96x128xf32, #tpu.memory_space<vmem>>, vector<8x128xf32>
    tpu.vector_store %arg10[%c72_126, %c0_127], %134 {strides = array<i32>} : memref<96x128xf32, #tpu.memory_space<vmem>>, vector<8x128xf32>,
    %c80_128 = arith.constant 80 : index
    %c0_129 = arith.constant 0 : index
    %136 = vector.load %arg10[%c80_128, %c0_129] : memref<96x128xf32, #tpu.memory_space<vmem>>, vector<8x128xf32>
    %cst_130 = arith.constant dense<0.000000e+00> : vector<8x128xf32>
    %137 = tpu.matmul %134, %77, %cst_130 {dimension_numbers = #tpu.dot_dimension_numbers<[1], [0], [0], [1], [0, 0, 1, 1], [], []>} : vector<8x128xf32>, vector<128x128xf32>, vector<8x128xf32> -> vector<8x128xf32>
    %138 = arith.addf %136, %137 : vector<8x128xf32>
    %139 = math.tanh %138 : vector<8x128xf32>
    %c80_131 = arith.constant 80 : index
    %c0_132 = arith.constant 0 : index
    %140 = vector.load %arg10[%c80_131, %c0_132] : memref<96x128xf32, #tpu.memory_space<vmem>>, vector<8x128xf32>
    tpu.vector_store %arg10[%c80_131, %c0_132], %139 {strides = array<i32>} : memref<96x128xf32, #tpu.memory_space<vmem>>, vector<8x128xf32>,
    %c88_133 = arith.constant 88 : index
    %c0_134 = arith.constant 0 : index
    %141 = vector.load %arg10[%c88_133, %c0_134] : memref<96x128xf32, #tpu.memory_space<vmem>>, vector<8x128xf32>
    %cst_135 = arith.constant dense<0.000000e+00> : vector<8x128xf32>
    %142 = tpu.matmul %139, %77, %cst_135 {dimension_numbers = #tpu.dot_dimension_numbers<[1], [0], [0], [1], [0, 0, 1, 1], [], []>} : vector<8x128xf32>, vector<128x128xf32>, vector<8x128xf32> -> vector<8x128xf32>
    %143 = arith.addf %141, %142 : vector<8x128xf32>
    %144 = math.tanh %143 : vector<8x128xf32>
    %c88_136 = arith.constant 88 : index
    %c0_137 = arith.constant 0 : index
    %145 = vector.load %arg10[%c88_136, %c0_137] : memref<96x128xf32, #tpu.memory_space<vmem>>, vector<8x128xf32>
    tpu.vector_store %arg10[%c88_136, %c0_137], %144 {strides = array<i32>} : memref<96x128xf32, #tpu.memory_space<vmem>>, vector<8x128xf32>,
    %c2 = arith.constant 2 : index
    %c0_138 = arith.constant 0 : index
    %c0_139 = arith.constant 0 : index
    %146 = vector.load %arg2[%c2, %c0_138, %c0_139] : memref<3x128x128xf32, #tpu.memory_space<vmem>>, vector<1x128x128xf32>
    %147 = vector.shape_cast %146 : vector<1x128x128xf32> to vector<128x128xf32>
    %c2_140 = arith.constant 2 : index
    %c0_141 = arith.constant 0 : index
    %c0_142 = arith.constant 0 : index
    %148 = vector.load %arg3[%c2_140, %c0_141, %c0_142] : memref<3x128x128xf32, #tpu.memory_space<vmem>>, vector<1x128x128xf32>
    %149 = vector.shape_cast %148 : vector<1x128x128xf32> to vector<128x128xf32>
    %c0_143 = arith.constant 0 : index
    %c0_144 = arith.constant 0 : index
    %150 = vector.load %arg10[%c0_143, %c0_144] : memref<96x128xf32, #tpu.memory_space<vmem>>, vector<96x128xf32>
    %cst_145 = arith.constant dense<0.000000e+00> : vector<96x128xf32>
    %151 = tpu.matmul %150, %147, %cst_145 {dimension_numbers = #tpu.dot_dimension_numbers<[1], [0], [0], [1], [0, 0, 1, 1], [], []>} : vector<96x128xf32>, vector<128x128xf32>, vector<96x128xf32> -> vector<96x128xf32>
    %c2_146 = arith.constant 2 : index
    %c0_147 = arith.constant 0 : index
    %c0_148 = arith.constant 0 : index
    %152 = vector.load %arg4[%c2_146, %c0_147, %c0_148] : memref<3x1x128xf32, #tpu.memory_space<vmem>>, vector<1x1x128xf32>
    %153 = vector.shape_cast %152 : vector<1x1x128xf32> to vector<1x128xf32>
    %154 = vector.broadcast %153 : vector<1x128xf32> to vector<96x128xf32>
    %155 = arith.addf %151, %154 : vector<96x128xf32>
    %c0_149 = arith.constant 0 : index
    %c0_150 = arith.constant 0 : index
    %156 = vector.load %arg10[%c0_149, %c0_150] : memref<96x128xf32, #tpu.memory_space<vmem>>, vector<96x128xf32>
    tpu.vector_store %arg10[%c0_149, %c0_150], %155 {strides = array<i32>} : memref<96x128xf32, #tpu.memory_space<vmem>>, vector<96x128xf32>,
    %cst_151 = arith.constant 0.000000e+00 : f32
    %157 = vector.broadcast %cst_151 : f32 to vector<8x128xf32>
    %c0_152 = arith.constant 0 : index
    %c0_153 = arith.constant 0 : index
    %158 = vector.load %arg10[%c0_152, %c0_153] : memref<96x128xf32, #tpu.memory_space<vmem>>, vector<8x128xf32>
    %cst_154 = arith.constant dense<0.000000e+00> : vector<8x128xf32>
    %159 = tpu.matmul %157, %149, %cst_154 {dimension_numbers = #tpu.dot_dimension_numbers<[1], [0], [0], [1], [0, 0, 1, 1], [], []>} : vector<8x128xf32>, vector<128x128xf32>, vector<8x128xf32> -> vector<8x128xf32>
    %160 = arith.addf %158, %159 : vector<8x128xf32>
    %161 = math.tanh %160 : vector<8x128xf32>
    %c0_155 = arith.constant 0 : index
    %c0_156 = arith.constant 0 : index
    %c0_157 = arith.constant 0 : index
    %162 = vector.load %arg5[%c0_155, %c0_156, %c0_157] : memref<12x128x256xf32, #tpu.memory_space<vmem>>, vector<1x128x256xf32>
    %163 = vector.shape_cast %162 : vector<1x128x256xf32> to vector<128x256xf32>
    %cst_158 = arith.constant dense<0.000000e+00> : vector<8x256xf32>
    %164 = tpu.matmul %161, %163, %cst_158 {dimension_numbers = #tpu.dot_dimension_numbers<[1], [0], [0], [1], [0, 0, 1, 1], [], []>} : vector<8x128xf32>, vector<128x256xf32>, vector<8x256xf32> -> vector<8x256xf32>
    %165 = arith.addf %0, %164 : vector<8x256xf32>
    %c8_159 = arith.constant 8 : index
    %c0_160 = arith.constant 0 : index
    %166 = vector.load %arg10[%c8_159, %c0_160] : memref<96x128xf32, #tpu.memory_space<vmem>>, vector<8x128xf32>
    %cst_161 = arith.constant dense<0.000000e+00> : vector<8x128xf32>
    %167 = tpu.matmul %161, %149, %cst_161 {dimension_numbers = #tpu.dot_dimension_numbers<[1], [0], [0], [1], [0, 0, 1, 1], [], []>} : vector<8x128xf32>, vector<128x128xf32>, vector<8x128xf32> -> vector<8x128xf32>
    %168 = arith.addf %166, %167 : vector<8x128xf32>
    %169 = math.tanh %168 : vector<8x128xf32>
    %c1_162 = arith.constant 1 : index
    %c0_163 = arith.constant 0 : index
    %c0_164 = arith.constant 0 : index
    %170 = vector.load %arg5[%c1_162, %c0_163, %c0_164] : memref<12x128x256xf32, #tpu.memory_space<vmem>>, vector<1x128x256xf32>
    %171 = vector.shape_cast %170 : vector<1x128x256xf32> to vector<128x256xf32>
    %cst_165 = arith.constant dense<0.000000e+00> : vector<8x256xf32>
    %172 = tpu.matmul %169, %171, %cst_165 {dimension_numbers = #tpu.dot_dimension_numbers<[1], [0], [0], [1], [0, 0, 1, 1], [], []>} : vector<8x128xf32>, vector<128x256xf32>, vector<8x256xf32> -> vector<8x256xf32>
    %173 = arith.addf %165, %172 : vector<8x256xf32>
    %c16_166 = arith.constant 16 : index
    %c0_167 = arith.constant 0 : index
    %174 = vector.load %arg10[%c16_166, %c0_167] : memref<96x128xf32, #tpu.memory_space<vmem>>, vector<8x128xf32>
    %cst_168 = arith.constant dense<0.000000e+00> : vector<8x128xf32>
    %175 = tpu.matmul %169, %149, %cst_168 {dimension_numbers = #tpu.dot_dimension_numbers<[1], [0], [0], [1], [0, 0, 1, 1], [], []>} : vector<8x128xf32>, vector<128x128xf32>, vector<8x128xf32> -> vector<8x128xf32>
    %176 = arith.addf %174, %175 : vector<8x128xf32>
    %177 = math.tanh %176 : vector<8x128xf32>
    %c2_169 = arith.constant 2 : index
    %c0_170 = arith.constant 0 : index
    %c0_171 = arith.constant 0 : index
    %178 = vector.load %arg5[%c2_169, %c0_170, %c0_171] : memref<12x128x256xf32, #tpu.memory_space<vmem>>, vector<1x128x256xf32>
    %179 = vector.shape_cast %178 : vector<1x128x256xf32> to vector<128x256xf32>
    %cst_172 = arith.constant dense<0.000000e+00> : vector<8x256xf32>
    %180 = tpu.matmul %177, %179, %cst_172 {dimension_numbers = #tpu.dot_dimension_numbers<[1], [0], [0], [1], [0, 0, 1, 1], [], []>} : vector<8x128xf32>, vector<128x256xf32>, vector<8x256xf32> -> vector<8x256xf32>
    %181 = arith.addf %173, %180 : vector<8x256xf32>
    %c24_173 = arith.constant 24 : index
    %c0_174 = arith.constant 0 : index
    %182 = vector.load %arg10[%c24_173, %c0_174] : memref<96x128xf32, #tpu.memory_space<vmem>>, vector<8x128xf32>
    %cst_175 = arith.constant dense<0.000000e+00> : vector<8x128xf32>
    %183 = tpu.matmul %177, %149, %cst_175 {dimension_numbers = #tpu.dot_dimension_numbers<[1], [0], [0], [1], [0, 0, 1, 1], [], []>} : vector<8x128xf32>, vector<128x128xf32>, vector<8x128xf32> -> vector<8x128xf32>
    %184 = arith.addf %182, %183 : vector<8x128xf32>
    %185 = math.tanh %184 : vector<8x128xf32>
    %c3 = arith.constant 3 : index
    %c0_176 = arith.constant 0 : index
    %c0_177 = arith.constant 0 : index
    %186 = vector.load %arg5[%c3, %c0_176, %c0_177] : memref<12x128x256xf32, #tpu.memory_space<vmem>>, vector<1x128x256xf32>
    %187 = vector.shape_cast %186 : vector<1x128x256xf32> to vector<128x256xf32>
    %cst_178 = arith.constant dense<0.000000e+00> : vector<8x256xf32>
    %188 = tpu.matmul %185, %187, %cst_178 {dimension_numbers = #tpu.dot_dimension_numbers<[1], [0], [0], [1], [0, 0, 1, 1], [], []>} : vector<8x128xf32>, vector<128x256xf32>, vector<8x256xf32> -> vector<8x256xf32>
    %189 = arith.addf %181, %188 : vector<8x256xf32>
    %c32_179 = arith.constant 32 : index
    %c0_180 = arith.constant 0 : index
    %190 = vector.load %arg10[%c32_179, %c0_180] : memref<96x128xf32, #tpu.memory_space<vmem>>, vector<8x128xf32>
    %cst_181 = arith.constant dense<0.000000e+00> : vector<8x128xf32>
    %191 = tpu.matmul %185, %149, %cst_181 {dimension_numbers = #tpu.dot_dimension_numbers<[1], [0], [0], [1], [0, 0, 1, 1], [], []>} : vector<8x128xf32>, vector<128x128xf32>, vector<8x128xf32> -> vector<8x128xf32>
    %192 = arith.addf %190, %191 : vector<8x128xf32>
    %193 = math.tanh %192 : vector<8x128xf32>
    %c4 = arith.constant 4 : index
    %c0_182 = arith.constant 0 : index
    %c0_183 = arith.constant 0 : index
    %194 = vector.load %arg5[%c4, %c0_182, %c0_183] : memref<12x128x256xf32, #tpu.memory_space<vmem>>, vector<1x128x256xf32>
    %195 = vector.shape_cast %194 : vector<1x128x256xf32> to vector<128x256xf32>
    %cst_184 = arith.constant dense<0.000000e+00> : vector<8x256xf32>
    %196 = tpu.matmul %193, %195, %cst_184 {dimension_numbers = #tpu.dot_dimension_numbers<[1], [0], [0], [1], [0, 0, 1, 1], [], []>} : vector<8x128xf32>, vector<128x256xf32>, vector<8x256xf32> -> vector<8x256xf32>
    %197 = arith.addf %189, %196 : vector<8x256xf32>
    %c40_185 = arith.constant 40 : index
    %c0_186 = arith.constant 0 : index
    %198 = vector.load %arg10[%c40_185, %c0_186] : memref<96x128xf32, #tpu.memory_space<vmem>>, vector<8x128xf32>
    %cst_187 = arith.constant dense<0.000000e+00> : vector<8x128xf32>
    %199 = tpu.matmul %193, %149, %cst_187 {dimension_numbers = #tpu.dot_dimension_numbers<[1], [0], [0], [1], [0, 0, 1, 1], [], []>} : vector<8x128xf32>, vector<128x128xf32>, vector<8x128xf32> -> vector<8x128xf32>
    %200 = arith.addf %198, %199 : vector<8x128xf32>
    %201 = math.tanh %200 : vector<8x128xf32>
    %c5 = arith.constant 5 : index
    %c0_188 = arith.constant 0 : index
    %c0_189 = arith.constant 0 : index
    %202 = vector.load %arg5[%c5, %c0_188, %c0_189] : memref<12x128x256xf32, #tpu.memory_space<vmem>>, vector<1x128x256xf32>
    %203 = vector.shape_cast %202 : vector<1x128x256xf32> to vector<128x256xf32>
    %cst_190 = arith.constant dense<0.000000e+00> : vector<8x256xf32>
    %204 = tpu.matmul %201, %203, %cst_190 {dimension_numbers = #tpu.dot_dimension_numbers<[1], [0], [0], [1], [0, 0, 1, 1], [], []>} : vector<8x128xf32>, vector<128x256xf32>, vector<8x256xf32> -> vector<8x256xf32>
    %205 = arith.addf %197, %204 : vector<8x256xf32>
    %c48_191 = arith.constant 48 : index
    %c0_192 = arith.constant 0 : index
    %206 = vector.load %arg10[%c48_191, %c0_192] : memref<96x128xf32, #tpu.memory_space<vmem>>, vector<8x128xf32>
    %cst_193 = arith.constant dense<0.000000e+00> : vector<8x128xf32>
    %207 = tpu.matmul %201, %149, %cst_193 {dimension_numbers = #tpu.dot_dimension_numbers<[1], [0], [0], [1], [0, 0, 1, 1], [], []>} : vector<8x128xf32>, vector<128x128xf32>, vector<8x128xf32> -> vector<8x128xf32>
    %208 = arith.addf %206, %207 : vector<8x128xf32>
    %209 = math.tanh %208 : vector<8x128xf32>
    %c6 = arith.constant 6 : index
    %c0_194 = arith.constant 0 : index
    %c0_195 = arith.constant 0 : index
    %210 = vector.load %arg5[%c6, %c0_194, %c0_195] : memref<12x128x256xf32, #tpu.memory_space<vmem>>, vector<1x128x256xf32>
    %211 = vector.shape_cast %210 : vector<1x128x256xf32> to vector<128x256xf32>
    %cst_196 = arith.constant dense<0.000000e+00> : vector<8x256xf32>
    %212 = tpu.matmul %209, %211, %cst_196 {dimension_numbers = #tpu.dot_dimension_numbers<[1], [0], [0], [1], [0, 0, 1, 1], [], []>} : vector<8x128xf32>, vector<128x256xf32>, vector<8x256xf32> -> vector<8x256xf32>
    %213 = arith.addf %205, %212 : vector<8x256xf32>
    %c56_197 = arith.constant 56 : index
    %c0_198 = arith.constant 0 : index
    %214 = vector.load %arg10[%c56_197, %c0_198] : memref<96x128xf32, #tpu.memory_space<vmem>>, vector<8x128xf32>
    %cst_199 = arith.constant dense<0.000000e+00> : vector<8x128xf32>
    %215 = tpu.matmul %209, %149, %cst_199 {dimension_numbers = #tpu.dot_dimension_numbers<[1], [0], [0], [1], [0, 0, 1, 1], [], []>} : vector<8x128xf32>, vector<128x128xf32>, vector<8x128xf32> -> vector<8x128xf32>
    %216 = arith.addf %214, %215 : vector<8x128xf32>
    %217 = math.tanh %216 : vector<8x128xf32>
    %c7 = arith.constant 7 : index
    %c0_200 = arith.constant 0 : index
    %c0_201 = arith.constant 0 : index
    %218 = vector.load %arg5[%c7, %c0_200, %c0_201] : memref<12x128x256xf32, #tpu.memory_space<vmem>>, vector<1x128x256xf32>
    %219 = vector.shape_cast %218 : vector<1x128x256xf32> to vector<128x256xf32>
    %cst_202 = arith.constant dense<0.000000e+00> : vector<8x256xf32>
    %220 = tpu.matmul %217, %219, %cst_202 {dimension_numbers = #tpu.dot_dimension_numbers<[1], [0], [0], [1], [0, 0, 1, 1], [], []>} : vector<8x128xf32>, vector<128x256xf32>, vector<8x256xf32> -> vector<8x256xf32>
    %221 = arith.addf %213, %220 : vector<8x256xf32>
    %c64_203 = arith.constant 64 : index
    %c0_204 = arith.constant 0 : index
    %222 = vector.load %arg10[%c64_203, %c0_204] : memref<96x128xf32, #tpu.memory_space<vmem>>, vector<8x128xf32>
    %cst_205 = arith.constant dense<0.000000e+00> : vector<8x128xf32>
    %223 = tpu.matmul %217, %149, %cst_205 {dimension_numbers = #tpu.dot_dimension_numbers<[1], [0], [0], [1], [0, 0, 1, 1], [], []>} : vector<8x128xf32>, vector<128x128xf32>, vector<8x128xf32> -> vector<8x128xf32>
    %224 = arith.addf %222, %223 : vector<8x128xf32>
    %225 = math.tanh %224 : vector<8x128xf32>
    %c8_206 = arith.constant 8 : index
    %c0_207 = arith.constant 0 : index
    %c0_208 = arith.constant 0 : index
    %226 = vector.load %arg5[%c8_206, %c0_207, %c0_208] : memref<12x128x256xf32, #tpu.memory_space<vmem>>, vector<1x128x256xf32>
    %227 = vector.shape_cast %226 : vector<1x128x256xf32> to vector<128x256xf32>
    %cst_209 = arith.constant dense<0.000000e+00> : vector<8x256xf32>
    %228 = tpu.matmul %225, %227, %cst_209 {dimension_numbers = #tpu.dot_dimension_numbers<[1], [0], [0], [1], [0, 0, 1, 1], [], []>} : vector<8x128xf32>, vector<128x256xf32>, vector<8x256xf32> -> vector<8x256xf32>
    %229 = arith.addf %221, %228 : vector<8x256xf32>
    %c72_210 = arith.constant 72 : index
    %c0_211 = arith.constant 0 : index
    %230 = vector.load %arg10[%c72_210, %c0_211] : memref<96x128xf32, #tpu.memory_space<vmem>>, vector<8x128xf32>
    %cst_212 = arith.constant dense<0.000000e+00> : vector<8x128xf32>
    %231 = tpu.matmul %225, %149, %cst_212 {dimension_numbers = #tpu.dot_dimension_numbers<[1], [0], [0], [1], [0, 0, 1, 1], [], []>} : vector<8x128xf32>, vector<128x128xf32>, vector<8x128xf32> -> vector<8x128xf32>
    %232 = arith.addf %230, %231 : vector<8x128xf32>
    %233 = math.tanh %232 : vector<8x128xf32>
    %c9 = arith.constant 9 : index
    %c0_213 = arith.constant 0 : index
    %c0_214 = arith.constant 0 : index
    %234 = vector.load %arg5[%c9, %c0_213, %c0_214] : memref<12x128x256xf32, #tpu.memory_space<vmem>>, vector<1x128x256xf32>
    %235 = vector.shape_cast %234 : vector<1x128x256xf32> to vector<128x256xf32>
    %cst_215 = arith.constant dense<0.000000e+00> : vector<8x256xf32>
    %236 = tpu.matmul %233, %235, %cst_215 {dimension_numbers = #tpu.dot_dimension_numbers<[1], [0], [0], [1], [0, 0, 1, 1], [], []>} : vector<8x128xf32>, vector<128x256xf32>, vector<8x256xf32> -> vector<8x256xf32>
    %237 = arith.addf %229, %236 : vector<8x256xf32>
    %c80_216 = arith.constant 80 : index
    %c0_217 = arith.constant 0 : index
    %238 = vector.load %arg10[%c80_216, %c0_217] : memref<96x128xf32, #tpu.memory_space<vmem>>, vector<8x128xf32>
    %cst_218 = arith.constant dense<0.000000e+00> : vector<8x128xf32>
    %239 = tpu.matmul %233, %149, %cst_218 {dimension_numbers = #tpu.dot_dimension_numbers<[1], [0], [0], [1], [0, 0, 1, 1], [], []>} : vector<8x128xf32>, vector<128x128xf32>, vector<8x128xf32> -> vector<8x128xf32>
    %240 = arith.addf %238, %239 : vector<8x128xf32>
    %241 = math.tanh %240 : vector<8x128xf32>
    %c10 = arith.constant 10 : index
    %c0_219 = arith.constant 0 : index
    %c0_220 = arith.constant 0 : index
    %242 = vector.load %arg5[%c10, %c0_219, %c0_220] : memref<12x128x256xf32, #tpu.memory_space<vmem>>, vector<1x128x256xf32>
    %243 = vector.shape_cast %242 : vector<1x128x256xf32> to vector<128x256xf32>
    %cst_221 = arith.constant dense<0.000000e+00> : vector<8x256xf32>
    %244 = tpu.matmul %241, %243, %cst_221 {dimension_numbers = #tpu.dot_dimension_numbers<[1], [0], [0], [1], [0, 0, 1, 1], [], []>} : vector<8x128xf32>, vector<128x256xf32>, vector<8x256xf32> -> vector<8x256xf32>
    %245 = arith.addf %237, %244 : vector<8x256xf32>
    %c88_222 = arith.constant 88 : index
    %c0_223 = arith.constant 0 : index
    %246 = vector.load %arg10[%c88_222, %c0_223] : memref<96x128xf32, #tpu.memory_space<vmem>>, vector<8x128xf32>
    %cst_224 = arith.constant dense<0.000000e+00> : vector<8x128xf32>
    %247 = tpu.matmul %241, %149, %cst_224 {dimension_numbers = #tpu.dot_dimension_numbers<[1], [0], [0], [1], [0, 0, 1, 1], [], []>} : vector<8x128xf32>, vector<128x128xf32>, vector<8x128xf32> -> vector<8x128xf32>
    %248 = arith.addf %246, %247 : vector<8x128xf32>
    %249 = math.tanh %248 : vector<8x128xf32>
    %c11 = arith.constant 11 : index
    %c0_225 = arith.constant 0 : index
    %c0_226 = arith.constant 0 : index
    %250 = vector.load %arg5[%c11, %c0_225, %c0_226] : memref<12x128x256xf32, #tpu.memory_space<vmem>>, vector<1x128x256xf32>
    %251 = vector.shape_cast %250 : vector<1x128x256xf32> to vector<128x256xf32>
    %cst_227 = arith.constant dense<0.000000e+00> : vector<8x256xf32>
    %252 = tpu.matmul %249, %251, %cst_227 {dimension_numbers = #tpu.dot_dimension_numbers<[1], [0], [0], [1], [0, 0, 1, 1], [], []>} : vector<8x128xf32>, vector<128x256xf32>, vector<8x256xf32> -> vector<8x256xf32>
    %253 = arith.addf %245, %252 : vector<8x256xf32>
    %c0_228 = arith.constant 0 : index
    %c0_229 = arith.constant 0 : index
    %254 = vector.load %arg6[%c0_228, %c0_229] : memref<1x256xf32, #tpu.memory_space<vmem>>, vector<1x256xf32>
    %255 = vector.broadcast %254 : vector<1x256xf32> to vector<8x256xf32>
    %256 = arith.addf %253, %255 : vector<8x256xf32>
    %cst_230 = arith.constant 0.000000e+00 : f32
    %257 = vector.broadcast %cst_230 : f32 to vector<8x256xf32>
    %258 = arith.cmpf ogt, %256, %257 : vector<8x256xf32>
    %cst_231 = arith.constant 0.00999999977 : f32
    %259 = vector.broadcast %cst_231 : f32 to vector<8x256xf32>
    %260 = arith.mulf %259, %256 : vector<8x256xf32>
    %261 = arith.select %258, %256, %260 : vector<8x256xi1>, vector<8x256xf32>
    %c0_232 = arith.constant 0 : index
    %c0_233 = arith.constant 0 : index
    %262 = vector.load %arg7[%c0_232, %c0_233] : memref<256x128xf32, #tpu.memory_space<vmem>>, vector<256x128xf32>
    %cst_234 = arith.constant dense<0.000000e+00> : vector<8x128xf32>
    %263 = tpu.matmul %261, %262, %cst_234 {dimension_numbers = #tpu.dot_dimension_numbers<[1], [0], [0], [1], [0, 0, 1, 1], [], []>} : vector<8x256xf32>, vector<256x128xf32>, vector<8x128xf32> -> vector<8x128xf32>
    %c0_235 = arith.constant 0 : index
    %c0_236 = arith.constant 0 : index
    %264 = vector.load %arg8[%c0_235, %c0_236] : memref<1x128xf32, #tpu.memory_space<vmem>>, vector<1x128xf32>
    %265 = vector.broadcast %264 : vector<1x128xf32> to vector<8x128xf32>
    %266 = arith.addf %263, %265 : vector<8x128xf32>
    %c0_237 = arith.constant 0 : index
    %c0_238 = arith.constant 0 : index
    %c0_239 = arith.constant 0 : index
    %267 = vector.load %arg9[%c0_237, %c0_238, %c0_239] : memref<1x8x128xf32, #tpu.memory_space<vmem>>, vector<1x8x128xf32>
    %268 = vector.shape_cast %267 : vector<1x8x128xf32> to vector<8x128xf32>
    %269 = vector.shape_cast %266 : vector<8x128xf32> to vector<1x8x128xf32>
    tpu.vector_store %arg9[%c0_237, %c0_238, %c0_239], %269 {strides = array<i32>} : memref<1x8x128xf32, #tpu.memory_space<vmem>>, vector<1x8x128xf32>,
    return
  }
  func.func @transform_0(%arg0: i32) -> (i32, i32, i32) {
    %c0_i32 = arith.constant 0 : i32
    %c0_i32_0 = arith.constant 0 : i32
    %c0_i32_1 = arith.constant 0 : i32
    return %arg0, %c0_i32, %c0_i32_0 : i32, i32, i32
  }
  func.func @transform_1(%arg0: i32) -> (i32, i32, i32) {
    %c0_i32 = arith.constant 0 : i32
    %c0_i32_0 = arith.constant 0 : i32
    %c0_i32_1 = arith.constant 0 : i32
    %c0_i32_2 = arith.constant 0 : i32
    return %c0_i32, %c0_i32_0, %c0_i32_1 : i32, i32, i32
  }
  func.func @transform_2(%arg0: i32) -> (i32, i32, i32) {
    %c0_i32 = arith.constant 0 : i32
    %c0_i32_0 = arith.constant 0 : i32
    %c0_i32_1 = arith.constant 0 : i32
    %c0_i32_2 = arith.constant 0 : i32
    return %c0_i32, %c0_i32_0, %c0_i32_1 : i32, i32, i32
  }
  func.func @transform_3(%arg0: i32) -> (i32, i32, i32) {
    %c0_i32 = arith.constant 0 : i32
    %c0_i32_0 = arith.constant 0 : i32
    %c0_i32_1 = arith.constant 0 : i32
    %c0_i32_2 = arith.constant 0 : i32
    return %c0_i32, %c0_i32_0, %c0_i32_1 : i32, i32, i32
  }
  func.func @transform_4(%arg0: i32) -> (i32, i32, i32) {
    %c0_i32 = arith.constant 0 : i32
    %c0_i32_0 = arith.constant 0 : i32
    %c0_i32_1 = arith.constant 0 : i32
    %c0_i32_2 = arith.constant 0 : i32
    return %c0_i32, %c0_i32_0, %c0_i32_1 : i32, i32, i32
  }
  func.func @transform_5(%arg0: i32) -> (i32, i32) {
    %c0_i32 = arith.constant 0 : i32
    %c0_i32_0 = arith.constant 0 : i32
    %c0_i32_1 = arith.constant 0 : i32
    return %c0_i32, %c0_i32_0 : i32, i32
  }
  func.func @transform_6(%arg0: i32) -> (i32, i32) {
    %c0_i32 = arith.constant 0 : i32
    %c0_i32_0 = arith.constant 0 : i32
    %c0_i32_1 = arith.constant 0 : i32
    return %c0_i32, %c0_i32_0 : i32, i32
  }
  func.func @transform_7(%arg0: i32) -> (i32, i32) {
    %c0_i32 = arith.constant 0 : i32
    %c0_i32_0 = arith.constant 0 : i32
    %c0_i32_1 = arith.constant 0 : i32
    return %c0_i32, %c0_i32_0 : i32, i32
  }
  func.func @transform_8(%arg0: i32) -> (i32, i32, i32) {
    %c0_i32 = arith.constant 0 : i32
    %c0_i32_0 = arith.constant 0 : i32
    %c0_i32_1 = arith.constant 0 : i32
    return %arg0, %c0_i32, %c0_i32_0 : i32, i32, i32
  }
}

</mosaic_0001>

<bundles_post_ra>
// kernel: tpu_custom_call.1
= control target key start
LH: loop header
LB: loop body
LE: loop exit
PB: predicated region body
PF: predicated region fallthrough
CT: control target
= control target key end

     0   :  { %13 = vsyncpa [#allocation4], 0  ;;  %s9747_s0 = inlined_call_operand.hbm [shape: f32[1,96,128], index: 0, kind: input, shape index: {}]   ;;  %s9748_s1 = inlined_call_operand.hbm [shape: f32[3,128,128], index: 1, kind: input, shape index: {}]   ;;  %s9749_s2 = inlined_call_operand.hbm [shape: f32[3,128,128], index: 2, kind: input, shape index: {}]   ;;  %s9750_s3 = inlined_call_operand.hbm [shape: f32[3,1,128], index: 3, kind: input, shape index: {}]   ;;  %s9751_s4 = inlined_call_operand.hbm [shape: f32[12,128,256], index: 4, kind: input, shape index: {}]   ;;  %s9752_s5 = inlined_call_operand.hbm [shape: f32[1,256], index: 5, kind: input, shape index: {}]   ;;  %s9753_s6 = inlined_call_operand.hbm [shape: f32[256,128], index: 6, kind: input, shape index: {}]   ;;  %s9754_s7 = inlined_call_operand.hbm [shape: f32[1,128], index: 7, kind: input, shape index: {}]   ;;  %s9755_s8 = inlined_call_operand.hbm [shape: f32[1,8,128], index: 8, kind: output, shape index: {}]  }
   0x1   :  { %14 = vsyncpa [#allocation7], 0 }
   0x2   :  { %15 = vsyncpa [#allocation10], 0 }
   0x3   :  { %16 = vsyncpa [#allocation13], 0 }
   0x4   :  { %17 = vsyncpa [#allocation16], 0 }
   0x5   :  { %18 = vsyncpa [#allocation5], 0  ;;  %s8617_s27 = smov [#allocation6]   ;;  %s8618_s29 = smov [#allocation9]  }
   0x6   :  { %s36_s28 = sshll.u32 %s8617_s27, 4  ;;  %s60_s30 = sshll.u32 %s8618_s29, 4  ;;  %s37_s28 = int_to_ptr.vmem [resolvable:$true] %s36_s28  ;;  %s8679_s30 = int_to_ptr.vmem [resolvable:$true] %s60_s30 }
   0x7   :  { %s8407_s11 = scalar_lea.hbm %s9748_s1, 6144 }
   0x8   :  { %p8408_p0 = scmp.ne.s32.totalorder %s9748_s1, %s8407_s11  ;;  %p8411_p1 = scmp.lt.u32.totalorder %s8407_s11, %s9748_s1 }
   0xa   :  { %p8413_p2 = pnand %p8411_p1, %p8408_p0 }
   0xc   :  { %8416 = shalt.err (!%p8413_p2)
}
   0xd   :  { %s8417_s16 = scalar_lea.vmem %s37_s28, 6144  ;;  %p8422_p4 = scmp.lt.s32.totalorder %s37_s28, %s37_s28 }
   0xe   :  { %p8418_p3 = scmp.ne.s32.totalorder %s37_s28, %s8417_s16  ;;  %p8423_p5 = scmp.lt.s32.totalorder %s8417_s16, %s8417_s16 }
  0x10   :  { %p8424_p6 = por %p8423_p5, %p8422_p4 }
  0x12   :  { %p8425_p7 = pnand %p8424_p6, %p8418_p3 }
  0x14   :  { %8428 = shalt.err (!%p8425_p7)
}
  0x15   :  { %s8619_s17 = smov 128   ;;  %s8620_s18 = smov 8  }
  0x16   :  { %42 = dma.hbm_to_vmem [thread:$0]  %s9748_s1, 6144, %s37_s28, [#allocation7], %s8619_s17, %s8619_s17, %s8620_s18  }
  0x17   :  { %s8429_s23 = scalar_lea.hbm %s9750_s3, 48 }
  0x18   :  { %p8430_p8 = scmp.ne.s32.totalorder %s9750_s3, %s8429_s23  ;;  %p8433_p9 = scmp.lt.u32.totalorder %s8429_s23, %s9750_s3 }
  0x1a   :  { %p8435_p10 = pnand %p8433_p9, %p8430_p8 }
  0x1c   :  { %8438 = shalt.err (!%p8435_p10)
}
  0x1d   :  { %s8439_s29 = scalar_lea.vmem %s8679_s30, 48  ;;  %s8443_s1 = scalar_lea.vmem %s8679_s30, 64 }
  0x1e   :  { %p8440_p11 = scmp.ne.s32.totalorder %s8679_s30, %s8439_s29  ;;  %p8444_p12 = scmp.lt.s32.totalorder %s8679_s30, %s8679_s30 }
  0x1f   :  { %p8445_p13 = scmp.lt.s32.totalorder %s8443_s1, %s8439_s29 }
  0x21   :  { %p8446_p0 = por %p8445_p13, %p8444_p12 }
  0x23   :  { %p8447_p1 = pnand %p8446_p0, %p8440_p11 }
  0x25   :  { %8450 = shalt.err (!%p8447_p1)
}
  0x26   :  { %s8621_s28 = smov 16   ;;  %s8622_s9 = smov 1  }
  0x27   :  { %66 = dma.hbm_to_vmem [thread:$0]  %s9750_s3, 48, %s8679_s30, [#allocation10], %s8621_s28, %s8621_s28, %s8622_s9  }
  0x28   :  { %s8623_s12 = smov [#allocation12]   ;;  %s8624_s14 = smov [#allocation3]  }
  0x29   :  { %s85_s13 = sshll.u32 %s8623_s12, 4  ;;  %s24_s15 = sshll.u32 %s8624_s14, 4  ;;  %s86_s13 = int_to_ptr.vmem [resolvable:$true] %s85_s13  ;;  %s8716_s15 = int_to_ptr.vmem [resolvable:$true] %s24_s15 }
  0x2a   :  { %s8451_s20 = scalar_lea.hbm %s9752_s5, 32 }
  0x2b   :  { %p8452_p2 = scmp.ne.s32.totalorder %s9752_s5, %s8451_s20  ;;  %p8455_p3 = scmp.lt.u32.totalorder %s8451_s20, %s9752_s5 }
  0x2d   :  { %p8457_p4 = pnand %p8455_p3, %p8452_p2 }
  0x2f   :  { %8460 = shalt.err (!%p8457_p4)
}
  0x30   :  { %s8461_s3 = scalar_lea.vmem %s86_s13, 32  ;;  %p8466_p6 = scmp.lt.s32.totalorder %s86_s13, %s86_s13 }
  0x31   :  { %p8462_p5 = scmp.ne.s32.totalorder %s86_s13, %s8461_s3  ;;  %p8467_p7 = scmp.lt.s32.totalorder %s8461_s3, %s8461_s3 }
  0x33   :  { %p8468_p8 = por %p8467_p7, %p8466_p6 }
  0x35   :  { %p8469_p9 = pnand %p8468_p8, %p8462_p5 }
  0x37   :  { %8472 = shalt.err (!%p8469_p9)
}
  0x38   :  { %88 = dma.hbm_to_vmem [thread:$0]  %s9752_s5, 32, %s86_s13, [#allocation13]  }
  0x39   :  { %s8473_s29 = scalar_lea.hbm %s9747_s0, 1536 }
  0x3a   :  { %p8474_p10 = scmp.ne.s32.totalorder %s9747_s0, %s8473_s29  ;;  %p8477_p11 = scmp.lt.u32.totalorder %s8473_s29, %s9747_s0 }
  0x3c   :  { %p8479_p12 = pnand %p8477_p11, %p8474_p10 }
  0x3e   :  { %8482 = shalt.err (!%p8479_p12)
}
  0x3f   :  { %s8483_s12 = scalar_lea.vmem %s8716_s15, 1536  ;;  %p8488_p0 = scmp.lt.s32.totalorder %s8716_s15, %s8716_s15 }
  0x40   :  { %p8484_p13 = scmp.ne.s32.totalorder %s8716_s15, %s8483_s12  ;;  %p8489_p1 = scmp.lt.s32.totalorder %s8483_s12, %s8483_s12 }
  0x42   :  { %p8490_p2 = por %p8489_p1, %p8488_p0 }
  0x44   :  { %p8491_p3 = pnand %p8490_p2, %p8484_p13 }
  0x46   :  { %8494 = shalt.err (!%p8491_p3)
}
  0x47   :  { %30 = dma.hbm_to_vmem [thread:$0]  %s9747_s0, 1536, %s8716_s15, [#allocation4], %s8619_s17, %s8619_s17, %s8620_s18  }
  0x48   :  { %s8625_s14 = smov [#allocation8]   ;;  %s8626_s19 = smov [#allocation11]  }
  0x49   :  { %s48_s16 = sshll.u32 %s8625_s14, 4  ;;  %s72_s20 = sshll.u32 %s8626_s19, 4  ;;  %s49_s16 = int_to_ptr.vmem [resolvable:$true] %s48_s16  ;;  %s8750_s20 = int_to_ptr.vmem [resolvable:$true] %s72_s20 }
  0x4a   :  { %s8495_s23 = scalar_lea.hbm %s9749_s2, 6144 }
  0x4b   :  { %p8496_p4 = scmp.ne.s32.totalorder %s9749_s2, %s8495_s23  ;;  %p8499_p5 = scmp.lt.u32.totalorder %s8495_s23, %s9749_s2 }
  0x4d   :  { %p8501_p6 = pnand %p8499_p5, %p8496_p4 }
  0x4f   :  { %8504 = shalt.err (!%p8501_p6)
}
  0x50   :  { %s8505_s0 = scalar_lea.vmem %s49_s16, 6144  ;;  %p8510_p8 = scmp.lt.s32.totalorder %s49_s16, %s49_s16 }
  0x51   :  { %p8506_p7 = scmp.ne.s32.totalorder %s49_s16, %s8505_s0  ;;  %p8511_p9 = scmp.lt.s32.totalorder %s8505_s0, %s8505_s0 }
  0x53   :  { %p8512_p10 = por %p8511_p9, %p8510_p8 }
  0x55   :  { %p8513_p11 = pnand %p8512_p10, %p8506_p7 }
  0x57   :  { %8516 = shalt.err (!%p8513_p11)
}
  0x58   :  { %54 = dma.hbm_to_vmem [thread:$0]  %s9749_s2, 6144, %s49_s16, [#allocation7], %s8619_s17, %s8619_s17, %s8620_s18  }
  0x59   :  { %s8517_s1 = scalar_lea.hbm %s9751_s4, 49152 }
  0x5a   :  { %p8518_p12 = scmp.ne.s32.totalorder %s9751_s4, %s8517_s1  ;;  %p8521_p13 = scmp.lt.u32.totalorder %s8517_s1, %s9751_s4 }
  0x5c   :  { %p8523_p0 = pnand %p8521_p13, %p8518_p12 }
  0x5e   :  { %8526 = shalt.err (!%p8523_p0)
}
  0x5f   :  { %s8527_s5 = scalar_lea.vmem %s8750_s20, 49152  ;;  %p8532_p2 = scmp.lt.s32.totalorder %s8750_s20, %s8750_s20 }
  0x60   :  { %p8528_p1 = scmp.ne.s32.totalorder %s8750_s20, %s8527_s5  ;;  %p8533_p3 = scmp.lt.s32.totalorder %s8527_s5, %s8527_s5 }
  0x62   :  { %p8534_p4 = por %p8533_p3, %p8532_p2 }
  0x64   :  { %p8535_p5 = pnand %p8534_p4, %p8528_p1 }
  0x66   :  { %8538 = shalt.err (!%p8535_p5)
}
  0x67   :  { %s8627_s2 = smov 256   ;;  %s8628_s16 = smov [#allocation14]  }
  0x68   :  { %78 = dma.hbm_to_vmem [thread:$0]  %s9751_s4, 49152, %s8750_s20, [#allocation10], %s8627_s2, %s8627_s2, %s8621_s28  }
  0x69   :  { %s94_s19 = sshll.u32 %s8628_s16, 4  ;;  %s8629_s21 = smov [#allocation15]   ;;  %s95_s19 = int_to_ptr.vmem [resolvable:$true] %s94_s19 }
  0x6a   :  { %s107_s22 = sshll.u32 %s8629_s21, 4  ;;  %s8539_s3 = scalar_lea.hbm %s9753_s6, 4096  ;;  %s108_s22 = int_to_ptr.vmem [resolvable:$true] %s107_s22 }
  0x6b   :  { %p8540_p6 = scmp.ne.s32.totalorder %s9753_s6, %s8539_s3  ;;  %p8543_p7 = scmp.lt.u32.totalorder %s8539_s3, %s9753_s6 }
  0x6d   :  { %p8545_p8 = pnand %p8543_p7, %p8540_p6 }
  0x6f   :  { %8548 = shalt.err (!%p8545_p8)
}
  0x70   :  { %s8549_s4 = scalar_lea.vmem %s95_s19, 4096  ;;  %p8554_p10 = scmp.lt.s32.totalorder %s95_s19, %s95_s19 }
  0x71   :  { %p8550_p9 = scmp.ne.s32.totalorder %s95_s19, %s8549_s4  ;;  %p8555_p11 = scmp.lt.s32.totalorder %s8549_s4, %s8549_s4 }
  0x73   :  { %p8556_p12 = por %p8555_p11, %p8554_p10 }
  0x75   :  { %p8557_p13 = pnand %p8556_p12, %p8550_p9 }
  0x77   :  { %8560 = shalt.err (!%p8557_p13)
}
  0x78   :  { %100 = dma.hbm_to_vmem [thread:$0]  %s9753_s6, 4096, %s95_s19, [#allocation13], %s8619_s17, %s8619_s17, %s8620_s18  }
  0x79   :  { %s8561_s29 = scalar_lea.hbm %s9754_s7, 16 }
  0x7a   :  { %p8562_p0 = scmp.ne.s32.totalorder %s9754_s7, %s8561_s29  ;;  %p8565_p1 = scmp.lt.u32.totalorder %s8561_s29, %s9754_s7 }
  0x7c   :  { %p8567_p2 = pnand %p8565_p1, %p8562_p0 }
  0x7e   :  { %8570 = shalt.err (!%p8567_p2)
}
  0x7f   :  { %s8571_s12 = scalar_lea.vmem %s108_s22, 16  ;;  %s8575_s5 = scalar_lea.vmem %s108_s22, 32 }
  0x80   :  { %p8572_p3 = scmp.ne.s32.totalorder %s108_s22, %s8571_s12  ;;  %p8576_p4 = scmp.lt.s32.totalorder %s108_s22, %s108_s22 }
  0x81   :  { %p8577_p5 = scmp.lt.s32.totalorder %s8575_s5, %s8571_s12 }
  0x83   :  { %p8578_p6 = por %p8577_p5, %p8576_p4 }
  0x85   :  { %p8579_p7 = pnand %p8578_p6, %p8572_p3 }
  0x87   :  { %8582 = shalt.err (!%p8579_p7)
}
  0x88   :  { %110 = dma.hbm_to_vmem [thread:$0]  %s9754_s7, 16, %s108_s22, [#allocation16]  }
  0x89   :  { %8605 = dma.done.wait [#allocation4], 1536  }
  0x8a   :  { %8606 = vsyncadd [#allocation4], 4294965760 }
  0x8b   :  { %8607 = dma.done.wait [#allocation7], 12288  }
  0x8c   :  { %8608 = vsyncadd [#allocation7], 4294955008 }
  0x8d   :  { %8609 = dma.done.wait [#allocation10], 49200  }
  0x8e   :  { %8610 = vsyncadd [#allocation10], 4294918096 }
  0x8f   :  { %8611 = dma.done.wait [#allocation13], 4128  }
  0x90   :  { %8612 = vsyncadd [#allocation13], 4294963168 }
  0x91   :  { %8613 = dma.done.wait [#allocation16], 16  }
  0x92   :  { %8614 = vsyncadd [#allocation16], 4294967280  ;;  %v8630_v0 = vmov 0.0|0.0   ;;  %vm8631_vm0 = vmmov 0   ;;  %v8632_v1 = vmov 0.0   ;;  %v135_v2 = vld [vmem:[#allocation6] sm:$0xff] }
  0x93   :  { %6950 = vmatprep.subr.bf16.mxu1 %v8630_v0  ;;  %5590 = vmatprep.mubr.msk.f32.mxu1 %vm8631_vm0, %v8632_v1  ;;  %v136_v3 = vld [vmem:[#allocation6 + $0x8] sm:$0xff]  ;;  %v151_v4 = vld [vmem:[#allocation8] sm:$0xff]  ;;  %v137_v7 = vld [vmem:[#allocation6 + $0x10] sm:$0xff]  ;;  %s8633_s7 = smov [#allocation17]  }
  0x94   :  { %v6918_v5 = vpack.c.bf16 %v136_v3, %v135_v2  ;;  %v152_v6 = vld [vmem:[#allocation8 + $0x8] sm:$0xff]  ;;  %v138_v8 = vld [vmem:[#allocation6 + $0x18] sm:$0xff]  ;;  %v153_v11 = vld [vmem:[#allocation8 + $0x10] sm:$0xff]  ;;  %s4760_s18 = sshll.u32 %s8633_s7, 4  ;;  %s4761_s18 = int_to_ptr.vmem [resolvable:$true] %s4760_s18 }
  0x95   :  { %v8815_v9 = vpack.c.bf16 %v152_v6, %v151_v4  ;;  %v6922_v10 = vpack.c.bf16 %v138_v8, %v137_v7  ;;  %v154_v12 = vld [vmem:[#allocation8 + $0x18] sm:$0xff]  ;;  %v139_v13 = vld [vmem:[#allocation6 + $0x20] sm:$0xff]  ;;  %v140_v14 = vld [vmem:[#allocation6 + $0x28] sm:$0xff]  ;;  %s8583_s2 = scalar_lea.vmem %s4761_s18, 128  ;;  %p8588_p9 = scmp.lt.s32.totalorder %s4761_s18, %s4761_s18 }
  0x96   :  { %6919 = vmatprep.subr.bf16.mxu0 %v6918_v5  ;;  %v8818_v15 = vpack.c.bf16 %v154_v12, %v153_v11  ;;  %v6926_v16 = vpack.c.bf16 %v140_v14, %v139_v13  ;;  %v155_v17 = vld [vmem:[#allocation8 + $0x20] sm:$0xff]  ;;  %v156_v18 = vld [vmem:[#allocation8 + $0x28] sm:$0xff]  ;;  %v141_v19 = vld [vmem:[#allocation6 + $0x30] sm:$0xff]  ;;  %p8584_p8 = scmp.ne.s32.totalorder %s4761_s18, %s8583_s2  ;;  %p8589_p10 = scmp.lt.s32.totalorder %s8583_s2, %s8583_s2 }
  0x97   :  { %6921 = vmatpush3.bf16.msra.mxu0 %v6918_v5  ;;  %6952 = vmatpush3.bf16.msra.mxu1 %v8815_v9  ;;  %v142_v20 = vld [vmem:[#allocation6 + $0x38] sm:$0xff]  ;;  %v8822_v21 = vpack.c.bf16 %v156_v18, %v155_v17  ;;  %v157_v23 = vld [vmem:[#allocation8 + $0x30] sm:$0xff]  ;;  %v143_v25 = vld [vmem:[#allocation6 + $0x40] sm:$0xff] }
  0x98   :  { %6923 = vmatprep.subr.bf16.mxu0 %v6922_v10  ;;  %6953 = vmatprep.subr.bf16.mxu1 %v8630_v0  ;;  %v6930_v22 = vpack.c.bf16 %v142_v20, %v141_v19  ;;  %v158_v24 = vld [vmem:[#allocation8 + $0x38] sm:$0xff]  ;;  %v144_v26 = vld [vmem:[#allocation6 + $0x48] sm:$0xff]  ;;  %v167_v27 = vld [vmem:[#allocation3] sm:$0xff]  ;;  %p8590_p11 = por %p8589_p10, %p8588_p9 }
  0x99   :  { %5540 = vmatprep.mubr.f32.mxu0 %v167_v27  ;;  %v8826_v28 = vpack.c.bf16 %v158_v24, %v157_v23  ;;  %v6934_v29 = vpack.c.bf16 %v144_v26, %v143_v25  ;;  %v159_v30 = vld [vmem:[#allocation8 + $0x40] sm:$0xff]  ;;  %v160_v31 = vld [vmem:[#allocation8 + $0x48] sm:$0xff]  ;;  %v145_v32 = vld [vmem:[#allocation6 + $0x50] sm:$0xff] }
  0x9a   :  { %v146_v33 = vld [vmem:[#allocation6 + $0x58] sm:$0xff]  ;;  %v8830_v34 = vpack.c.bf16 %v160_v31, %v159_v30  ;;  %v161_v36 = vld [vmem:[#allocation8 + $0x50] sm:$0xff]  ;;  %v147_v38 = vld [vmem:[#allocation6 + $0x60] sm:$0xff]  ;;  %p8591_p12 = pnand %p8590_p11, %p8584_p8 }
  0x9b   :  { %6925 = vmatpush3.bf16.msra.mxu0 %v6922_v10  ;;  %6955 = vmatpush3.bf16.msra.mxu1 %v8818_v15  ;;  %v6938_v35 = vpack.c.bf16 %v146_v33, %v145_v32  ;;  %v162_v37 = vld [vmem:[#allocation8 + $0x58] sm:$0xff]  ;;  %v148_v39 = vld [vmem:[#allocation6 + $0x68] sm:$0xff]  ;;  %v163_v42 = vld [vmem:[#allocation8 + $0x60] sm:$0xff] }
  0x9c   :  { %6927 = vmatprep.subr.bf16.mxu0 %v6926_v16  ;;  %6956 = vmatprep.subr.bf16.mxu1 %v8630_v0  ;;  %v8834_v40 = vpack.c.bf16 %v162_v37, %v161_v36  ;;  %v6942_v41 = vpack.c.bf16 %v148_v39, %v147_v38  ;;  %v164_v43 = vld [vmem:[#allocation8 + $0x68] sm:$0xff]  ;;  %v149_v44 = vld [vmem:[#allocation6 + $0x70] sm:$0xff]  ;;  %v150_v45 = vld [vmem:[#allocation6 + $0x78] sm:$0xff] }
  0x9d   :  { %v8838_v46 = vpack.c.bf16 %v164_v43, %v163_v42  ;;  %v6946_v47 = vpack.c.bf16 %v150_v45, %v149_v44  ;;  %v165_v48 = vld [vmem:[#allocation8 + $0x70] sm:$0xff]  ;;  %v166_v49 = vld [vmem:[#allocation8 + $0x78] sm:$0xff]  ;;  %v168_v51 = vld [vmem:[#allocation3 + $0x8] sm:$0xff] }
  0x9e   :  { %v8842_v50 = vpack.c.bf16 %v166_v49, %v165_v48  ;;  %v169_v52 = vld [vmem:[#allocation3 + $0x10] sm:$0xff]  ;;  %v170_v53 = vld [vmem:[#allocation3 + $0x18] sm:$0xff]  ;;  %v171_v54 = vld [vmem:[#allocation3 + $0x20] sm:$0xff] }
  0x9f   :  { %6929 = vmatpush3.bf16.msra.mxu0 %v6926_v16  ;;  %6958 = vmatpush3.bf16.msra.mxu1 %v8822_v21  ;;  %v172_v55 = vld [vmem:[#allocation3 + $0x28] sm:$0xff]  ;;  %v173_v56 = vld [vmem:[#allocation3 + $0x30] sm:$0xff]  ;;  %v174_v57 = vld [vmem:[#allocation3 + $0x38] sm:$0xff] }
  0xa0   :  { %6931 = vmatprep.subr.bf16.mxu0 %v6930_v22  ;;  %6959 = vmatprep.subr.bf16.mxu1 %v8630_v0  ;;  %v175_v58 = vld [vmem:[#allocation3 + $0x40] sm:$0xff]  ;;  %v176_v59 = vld [vmem:[#allocation3 + $0x48] sm:$0xff]  ;;  %v177_v60 = vld [vmem:[#allocation3 + $0x50] sm:$0xff] }
  0xa1   :  { %v178_v61 = vld [vmem:[#allocation3 + $0x58] sm:$0xff]  ;;  %v8885_v62 = vld [vmem:[#allocation9] ss:$0 sm:$0xff] }
  0xa3   :  { %6933 = vmatpush3.bf16.msra.mxu0 %v6930_v22  ;;  %6961 = vmatpush3.bf16.msra.mxu1 %v8826_v28 }
  0xa4   :  { %6935 = vmatprep.subr.bf16.mxu0 %v6934_v29  ;;  %6962 = vmatprep.subr.bf16.mxu1 %v8630_v0 }
  0xa7   :  { %6937 = vmatpush3.bf16.msra.mxu0 %v6934_v29  ;;  %6964 = vmatpush3.bf16.msra.mxu1 %v8830_v34 }
  0xa8   :  { %6939 = vmatprep.subr.bf16.mxu0 %v6938_v35  ;;  %6965 = vmatprep.subr.bf16.mxu1 %v8630_v0 }
  0xab   :  { %6941 = vmatpush3.bf16.msra.mxu0 %v6938_v35  ;;  %6967 = vmatpush3.bf16.msra.mxu1 %v8834_v40 }
  0xac   :  { %6943 = vmatprep.subr.bf16.mxu0 %v6942_v41  ;;  %6968 = vmatprep.subr.bf16.mxu1 %v8630_v0 }
  0xaf   :  { %6945 = vmatpush3.bf16.msra.mxu0 %v6942_v41  ;;  %6970 = vmatpush3.bf16.msra.mxu1 %v8838_v46 }
  0xb0   :  { %6947 = vmatprep.subr.bf16.mxu0 %v6946_v47  ;;  %6971 = vmatprep.subr.bf16.mxu1 %v8630_v0 }
  0xb3   :  { %6949 = vmatpush3.bf16.msra.mxu0 %v6946_v47  ;;  %6973 = vmatpush3.bf16.msra.mxu1 %v8842_v50 }
  0xb4   :  { %6974 = vmatprep.subr.bf16.mxu0 %v8630_v0  ;;  %6998 = vmatprep.subr.bf16.mxu1 %v8630_v0 }
  0xb6   :  { %5541 = vmatmul.mubr.f32.vlgmr.msra.gmra.mrb[0].mxu0 %v168_v51  ;;  %5591 = vmatmul.mubr.f32.vlgmr.msra.gmra.mrb[0].mxu1 %v8632_v1 }
  0xb7   :  { %6976 = vmatpush3.bf16.msra.mxu0 %v8815_v9  ;;  %5543 = vmatprep.mubr.f32.mxu0 %v169_v52 }
  0xb8   :  { %6977 = vmatprep.subr.bf16.mxu0 %v8630_v0  ;;  %7000 = vmatpush3.bf16.msra.mxu1 %v8815_v9 }
  0xb9   :  { %7001 = vmatprep.subr.bf16.mxu1 %v8630_v0  ;;  %5660 = vmatprep.mubr.msk.f32.mxu1 %vm8631_vm0, %v8632_v1 }
  0xba   :  { %5544 = vmatmul.mubr.f32.gmra.mrb[2].mxu0 %v170_v53 }
  0xbb   :  { %6979 = vmatpush3.bf16.msra.mxu0 %v8818_v15  ;;  %5546 = vmatprep.mubr.f32.mxu0 %v171_v54 }
  0xbc   :  { %6980 = vmatprep.subr.bf16.mxu0 %v8630_v0  ;;  %7003 = vmatpush3.bf16.msra.mxu1 %v8818_v15 }
  0xbd   :  { %7004 = vmatprep.subr.bf16.mxu1 %v8630_v0 }
  0xbe   :  { %5547 = vmatmul.mubr.f32.gmra.mrb[4].mxu0 %v172_v55 }
  0xbf   :  { %6982 = vmatpush3.bf16.msra.mxu0 %v8822_v21  ;;  %5549 = vmatprep.mubr.f32.mxu0 %v173_v56 }
  0xc0   :  { %6983 = vmatprep.subr.bf16.mxu0 %v8630_v0  ;;  %7006 = vmatpush3.bf16.msra.mxu1 %v8822_v21 }
  0xc1   :  { %7007 = vmatprep.subr.bf16.mxu1 %v8630_v0 }
  0xc2   :  { %5550 = vmatmul.mubr.f32.gmra.mrb[6].mxu0 %v174_v57 }
  0xc3   :  { %6985 = vmatpush3.bf16.msra.mxu0 %v8826_v28  ;;  %5552 = vmatprep.mubr.f32.mxu0 %v175_v58 }
  0xc4   :  { %6986 = vmatprep.subr.bf16.mxu0 %v8630_v0  ;;  %7009 = vmatpush3.bf16.msra.mxu1 %v8826_v28 }
  0xc5   :  { %7010 = vmatprep.subr.bf16.mxu1 %v8630_v0 }
  0xc6   :  { %5553 = vmatmul.mubr.f32.gmra.mrb[8].mxu0 %v176_v59 }
  0xc7   :  { %6988 = vmatpush3.bf16.msra.mxu0 %v8830_v34  ;;  %5555 = vmatprep.mubr.f32.mxu0 %v177_v60 }
  0xc8   :  { %6989 = vmatprep.subr.bf16.mxu0 %v8630_v0  ;;  %7012 = vmatpush3.bf16.msra.mxu1 %v8830_v34 }
  0xc9   :  { %7013 = vmatprep.subr.bf16.mxu1 %v8630_v0 }
  0xca   :  { %5556 = vmatmul.mubr.f32.gmra.mrb[10].mxu0 %v178_v61 }
  0xcb   :  { %6991 = vmatpush3.bf16.msra.mxu0 %v8834_v40  ;;  %5625 = vmatprep.mubr.msk.f32.mxu0 %vm8631_vm0, %v8632_v1 }
  0xcc   :  { %6992 = vmatprep.subr.bf16.mxu0 %v8630_v0  ;;  %7015 = vmatpush3.bf16.msra.mxu1 %v8834_v40 }
  0xcd   :  { %7016 = vmatprep.subr.bf16.mxu1 %v8630_v0 }
  0xcf   :  { %6994 = vmatpush3.bf16.msra.mxu0 %v8838_v46 }
  0xd0   :  { %6995 = vmatprep.subr.bf16.mxu0 %v8630_v0  ;;  %7018 = vmatpush3.bf16.msra.mxu1 %v8838_v46 }
  0xd1   :  { %7019 = vmatprep.subr.bf16.mxu1 %v8630_v0 }
  0xd3   :  { %6997 = vmatpush3.bf16.msra.mxu0 %v8842_v50 }
  0xd4   :  { %7021 = vmatpush3.bf16.msra.mxu1 %v8842_v50  ;;  %7022 = vmatprep.subr.bf16.mxu0 %v8630_v0 }
  0xd5   :  { %7046 = vmatprep.subr.bf16.mxu1 %v8630_v0 }
 0x189   :  { %v5542_v63 = vpop.f32.mrb[0].mxu0  ;;  %v390_v2 = vpop.f32.mrb[0].mxu1 }
 0x18a   :  { %v252_v3 = vpop.f32.mrb[1].mxu0  ;;  %v5592_v4 = vpop.f32.mrb[1].mxu1  ;;  %v258_v20 = vadd.f32 %v5542_v63, %v8885_v62 }
 0x18b   :  { %v253_v5 = vadd.f32 %v8885_v62, %v252_v3 }
 0x18d   :  { %v394_v6 = vadd.f32 %v390_v2, %v253_v5  ;;  %v8888_v7 = vpop.f32.mrb[2].mxu0 }
 0x18e   :  { %v262_v8 = vpop.f32.mrb[3].mxu0  ;;  %v268_v32 = vadd.f32 %v8888_v7, %v8885_v62  ;;  %v1215_v7 = vld [vmem:[#allocation6 + $0x98] sm:$0xff] }
 0x18f   :  { %8333 = vtanh.f32 %v394_v6  ;;  %v263_v26 = vadd.f32 %v8885_v62, %v262_v8  ;;  %v1214_v6 = vld [vmem:[#allocation6 + $0x90] sm:$0xff] }
 0x191   :  { %v8911_v11 = vpop.f32.mrb[4].mxu0 }
 0x192   :  { %v8913_v12 = vpop.f32.mrb[5].mxu0  ;;  %v278_v44 = vadd.f32 %v8911_v11, %v8885_v62  ;;  %v1216_v11 = vld [vmem:[#allocation6 + $0xa0] sm:$0xff] }
 0x193   :  { %v273_v38 = vadd.f32 %v8885_v62, %v8913_v12  ;;  %v1217_v12 = vld [vmem:[#allocation6 + $0xa8] sm:$0xff] }
 0x195   :  { %v8915_v13 = vpop.f32.mrb[6].mxu0 }
 0x196   :  { %v8917_v14 = vpop.f32.mrb[7].mxu0  ;;  %v288_v56 = vadd.f32 %v8915_v13, %v8885_v62  ;;  %v1218_v13 = vld [vmem:[#allocation6 + $0xb0] sm:$0xff] }
 0x197   :  { %v283_v51 = vadd.f32 %v8885_v62, %v8917_v14  ;;  %v1219_v14 = vld [vmem:[#allocation6 + $0xb8] sm:$0xff] }
 0x199   :  { %v8890_v10 = vpop.eup %8333  ;;  %v8919_v16 = vpop.f32.mrb[8].mxu0 }
 0x19a   :  { %5626 = vmatmul.mubr.f32.vlgmr.msra.gmra.mrb[12].mxu0 %v8890_v10  ;;  %v8921_v17 = vpop.f32.mrb[9].mxu0 }
 0x19b   :  { %7024 = vmatpush3.bf16.msra.mxu0 %v8815_v9  ;;  %5695 = vmatprep.mubr.msk.f32.mxu0 %vm8631_vm0, %v8632_v1  ;;  %v293_v61 = vadd.f32 %v8885_v62, %v8921_v17  ;;  %v1220_v17 = vld [vmem:[#allocation6 + $0xc0] sm:$0xff] }
 0x19c   :  { %7025 = vmatprep.subr.bf16.mxu0 %v8630_v0 }
 0x19d   :  { %v8923_v18 = vpop.f32.mrb[10].mxu0 }
 0x19e   :  { %v8925_v19 = vpop.f32.mrb[11].mxu0 }
 0x19f   :  { %7027 = vmatpush3.bf16.msra.mxu0 %v8818_v15 }
 0x1a0   :  { %7028 = vmatprep.subr.bf16.mxu0 %v8630_v0 }
 0x1a3   :  { %7030 = vmatpush3.bf16.msra.mxu0 %v8822_v21 }
 0x1a4   :  { %7031 = vmatprep.subr.bf16.mxu0 %v8630_v0 }
 0x1a7   :  { %7033 = vmatpush3.bf16.msra.mxu0 %v8826_v28 }
 0x1a8   :  { %7034 = vmatprep.subr.bf16.mxu0 %v8630_v0 }
 0x1ab   :  { %7036 = vmatpush3.bf16.msra.mxu0 %v8830_v34 }
 0x1ac   :  { %7037 = vmatprep.subr.bf16.mxu0 %v8630_v0 }
 0x1af   :  { %7039 = vmatpush3.bf16.msra.mxu0 %v8834_v40 }
 0x1b0   :  { %7040 = vmatprep.subr.bf16.mxu0 %v8630_v0 }
 0x1b3   :  { %7042 = vmatpush3.bf16.msra.mxu0 %v8838_v46 }
 0x1b4   :  { %7043 = vmatprep.subr.bf16.mxu0 %v8630_v0 }
 0x1b7   :  { %7045 = vmatpush3.bf16.msra.mxu0 %v8842_v50 }
 0x1b8   :  { %7070 = vmatprep.subr.bf16.mxu0 %v8630_v0 }
 0x26d   :  { %v464_v22 = vpop.f32.mrb[12].mxu0 }
 0x26e   :  { %v468_v23 = vadd.f32 %v464_v22, %v258_v20  ;;  %v5627_v24 = vpop.f32.mrb[13].mxu0  ;;  %v1221_v20 = vld [vmem:[#allocation6 + $0xc8] sm:$0xff] }
 0x26f   :  { %v7254_v22 = vpack.c.bf16 %v1221_v20, %v1220_v17  ;;  %v1223_v24 = vld [vmem:[#allocation6 + $0xd8] sm:$0xff] }
 0x270   :  { %8335 = vtanh.f32 %v468_v23  ;;  %v1222_v23 = vld [vmem:[#allocation6 + $0xd0] sm:$0xff] }
 0x27a   :  { %v8928_v25 = vpop.eup %8335 }
 0x27b   :  { %5661 = vmatmul.mubr.f32.vlgmr.msra.gmra.mrb[2].mxu1 %v8928_v25 }
 0x27c   :  { %7048 = vmatpush3.bf16.msra.mxu1 %v8815_v9  ;;  %5730 = vmatprep.mubr.msk.f32.mxu1 %vm8631_vm0, %v8632_v1 }
 0x27d   :  { %7049 = vmatprep.subr.bf16.mxu1 %v8630_v0 }
 0x280   :  { %7051 = vmatpush3.bf16.msra.mxu1 %v8818_v15 }
 0x281   :  { %7052 = vmatprep.subr.bf16.mxu1 %v8630_v0 }
 0x284   :  { %7054 = vmatpush3.bf16.msra.mxu1 %v8822_v21 }
 0x285   :  { %7055 = vmatprep.subr.bf16.mxu1 %v8630_v0 }
 0x288   :  { %7057 = vmatpush3.bf16.msra.mxu1 %v8826_v28 }
 0x289   :  { %7058 = vmatprep.subr.bf16.mxu1 %v8630_v0 }
 0x28c   :  { %7060 = vmatpush3.bf16.msra.mxu1 %v8830_v34 }
 0x28d   :  { %7061 = vmatprep.subr.bf16.mxu1 %v8630_v0 }
 0x290   :  { %7063 = vmatpush3.bf16.msra.mxu1 %v8834_v40 }
 0x291   :  { %7064 = vmatprep.subr.bf16.mxu1 %v8630_v0 }
 0x294   :  { %7066 = vmatpush3.bf16.msra.mxu1 %v8838_v46 }
 0x295   :  { %7067 = vmatprep.subr.bf16.mxu1 %v8630_v0 }
 0x298   :  { %7069 = vmatpush3.bf16.msra.mxu1 %v8842_v50 }
 0x299   :  { %7094 = vmatprep.subr.bf16.mxu1 %v8630_v0 }
 0x34e   :  { %v538_v27 = vpop.f32.mrb[2].mxu1 }
 0x34f   :  { %v542_v29 = vadd.f32 %v538_v27, %v263_v26  ;;  %v5662_v30 = vpop.f32.mrb[3].mxu1  ;;  %v7258_v26 = vpack.c.bf16 %v1223_v24, %v1222_v23  ;;  %v1224_v27 = vld [vmem:[#allocation6 + $0xe0] sm:$0xff] }
 0x350   :  { %v1226_v30 = vld [vmem:[#allocation6 + $0xf0] sm:$0xff] }
 0x351   :  { %8337 = vtanh.f32 %v542_v29  ;;  %v1225_v29 = vld [vmem:[#allocation6 + $0xe8] sm:$0xff] }
 0x35b   :  { %v8950_v31 = vpop.eup %8337 }
 0x35c   :  { %5696 = vmatmul.mubr.f32.vlgmr.msra.gmra.mrb[14].mxu0 %v8950_v31 }
 0x35d   :  { %7072 = vmatpush3.bf16.msra.mxu0 %v8815_v9  ;;  %5765 = vmatprep.mubr.msk.f32.mxu0 %vm8631_vm0, %v8632_v1 }
 0x35e   :  { %7073 = vmatprep.subr.bf16.mxu0 %v8630_v0 }
 0x361   :  { %7075 = vmatpush3.bf16.msra.mxu0 %v8818_v15 }
 0x362   :  { %7076 = vmatprep.subr.bf16.mxu0 %v8630_v0 }
 0x365   :  { %7078 = vmatpush3.bf16.msra.mxu0 %v8822_v21 }
 0x366   :  { %7079 = vmatprep.subr.bf16.mxu0 %v8630_v0 }
 0x369   :  { %7081 = vmatpush3.bf16.msra.mxu0 %v8826_v28 }
 0x36a   :  { %7082 = vmatprep.subr.bf16.mxu0 %v8630_v0 }
 0x36d   :  { %7084 = vmatpush3.bf16.msra.mxu0 %v8830_v34 }
 0x36e   :  { %7085 = vmatprep.subr.bf16.mxu0 %v8630_v0 }
 0x371   :  { %7087 = vmatpush3.bf16.msra.mxu0 %v8834_v40 }
 0x372   :  { %7088 = vmatprep.subr.bf16.mxu0 %v8630_v0 }
 0x375   :  { %7090 = vmatpush3.bf16.msra.mxu0 %v8838_v46 }
 0x376   :  { %7091 = vmatprep.subr.bf16.mxu0 %v8630_v0 }
 0x379   :  { %7093 = vmatpush3.bf16.msra.mxu0 %v8842_v50 }
 0x37a   :  { %7118 = vmatprep.subr.bf16.mxu0 %v8630_v0 }
 0x42f   :  { %v612_v33 = vpop.f32.mrb[14].mxu0 }
 0x430   :  { %v616_v35 = vadd.f32 %v612_v33, %v268_v32  ;;  %v5697_v36 = vpop.f32.mrb[15].mxu0  ;;  %v1227_v32 = vld [vmem:[#allocation6 + $0xf8] sm:$0xff] }
 0x431   :  { %v7266_v33 = vpack.c.bf16 %v1227_v32, %v1226_v30  ;;  %v1230_v36 = vld [vmem:[#allocation8 + $0x88] sm:$0xff] }
 0x432   :  { %8339 = vtanh.f32 %v616_v35  ;;  %v1229_v35 = vld [vmem:[#allocation8 + $0x80] sm:$0xff] }
 0x43c   :  { %v8973_v37 = vpop.eup %8339 }
 0x43d   :  { %5731 = vmatmul.mubr.f32.vlgmr.msra.gmra.mrb[4].mxu1 %v8973_v37 }
 0x43e   :  { %7096 = vmatpush3.bf16.msra.mxu1 %v8815_v9  ;;  %5800 = vmatprep.mubr.msk.f32.mxu1 %vm8631_vm0, %v8632_v1 }
 0x43f   :  { %7097 = vmatprep.subr.bf16.mxu1 %v8630_v0 }
 0x442   :  { %7099 = vmatpush3.bf16.msra.mxu1 %v8818_v15 }
 0x443   :  { %7100 = vmatprep.subr.bf16.mxu1 %v8630_v0 }
 0x446   :  { %7102 = vmatpush3.bf16.msra.mxu1 %v8822_v21 }
 0x447   :  { %7103 = vmatprep.subr.bf16.mxu1 %v8630_v0 }
 0x44a   :  { %7105 = vmatpush3.bf16.msra.mxu1 %v8826_v28 }
 0x44b   :  { %7106 = vmatprep.subr.bf16.mxu1 %v8630_v0 }
 0x44e   :  { %7108 = vmatpush3.bf16.msra.mxu1 %v8830_v34 }
 0x44f   :  { %7109 = vmatprep.subr.bf16.mxu1 %v8630_v0 }
 0x452   :  { %7111 = vmatpush3.bf16.msra.mxu1 %v8834_v40 }
 0x453   :  { %7112 = vmatprep.subr.bf16.mxu1 %v8630_v0 }
 0x456   :  { %7114 = vmatpush3.bf16.msra.mxu1 %v8838_v46 }
 0x457   :  { %7115 = vmatprep.subr.bf16.mxu1 %v8630_v0 }
 0x45a   :  { %7117 = vmatpush3.bf16.msra.mxu1 %v8842_v50 }
 0x45b   :  { %7142 = vmatprep.subr.bf16.mxu1 %v8630_v0 }
 0x510   :  { %v686_v39 = vpop.f32.mrb[4].mxu1 }
 0x511   :  { %v690_v41 = vadd.f32 %v686_v39, %v273_v38  ;;  %v5732_v42 = vpop.f32.mrb[5].mxu1  ;;  %v9120_v38 = vpack.c.bf16 %v1230_v36, %v1229_v35  ;;  %v1233_v39 = vld [vmem:[#allocation8 + $0xa0] sm:$0xff] }
 0x513   :  { %8341 = vtanh.f32 %v690_v41  ;;  %v1234_v41 = vld [vmem:[#allocation8 + $0xa8] sm:$0xff] }
 0x514   :  { %v9128_v42 = vpack.c.bf16 %v1234_v41, %v1233_v39 }
 0x51d   :  { %v8996_v43 = vpop.eup %8341 }
 0x51e   :  { %5766 = vmatmul.mubr.f32.vlgmr.msra.gmra.mrb[16].mxu0 %v8996_v43 }
 0x51f   :  { %7120 = vmatpush3.bf16.msra.mxu0 %v8815_v9  ;;  %5835 = vmatprep.mubr.msk.f32.mxu0 %vm8631_vm0, %v8632_v1 }
 0x520   :  { %7121 = vmatprep.subr.bf16.mxu0 %v8630_v0 }
 0x523   :  { %7123 = vmatpush3.bf16.msra.mxu0 %v8818_v15 }
 0x524   :  { %7124 = vmatprep.subr.bf16.mxu0 %v8630_v0 }
 0x527   :  { %7126 = vmatpush3.bf16.msra.mxu0 %v8822_v21 }
 0x528   :  { %7127 = vmatprep.subr.bf16.mxu0 %v8630_v0 }
 0x52b   :  { %7129 = vmatpush3.bf16.msra.mxu0 %v8826_v28 }
 0x52c   :  { %7130 = vmatprep.subr.bf16.mxu0 %v8630_v0 }
 0x52f   :  { %7132 = vmatpush3.bf16.msra.mxu0 %v8830_v34 }
 0x530   :  { %7133 = vmatprep.subr.bf16.mxu0 %v8630_v0 }
 0x533   :  { %7135 = vmatpush3.bf16.msra.mxu0 %v8834_v40 }
 0x534   :  { %7136 = vmatprep.subr.bf16.mxu0 %v8630_v0 }
 0x537   :  { %7138 = vmatpush3.bf16.msra.mxu0 %v8838_v46 }
 0x538   :  { %7139 = vmatprep.subr.bf16.mxu0 %v8630_v0 }
 0x53b   :  { %7141 = vmatpush3.bf16.msra.mxu0 %v8842_v50 }
 0x53c   :  { %7166 = vmatprep.subr.bf16.mxu0 %v8630_v0 }
 0x5f1   :  { %v760_v45 = vpop.f32.mrb[16].mxu0 }
 0x5f2   :  { %v764_v47 = vadd.f32 %v760_v45, %v278_v44  ;;  %v5767_v48 = vpop.f32.mrb[17].mxu0  ;;  %v1236_v44 = vld [vmem:[#allocation8 + $0xb8] sm:$0xff] }
 0x5f3   :  { %v1238_v48 = vld [vmem:[#allocation8 + $0xc8] sm:$0xff] }
 0x5f4   :  { %8343 = vtanh.f32 %v764_v47  ;;  %v1237_v47 = vld [vmem:[#allocation8 + $0xc0] sm:$0xff] }
 0x5fe   :  { %v9019_v49 = vpop.eup %8343 }
 0x5ff   :  { %5801 = vmatmul.mubr.f32.vlgmr.msra.gmra.mrb[6].mxu1 %v9019_v49 }
 0x600   :  { %7144 = vmatpush3.bf16.msra.mxu1 %v8815_v9  ;;  %5870 = vmatprep.mubr.msk.f32.mxu1 %vm8631_vm0, %v8632_v1 }
 0x601   :  { %7145 = vmatprep.subr.bf16.mxu1 %v8630_v0 }
 0x604   :  { %7147 = vmatpush3.bf16.msra.mxu1 %v8818_v15 }
 0x605   :  { %7148 = vmatprep.subr.bf16.mxu1 %v8630_v0 }
 0x608   :  { %7150 = vmatpush3.bf16.msra.mxu1 %v8822_v21 }
 0x609   :  { %7151 = vmatprep.subr.bf16.mxu1 %v8630_v0 }
 0x60c   :  { %7153 = vmatpush3.bf16.msra.mxu1 %v8826_v28 }
 0x60d   :  { %7154 = vmatprep.subr.bf16.mxu1 %v8630_v0 }
 0x610   :  { %7156 = vmatpush3.bf16.msra.mxu1 %v8830_v34 }
 0x611   :  { %7157 = vmatprep.subr.bf16.mxu1 %v8630_v0 }
 0x614   :  { %7159 = vmatpush3.bf16.msra.mxu1 %v8834_v40 }
 0x615   :  { %7160 = vmatprep.subr.bf16.mxu1 %v8630_v0 }
 0x618   :  { %7162 = vmatpush3.bf16.msra.mxu1 %v8838_v46 }
 0x619   :  { %7163 = vmatprep.subr.bf16.mxu1 %v8630_v0 }
 0x61c   :  { %7165 = vmatpush3.bf16.msra.mxu1 %v8842_v50 }
 0x61d   :  { %7190 = vmatprep.subr.bf16.mxu1 %v8630_v0 }
 0x6d2   :  { %v834_v52 = vpop.f32.mrb[6].mxu1 }
 0x6d3   :  { %v838_v53 = vadd.f32 %v834_v52, %v283_v51  ;;  %v5802_v54 = vpop.f32.mrb[7].mxu1  ;;  %v1239_v51 = vld [vmem:[#allocation8 + $0xd0] sm:$0xff]  ;;  %v1240_v52 = vld [vmem:[#allocation8 + $0xd8] sm:$0xff] }
 0x6d4   :  { %v1241_v54 = vld [vmem:[#allocation8 + $0xe0] sm:$0xff] }
 0x6d5   :  { %8345 = vtanh.f32 %v838_v53  ;;  %v9140_v53 = vpack.c.bf16 %v1240_v52, %v1239_v51 }
 0x6df   :  { %v9042_v55 = vpop.eup %8345 }
 0x6e0   :  { %5836 = vmatmul.mubr.f32.vlgmr.msra.gmra.mrb[18].mxu0 %v9042_v55 }
 0x6e1   :  { %7168 = vmatpush3.bf16.msra.mxu0 %v8815_v9  ;;  %5905 = vmatprep.mubr.msk.f32.mxu0 %vm8631_vm0, %v8632_v1 }
 0x6e2   :  { %7169 = vmatprep.subr.bf16.mxu0 %v8630_v0 }
 0x6e5   :  { %7171 = vmatpush3.bf16.msra.mxu0 %v8818_v15 }
 0x6e6   :  { %7172 = vmatprep.subr.bf16.mxu0 %v8630_v0 }
 0x6e9   :  { %7174 = vmatpush3.bf16.msra.mxu0 %v8822_v21 }
 0x6ea   :  { %7175 = vmatprep.subr.bf16.mxu0 %v8630_v0 }
 0x6ed   :  { %7177 = vmatpush3.bf16.msra.mxu0 %v8826_v28 }
 0x6ee   :  { %7178 = vmatprep.subr.bf16.mxu0 %v8630_v0 }
 0x6f1   :  { %7180 = vmatpush3.bf16.msra.mxu0 %v8830_v34 }
 0x6f2   :  { %7181 = vmatprep.subr.bf16.mxu0 %v8630_v0 }
 0x6f5   :  { %7183 = vmatpush3.bf16.msra.mxu0 %v8834_v40 }
 0x6f6   :  { %7184 = vmatprep.subr.bf16.mxu0 %v8630_v0 }
 0x6f9   :  { %7186 = vmatpush3.bf16.msra.mxu0 %v8838_v46 }
 0x6fa   :  { %7187 = vmatprep.subr.bf16.mxu0 %v8630_v0 }
 0x6fd   :  { %7189 = vmatpush3.bf16.msra.mxu0 %v8842_v50 }
 0x6fe   :  { %7214 = vmatprep.subr.bf16.mxu0 %v8630_v0 }
 0x7b3   :  { %v908_v57 = vpop.f32.mrb[18].mxu0 }
 0x7b4   :  { %v912_v58 = vadd.f32 %v908_v57, %v288_v56  ;;  %v5837_v59 = vpop.f32.mrb[19].mxu0  ;;  %v1243_v57 = vld [vmem:[#allocation8 + $0xf0] sm:$0xff] }
 0x7b6   :  { %8347 = vtanh.f32 %v912_v58  ;;  %v1244_v58 = vld [vmem:[#allocation8 + $0xf8] sm:$0xff] }
 0x7b7   :  { %v9148_v59 = vpack.c.bf16 %v1244_v58, %v1243_v57 }
 0x7c0   :  { %v9065_v60 = vpop.eup %8347 }
 0x7c1   :  { %5871 = vmatmul.mubr.f32.vlgmr.msra.gmra.mrb[8].mxu1 %v9065_v60 }
 0x7c2   :  { %7192 = vmatpush3.bf16.msra.mxu1 %v8815_v9  ;;  %5940 = vmatprep.mubr.msk.f32.mxu1 %vm8631_vm0, %v8632_v1 }
 0x7c3   :  { %7193 = vmatprep.subr.bf16.mxu1 %v8630_v0 }
 0x7c6   :  { %7195 = vmatpush3.bf16.msra.mxu1 %v8818_v15 }
 0x7c7   :  { %7196 = vmatprep.subr.bf16.mxu1 %v8630_v0 }
 0x7ca   :  { %7198 = vmatpush3.bf16.msra.mxu1 %v8822_v21 }
 0x7cb   :  { %7199 = vmatprep.subr.bf16.mxu1 %v8630_v0 }
 0x7ce   :  { %7201 = vmatpush3.bf16.msra.mxu1 %v8826_v28 }
 0x7cf   :  { %7202 = vmatprep.subr.bf16.mxu1 %v8630_v0 }
 0x7d2   :  { %7204 = vmatpush3.bf16.msra.mxu1 %v8830_v34 }
 0x7d3   :  { %7205 = vmatprep.subr.bf16.mxu1 %v8630_v0 }
 0x7d6   :  { %7207 = vmatpush3.bf16.msra.mxu1 %v8834_v40 }
 0x7d7   :  { %7208 = vmatprep.subr.bf16.mxu1 %v8630_v0 }
 0x7da   :  { %7210 = vmatpush3.bf16.msra.mxu1 %v8838_v46 }
 0x7db   :  { %7211 = vmatprep.subr.bf16.mxu1 %v8630_v0 }
 0x7de   :  { %7213 = vmatpush3.bf16.msra.mxu1 %v8842_v50 }
 0x894   :  { %v982_v63 = vpop.f32.mrb[8].mxu1 }
 0x895   :  { %v986_v2 = vadd.f32 %v982_v63, %v293_v61  ;;  %v5872_v3 = vpop.f32.mrb[9].mxu1 }
 0x897   :  { %8349 = vtanh.f32 %v986_v2 }
 0x8a1   :  { %v9087_v4 = vpop.eup %8349 }
 0x8a2   :  { %5906 = vmatmul.mubr.f32.vlgmr.msra.gmra.mrb[20].mxu0 %v9087_v4 }
 0x8a3   :  { %7216 = vmatpush3.bf16.msra.mxu0 %v8815_v9  ;;  %5975 = vmatprep.mubr.msk.f32.mxu0 %vm8631_vm0, %v8632_v1  ;;  %v1212_v9 = vld [vmem:[#allocation6 + $0x80] sm:$0xff] }
 0x8a4   :  { %7217 = vmatprep.subr.bf16.mxu0 %v8630_v0 }
 0x8a7   :  { %7219 = vmatpush3.bf16.msra.mxu0 %v8818_v15  ;;  %v1213_v15 = vld [vmem:[#allocation6 + $0x88] sm:$0xff] }
 0x8a8   :  { %7220 = vmatprep.subr.bf16.mxu0 %v8630_v0 }
 0x8ab   :  { %7222 = vmatpush3.bf16.msra.mxu0 %v8822_v21  ;;  %v7238_v21 = vpack.c.bf16 %v1213_v15, %v1212_v9 }
 0x8ac   :  { %7223 = vmatprep.subr.bf16.mxu0 %v8630_v0 }
 0x8ad   :  { %7239 = vmatprep.subr.bf16.mxu1 %v7238_v21 }
 0x8af   :  { %7225 = vmatpush3.bf16.msra.mxu0 %v8826_v28  ;;  %v298_v28 = vadd.f32 %v8919_v16, %v8885_v62  ;;  %v7250_v16 = vpack.c.bf16 %v1219_v14, %v1218_v13 }
 0x8b0   :  { %7226 = vmatprep.subr.bf16.mxu0 %v8630_v0 }
 0x8b3   :  { %7228 = vmatpush3.bf16.msra.mxu0 %v8830_v34 }
 0x8b4   :  { %7229 = vmatprep.subr.bf16.mxu0 %v8630_v0 }
 0x8b7   :  { %7231 = vmatpush3.bf16.msra.mxu0 %v8834_v40 }
 0x8b8   :  { %7232 = vmatprep.subr.bf16.mxu0 %v8630_v0 }
 0x8bb   :  { %7234 = vmatpush3.bf16.msra.mxu0 %v8838_v46  ;;  %v7242_v46 = vpack.c.bf16 %v1215_v7, %v1214_v6  ;;  %v308_v7 = vadd.f32 %v8923_v18, %v8885_v62 }
 0x8bc   :  { %7235 = vmatprep.subr.bf16.mxu0 %v8630_v0 }
 0x8bf   :  { %7237 = vmatpush3.bf16.msra.mxu0 %v8842_v50  ;;  %v7246_v50 = vpack.c.bf16 %v1217_v12, %v1216_v11 }
 0x8c0   :  { %7270 = vmatprep.subr.bf16.mxu0 %v8630_v0 }
 0x975   :  { %v1056_v34 = vpop.f32.mrb[20].mxu0 }
 0x976   :  { %v1060_v5 = vadd.f32 %v1056_v34, %v298_v28  ;;  %v5907_v40 = vpop.f32.mrb[21].mxu0 }
 0x978   :  { %8351 = vtanh.f32 %v1060_v5 }
 0x982   :  { %v8352_v8 = vpop.eup %8351 }
 0x983   :  { %5941 = vmatmul.mubr.f32.vlgmr.msra.gmra.mrb[10].mxu1 %v8352_v8 }
 0x984   :  { %7241 = vmatpush3.bf16.msra.mxu1 %v7238_v21  ;;  %6010 = vmatprep.mubr.f32.mxu1 %v8890_v10  ;;  %v7262_v10 = vpack.c.bf16 %v1225_v29, %v1224_v27 }
 0x985   :  { %7243 = vmatprep.subr.bf16.mxu1 %v7242_v46 }
 0x988   :  { %7245 = vmatpush3.bf16.msra.mxu1 %v7242_v46 }
 0x989   :  { %7247 = vmatprep.subr.bf16.mxu1 %v7246_v50 }
 0x98c   :  { %7249 = vmatpush3.bf16.msra.mxu1 %v7246_v50  ;;  %v9213_v50 = vld [vmem:[#allocation9 + $0x1] ss:$0 sm:$0xff] }
 0x98d   :  { %7251 = vmatprep.subr.bf16.mxu1 %v7250_v16 }
 0x990   :  { %7253 = vmatpush3.bf16.msra.mxu1 %v7250_v16 }
 0x991   :  { %7255 = vmatprep.subr.bf16.mxu1 %v7254_v22 }
 0x994   :  { %7257 = vmatpush3.bf16.msra.mxu1 %v7254_v22 }
 0x995   :  { %7259 = vmatprep.subr.bf16.mxu1 %v7258_v26 }
 0x998   :  { %7261 = vmatpush3.bf16.msra.mxu1 %v7258_v26 }
 0x999   :  { %7263 = vmatprep.subr.bf16.mxu1 %v7262_v10 }
 0x99c   :  { %7265 = vmatpush3.bf16.msra.mxu1 %v7262_v10 }
 0x99d   :  { %7267 = vmatprep.subr.bf16.mxu1 %v7266_v33 }
 0x9a0   :  { %7269 = vmatpush3.bf16.msra.mxu1 %v7266_v33 }
 0x9a1   :  { %7294 = vmatprep.subr.bf16.mxu1 %v8630_v0 }
 0x9a3   :  { %6011 = vmatmul.mubr.f32.vlgmr.msra.gmra.mrb[12].mxu1 %v8928_v25  ;;  %v1231_v25 = vld [vmem:[#allocation8 + $0x90] sm:$0xff] }
 0x9a4   :  { %6013 = vmatprep.mubr.f32.mxu1 %v8950_v31  ;;  %7296 = vmatpush3.bf16.msra.mxu1 %v9120_v38  ;;  %v1232_v31 = vld [vmem:[#allocation8 + $0x98] sm:$0xff] }
 0x9a5   :  { %7297 = vmatprep.subr.bf16.mxu1 %v8630_v0 }
 0x9a7   :  { %6014 = vmatmul.mubr.f32.gmra.mrb[14].mxu1 %v8973_v37  ;;  %v9124_v37 = vpack.c.bf16 %v1232_v31, %v1231_v25 }
 0x9a8   :  { %6016 = vmatprep.mubr.f32.mxu1 %v8996_v43  ;;  %v1235_v43 = vld [vmem:[#allocation8 + $0xb0] sm:$0xff] }
 0x9a9   :  { %7299 = vmatpush3.bf16.msra.mxu1 %v9124_v37  ;;  %v9132_v45 = vpack.c.bf16 %v1236_v44, %v1235_v43 }
 0x9aa   :  { %7300 = vmatprep.subr.bf16.mxu1 %v8630_v0 }
 0x9ab   :  { %6017 = vmatmul.mubr.f32.gmra.mrb[16].mxu1 %v9019_v49  ;;  %v9136_v49 = vpack.c.bf16 %v1238_v48, %v1237_v47 }
 0x9ac   :  { %6019 = vmatprep.mubr.f32.mxu1 %v9042_v55  ;;  %v1242_v55 = vld [vmem:[#allocation8 + $0xe8] sm:$0xff] }
 0x9ad   :  { %7302 = vmatpush3.bf16.msra.mxu1 %v9128_v42  ;;  %v9144_v56 = vpack.c.bf16 %v1242_v55, %v1241_v54 }
 0x9ae   :  { %7303 = vmatprep.subr.bf16.mxu1 %v8630_v0 }
 0x9af   :  { %6020 = vmatmul.mubr.f32.gmra.mrb[18].mxu1 %v9065_v60  ;;  %v303_v60 = vadd.f32 %v8885_v62, %v8925_v19 }
 0x9b0   :  { %6022 = vmatprep.mubr.f32.mxu1 %v9087_v4 }
 0x9b1   :  { %7305 = vmatpush3.bf16.msra.mxu1 %v9132_v45 }
 0x9b2   :  { %7306 = vmatprep.subr.bf16.mxu1 %v8630_v0 }
 0x9b3   :  { %6023 = vmatmul.mubr.f32.gmra.mrb[20].mxu1 %v8352_v8 }
 0x9b5   :  { %7308 = vmatpush3.bf16.msra.mxu1 %v9136_v49 }
 0x9b6   :  { %7309 = vmatprep.subr.bf16.mxu1 %v8630_v0 }
 0x9b9   :  { %7311 = vmatpush3.bf16.msra.mxu1 %v9140_v53 }
 0x9ba   :  { %7312 = vmatprep.subr.bf16.mxu1 %v8630_v0 }
 0x9bd   :  { %7314 = vmatpush3.bf16.msra.mxu1 %v9144_v56 }
 0x9be   :  { %7315 = vmatprep.subr.bf16.mxu1 %v8630_v0 }
 0x9c1   :  { %7317 = vmatpush3.bf16.msra.mxu1 %v9148_v59 }
 0x9c2   :  { %7342 = vmatprep.subr.bf16.mxu1 %v8630_v0 }
 0xa56   :  { %v1130_v61 = vpop.f32.mrb[10].mxu1 }
 0xa57   :  { %v1134_v63 = vadd.f32 %v1130_v61, %v303_v60  ;;  %v5942_v2 = vpop.f32.mrb[11].mxu1 }
 0xa59   :  { %8353 = vtanh.f32 %v1134_v63 }
 0xa63   :  { %v8354_v3 = vpop.eup %8353 }
 0xa64   :  { %5976 = vmatmul.mubr.f32.vlgmr.msra.gmra.mrb[22].mxu0 %v8354_v3  ;;  %6025 = vmatprep.mubr.f32.mxu1 %v8354_v3 }
 0xa65   :  { %7272 = vmatpush3.bf16.msra.mxu0 %v9120_v38  ;;  %6060 = vmatprep.mubr.msk.f32.mxu0 %vm8631_vm0, %v8632_v1 }
 0xa66   :  { %7273 = vmatprep.subr.bf16.mxu0 %v8630_v0 }
 0xa69   :  { %7275 = vmatpush3.bf16.msra.mxu0 %v9124_v37 }
 0xa6a   :  { %7276 = vmatprep.subr.bf16.mxu0 %v8630_v0 }
 0xa6d   :  { %7278 = vmatpush3.bf16.msra.mxu0 %v9128_v42 }
 0xa6e   :  { %7279 = vmatprep.subr.bf16.mxu0 %v8630_v0 }
 0xa71   :  { %7281 = vmatpush3.bf16.msra.mxu0 %v9132_v45 }
 0xa72   :  { %7282 = vmatprep.subr.bf16.mxu0 %v8630_v0 }
 0xa75   :  { %7284 = vmatpush3.bf16.msra.mxu0 %v9136_v49 }
 0xa76   :  { %v9165_v19 = vpop.f32.mrb[12].mxu1  ;;  %7285 = vmatprep.subr.bf16.mxu0 %v8630_v0 }
 0xa77   :  { %v1331_v4 = vpop.f32.mrb[13].mxu1  ;;  %v1337_v22 = vadd.f32 %v9165_v19, %v9213_v50 }
 0xa78   :  { %v1332_v13 = vadd.f32 %v9213_v50, %v1331_v4 }
 0xa79   :  { %7287 = vmatpush3.bf16.msra.mxu0 %v9140_v53 }
 0xa7a   :  { %v9169_v9 = vpop.f32.mrb[14].mxu1  ;;  %7288 = vmatprep.subr.bf16.mxu0 %v8630_v0 }
 0xa7b   :  { %v9172_v15 = vpop.f32.mrb[15].mxu1  ;;  %v1347_v35 = vadd.f32 %v9169_v9, %v9213_v50 }
 0xa7c   :  { %v1342_v29 = vadd.f32 %v9213_v50, %v9172_v15 }
 0xa7d   :  { %7290 = vmatpush3.bf16.msra.mxu0 %v9144_v56 }
 0xa7e   :  { %v9175_v21 = vpop.f32.mrb[16].mxu1  ;;  %7291 = vmatprep.subr.bf16.mxu0 %v8630_v0 }
 0xa7f   :  { %v9178_v28 = vpop.f32.mrb[17].mxu1  ;;  %v1357_v51 = vadd.f32 %v9175_v21, %v9213_v50 }
 0xa80   :  { %v1352_v41 = vadd.f32 %v9213_v50, %v9178_v28 }
 0xa81   :  { %7293 = vmatpush3.bf16.msra.mxu0 %v9148_v59 }
 0xa82   :  { %v9181_v34 = vpop.f32.mrb[18].mxu1  ;;  %7318 = vmatprep.subr.bf16.mxu0 %v8630_v0 }
 0xa83   :  { %v9184_v5 = vpop.f32.mrb[19].mxu1  ;;  %v1367_v3 = vadd.f32 %v9181_v34, %v9213_v50 }
 0xa84   :  { %6061 = vmatmul.mubr.f32.vlgmr.msra.gmra.mrb[24].mxu0 %v8632_v1  ;;  %v1362_v58 = vadd.f32 %v9213_v50, %v9184_v5 }
 0xa85   :  { %7320 = vmatpush3.bf16.msra.mxu0 %v9120_v38  ;;  %6130 = vmatprep.mubr.msk.f32.mxu0 %vm8631_vm0, %v8632_v1 }
 0xa86   :  { %v9190_v40 = vpop.f32.mrb[20].mxu1  ;;  %7321 = vmatprep.subr.bf16.mxu0 %v8630_v0 }
 0xa87   :  { %v9193_v6 = vpop.f32.mrb[21].mxu1 }
 0xa88   :  { %v1372_v21 = vadd.f32 %v9213_v50, %v9193_v6 }
 0xa89   :  { %7323 = vmatpush3.bf16.msra.mxu0 %v9124_v37 }
 0xa8a   :  { %7324 = vmatprep.subr.bf16.mxu0 %v8630_v0 }
 0xa8d   :  { %7326 = vmatpush3.bf16.msra.mxu0 %v9128_v42 }
 0xa8e   :  { %7327 = vmatprep.subr.bf16.mxu0 %v8630_v0 }
 0xa91   :  { %7329 = vmatpush3.bf16.msra.mxu0 %v9132_v45 }
 0xa92   :  { %7330 = vmatprep.subr.bf16.mxu0 %v8630_v0 }
 0xa95   :  { %7332 = vmatpush3.bf16.msra.mxu0 %v9136_v49 }
 0xa96   :  { %7333 = vmatprep.subr.bf16.mxu0 %v8630_v0 }
 0xa99   :  { %7335 = vmatpush3.bf16.msra.mxu0 %v9140_v53 }
 0xa9a   :  { %7336 = vmatprep.subr.bf16.mxu0 %v8630_v0 }
 0xa9d   :  { %7338 = vmatpush3.bf16.msra.mxu0 %v9144_v56 }
 0xa9e   :  { %7339 = vmatprep.subr.bf16.mxu0 %v8630_v0 }
 0xaa1   :  { %7341 = vmatpush3.bf16.msra.mxu0 %v9148_v59 }
 0xaa2   :  { %7366 = vmatprep.subr.bf16.mxu0 %v8630_v0 }
 0xb37   :  { %v1204_v46 = vpop.f32.mrb[22].mxu0 }
 0xb38   :  { %v1208_v8 = vadd.f32 %v1204_v46, %v308_v7  ;;  %v5977_v11 = vpop.f32.mrb[23].mxu0  ;;  %v2293_v46 = vld [vmem:[#allocation6 + $0x110] sm:$0xff] }
 0xb3a   :  { %8355 = vtanh.f32 %v1208_v8  ;;  %v2294_v8 = vld [vmem:[#allocation6 + $0x118] sm:$0xff] }
 0xb44   :  { %v8356_v12 = vpop.eup %8355 }
 0xb45   :  { %6026 = vmatmul.mubr.f32.gmra.mrb[22].mxu1 %v8356_v12  ;;  %v2295_v12 = vld [vmem:[#allocation6 + $0x120] sm:$0xff] }
 0xb46   :  { %6095 = vmatprep.mubr.msk.f32.mxu1 %vm8631_vm0, %v8632_v1 }
 0xb57   :  { %v1469_v14 = vpop.f32.mrb[24].mxu0 }
 0xb58   :  { %v1473_v16 = vadd.f32 %v1469_v14, %v1332_v13  ;;  %v6062_v17 = vpop.f32.mrb[25].mxu0  ;;  %v2296_v13 = vld [vmem:[#allocation6 + $0x128] sm:$0xff]  ;;  %v2297_v14 = vld [vmem:[#allocation6 + $0x130] sm:$0xff] }
 0xb59   :  { %v2299_v17 = vld [vmem:[#allocation6 + $0x140] sm:$0xff] }
 0xb5a   :  { %8357 = vtanh.f32 %v1473_v16  ;;  %v2298_v16 = vld [vmem:[#allocation6 + $0x138] sm:$0xff] }
 0xb64   :  { %v9216_v20 = vpop.eup %8357 }
 0xb65   :  { %6096 = vmatmul.mubr.f32.vlgmr.msra.gmra.mrb[24].mxu1 %v9216_v20 }
 0xb66   :  { %7344 = vmatpush3.bf16.msra.mxu1 %v9120_v38  ;;  %6165 = vmatprep.mubr.msk.f32.mxu1 %vm8631_vm0, %v8632_v1 }
 0xb67   :  { %7345 = vmatprep.subr.bf16.mxu1 %v8630_v0 }
 0xb6a   :  { %7347 = vmatpush3.bf16.msra.mxu1 %v9124_v37 }
 0xb6b   :  { %7348 = vmatprep.subr.bf16.mxu1 %v8630_v0 }
 0xb6e   :  { %7350 = vmatpush3.bf16.msra.mxu1 %v9128_v42 }
 0xb6f   :  { %7351 = vmatprep.subr.bf16.mxu1 %v8630_v0 }
 0xb72   :  { %7353 = vmatpush3.bf16.msra.mxu1 %v9132_v45 }
 0xb73   :  { %7354 = vmatprep.subr.bf16.mxu1 %v8630_v0 }
 0xb76   :  { %7356 = vmatpush3.bf16.msra.mxu1 %v9136_v49 }
 0xb77   :  { %7357 = vmatprep.subr.bf16.mxu1 %v8630_v0 }
 0xb7a   :  { %7359 = vmatpush3.bf16.msra.mxu1 %v9140_v53 }
 0xb7b   :  { %7360 = vmatprep.subr.bf16.mxu1 %v8630_v0 }
 0xb7e   :  { %7362 = vmatpush3.bf16.msra.mxu1 %v9144_v56 }
 0xb7f   :  { %7363 = vmatprep.subr.bf16.mxu1 %v8630_v0 }
 0xb82   :  { %7365 = vmatpush3.bf16.msra.mxu1 %v9148_v59 }
 0xb83   :  { %7390 = vmatprep.subr.bf16.mxu1 %v8630_v0 }
 0xc18   :  { %v9237_v62 = vpop.f32.mrb[22].mxu1 }
 0xc19   :  { %v9239_v18 = vpop.f32.mrb[23].mxu1 }
 0xc38   :  { %v1543_v23 = vpop.f32.mrb[24].mxu1 }
 0xc39   :  { %v1547_v24 = vadd.f32 %v1543_v23, %v1337_v22  ;;  %v6097_v26 = vpop.f32.mrb[25].mxu1  ;;  %v2300_v22 = vld [vmem:[#allocation6 + $0x148] sm:$0xff] }
 0xc3a   :  { %v7574_v23 = vpack.c.bf16 %v2300_v22, %v2299_v17  ;;  %v2302_v26 = vld [vmem:[#allocation6 + $0x158] sm:$0xff] }
 0xc3b   :  { %8359 = vtanh.f32 %v1547_v24  ;;  %v2301_v24 = vld [vmem:[#allocation6 + $0x150] sm:$0xff] }
 0xc45   :  { %v9243_v27 = vpop.eup %8359 }
 0xc46   :  { %6131 = vmatmul.mubr.f32.vlgmr.msra.gmra.mrb[26].mxu0 %v9243_v27 }
 0xc47   :  { %7368 = vmatpush3.bf16.msra.mxu0 %v9120_v38  ;;  %6200 = vmatprep.mubr.msk.f32.mxu0 %vm8631_vm0, %v8632_v1 }
 0xc48   :  { %7369 = vmatprep.subr.bf16.mxu0 %v8630_v0 }
 0xc4b   :  { %7371 = vmatpush3.bf16.msra.mxu0 %v9124_v37 }
 0xc4c   :  { %7372 = vmatprep.subr.bf16.mxu0 %v8630_v0 }
 0xc4f   :  { %7374 = vmatpush3.bf16.msra.mxu0 %v9128_v42 }
 0xc50   :  { %7375 = vmatprep.subr.bf16.mxu0 %v8630_v0 }
 0xc53   :  { %7377 = vmatpush3.bf16.msra.mxu0 %v9132_v45 }
 0xc54   :  { %7378 = vmatprep.subr.bf16.mxu0 %v8630_v0 }
 0xc57   :  { %7380 = vmatpush3.bf16.msra.mxu0 %v9136_v49 }
 0xc58   :  { %7381 = vmatprep.subr.bf16.mxu0 %v8630_v0 }
 0xc5b   :  { %7383 = vmatpush3.bf16.msra.mxu0 %v9140_v53 }
 0xc5c   :  { %7384 = vmatprep.subr.bf16.mxu0 %v8630_v0 }
 0xc5f   :  { %7386 = vmatpush3.bf16.msra.mxu0 %v9144_v56 }
 0xc60   :  { %7387 = vmatprep.subr.bf16.mxu0 %v8630_v0 }
 0xc63   :  { %7389 = vmatpush3.bf16.msra.mxu0 %v9148_v59 }
 0xc64   :  { %7414 = vmatprep.subr.bf16.mxu0 %v8630_v0 }
 0xd19   :  { %v1617_v10 = vpop.f32.mrb[26].mxu0 }
 0xd1a   :  { %v1621_v30 = vadd.f32 %v1617_v10, %v1342_v29  ;;  %v6132_v32 = vpop.f32.mrb[27].mxu0  ;;  %v7578_v29 = vpack.c.bf16 %v2302_v26, %v2301_v24  ;;  %v2303_v10 = vld [vmem:[#allocation6 + $0x160] sm:$0xff]  ;;  %v2662_v26 = vld [vmem:[#allocation11 + $0x110] sm:$0xff] }
 0xd1b   :  { %v2305_v32 = vld [vmem:[#allocation6 + $0x170] sm:$0xff] }
 0xd1c   :  { %8361 = vtanh.f32 %v1621_v30  ;;  %v2304_v30 = vld [vmem:[#allocation6 + $0x168] sm:$0xff] }
 0xd26   :  { %v9266_v33 = vpop.eup %8361 }
 0xd27   :  { %6166 = vmatmul.mubr.f32.vlgmr.msra.gmra.mrb[26].mxu1 %v9266_v33 }
 0xd28   :  { %7392 = vmatpush3.bf16.msra.mxu1 %v9120_v38  ;;  %6235 = vmatprep.mubr.msk.f32.mxu1 %vm8631_vm0, %v8632_v1 }
 0xd29   :  { %7393 = vmatprep.subr.bf16.mxu1 %v8630_v0 }
 0xd2c   :  { %7395 = vmatpush3.bf16.msra.mxu1 %v9124_v37 }
 0xd2d   :  { %7396 = vmatprep.subr.bf16.mxu1 %v8630_v0 }
 0xd30   :  { %7398 = vmatpush3.bf16.msra.mxu1 %v9128_v42 }
 0xd31   :  { %7399 = vmatprep.subr.bf16.mxu1 %v8630_v0 }
 0xd34   :  { %7401 = vmatpush3.bf16.msra.mxu1 %v9132_v45 }
 0xd35   :  { %7402 = vmatprep.subr.bf16.mxu1 %v8630_v0 }
 0xd38   :  { %7404 = vmatpush3.bf16.msra.mxu1 %v9136_v49 }
 0xd39   :  { %7405 = vmatprep.subr.bf16.mxu1 %v8630_v0 }
 0xd3c   :  { %7407 = vmatpush3.bf16.msra.mxu1 %v9140_v53 }
 0xd3d   :  { %7408 = vmatprep.subr.bf16.mxu1 %v8630_v0 }
 0xd40   :  { %7410 = vmatpush3.bf16.msra.mxu1 %v9144_v56 }
 0xd41   :  { %7411 = vmatprep.subr.bf16.mxu1 %v8630_v0 }
 0xd44   :  { %7413 = vmatpush3.bf16.msra.mxu1 %v9148_v59 }
 0xd45   :  { %7438 = vmatprep.subr.bf16.mxu1 %v8630_v0 }
 0xdfa   :  { %v1691_v36 = vpop.f32.mrb[26].mxu1 }
 0xdfb   :  { %v1695_v25 = vadd.f32 %v1691_v36, %v1347_v35  ;;  %v6167_v31 = vpop.f32.mrb[27].mxu1  ;;  %v2306_v35 = vld [vmem:[#allocation6 + $0x178] sm:$0xff] }
 0xdfc   :  { %v7586_v36 = vpack.c.bf16 %v2306_v35, %v2305_v32  ;;  %v2309_v31 = vld [vmem:[#allocation8 + $0x108] sm:$0xff]  ;;  %v2666_v35 = vld [vmem:[#allocation11 + $0x130] sm:$0xff] }
 0xdfd   :  { %8363 = vtanh.f32 %v1695_v25  ;;  %v2308_v25 = vld [vmem:[#allocation8 + $0x100] sm:$0xff] }
 0xdfe   :  { %v2664_v32 = vld [vmem:[#allocation11 + $0x120] sm:$0xff] }
 0xe07   :  { %v9289_v39 = vpop.eup %8363 }
 0xe08   :  { %6201 = vmatmul.mubr.f32.vlgmr.msra.gmra.mrb[28].mxu0 %v9289_v39 }
 0xe09   :  { %7416 = vmatpush3.bf16.msra.mxu0 %v9120_v38  ;;  %6270 = vmatprep.mubr.msk.f32.mxu0 %vm8631_vm0, %v8632_v1 }
 0xe0a   :  { %7417 = vmatprep.subr.bf16.mxu0 %v8630_v0 }
 0xe0d   :  { %7419 = vmatpush3.bf16.msra.mxu0 %v9124_v37 }
 0xe0e   :  { %7420 = vmatprep.subr.bf16.mxu0 %v8630_v0 }
 0xe11   :  { %7422 = vmatpush3.bf16.msra.mxu0 %v9128_v42 }
 0xe12   :  { %7423 = vmatprep.subr.bf16.mxu0 %v8630_v0 }
 0xe15   :  { %7425 = vmatpush3.bf16.msra.mxu0 %v9132_v45 }
 0xe16   :  { %7426 = vmatprep.subr.bf16.mxu0 %v8630_v0 }
 0xe19   :  { %7428 = vmatpush3.bf16.msra.mxu0 %v9136_v49 }
 0xe1a   :  { %7429 = vmatprep.subr.bf16.mxu0 %v8630_v0 }
 0xe1d   :  { %7431 = vmatpush3.bf16.msra.mxu0 %v9140_v53 }
 0xe1e   :  { %7432 = vmatprep.subr.bf16.mxu0 %v8630_v0 }
 0xe21   :  { %7434 = vmatpush3.bf16.msra.mxu0 %v9144_v56 }
 0xe22   :  { %7435 = vmatprep.subr.bf16.mxu0 %v8630_v0 }
 0xe25   :  { %7437 = vmatpush3.bf16.msra.mxu0 %v9148_v59 }
 0xe26   :  { %7462 = vmatprep.subr.bf16.mxu0 %v8630_v0 }
 0xedb   :  { %v1765_v43 = vpop.f32.mrb[28].mxu0 }
 0xedc   :  { %v1769_v44 = vadd.f32 %v1765_v43, %v1352_v41  ;;  %v6202_v47 = vpop.f32.mrb[29].mxu0  ;;  %v9436_v41 = vpack.c.bf16 %v2309_v31, %v2308_v25  ;;  %v2312_v43 = vld [vmem:[#allocation8 + $0x120] sm:$0xff]  ;;  %v7644_v31 = vpack.c.bf16 %v2666_v35, %v2664_v32 }
 0xedd   :  { %v2671_v25 = vld [vmem:[#allocation11 + $0x158] sm:$0xff] }
 0xede   :  { %8365 = vtanh.f32 %v1769_v44  ;;  %v2313_v44 = vld [vmem:[#allocation8 + $0x128] sm:$0xff] }
 0xedf   :  { %v9444_v47 = vpack.c.bf16 %v2313_v44, %v2312_v43  ;;  %v2670_v43 = vld [vmem:[#allocation11 + $0x150] sm:$0xff]  ;;  %v2673_v44 = vld [vmem:[#allocation11 + $0x168] sm:$0xff] }
 0xee8   :  { %v9312_v48 = vpop.eup %8365 }
 0xee9   :  { %6236 = vmatmul.mubr.f32.vlgmr.msra.gmra.mrb[28].mxu1 %v9312_v48 }
 0xeea   :  { %7440 = vmatpush3.bf16.msra.mxu1 %v9120_v38  ;;  %6305 = vmatprep.mubr.msk.f32.mxu1 %vm8631_vm0, %v8632_v1 }
 0xeeb   :  { %7441 = vmatprep.subr.bf16.mxu1 %v8630_v0 }
 0xeee   :  { %7443 = vmatpush3.bf16.msra.mxu1 %v9124_v37 }
 0xeef   :  { %7444 = vmatprep.subr.bf16.mxu1 %v8630_v0 }
 0xef2   :  { %7446 = vmatpush3.bf16.msra.mxu1 %v9128_v42 }
 0xef3   :  { %7447 = vmatprep.subr.bf16.mxu1 %v8630_v0 }
 0xef6   :  { %7449 = vmatpush3.bf16.msra.mxu1 %v9132_v45 }
 0xef7   :  { %7450 = vmatprep.subr.bf16.mxu1 %v8630_v0 }
 0xefa   :  { %7452 = vmatpush3.bf16.msra.mxu1 %v9136_v49 }
 0xefb   :  { %7453 = vmatprep.subr.bf16.mxu1 %v8630_v0 }
 0xefe   :  { %7455 = vmatpush3.bf16.msra.mxu1 %v9140_v53 }
 0xeff   :  { %7456 = vmatprep.subr.bf16.mxu1 %v8630_v0 }
 0xf02   :  { %7458 = vmatpush3.bf16.msra.mxu1 %v9144_v56 }
 0xf03   :  { %7459 = vmatprep.subr.bf16.mxu1 %v8630_v0 }
 0xf06   :  { %7461 = vmatpush3.bf16.msra.mxu1 %v9148_v59 }
 0xf07   :  { %7486 = vmatprep.subr.bf16.mxu1 %v8630_v0 }
 0xfbc   :  { %v1839_v52 = vpop.f32.mrb[28].mxu1 }
 0xfbd   :  { %v1843_v54 = vadd.f32 %v1839_v52, %v1357_v51  ;;  %v6237_v55 = vpop.f32.mrb[29].mxu1  ;;  %v2315_v51 = vld [vmem:[#allocation8 + $0x138] sm:$0xff] }
 0xfbe   :  { %v2317_v55 = vld [vmem:[#allocation8 + $0x148] sm:$0xff] }
 0xfbf   :  { %8367 = vtanh.f32 %v1843_v54  ;;  %v2316_v54 = vld [vmem:[#allocation8 + $0x140] sm:$0xff] }
 0xfc9   :  { %v9335_v57 = vpop.eup %8367 }
 0xfca   :  { %6271 = vmatmul.mubr.f32.vlgmr.msra.gmra.mrb[30].mxu0 %v9335_v57 }
 0xfcb   :  { %7464 = vmatpush3.bf16.msra.mxu0 %v9120_v38  ;;  %6340 = vmatprep.mubr.msk.f32.mxu0 %vm8631_vm0, %v8632_v1 }
 0xfcc   :  { %7465 = vmatprep.subr.bf16.mxu0 %v8630_v0 }
 0xfcf   :  { %7467 = vmatpush3.bf16.msra.mxu0 %v9124_v37 }
 0xfd0   :  { %7468 = vmatprep.subr.bf16.mxu0 %v8630_v0 }
 0xfd3   :  { %7470 = vmatpush3.bf16.msra.mxu0 %v9128_v42 }
 0xfd4   :  { %7471 = vmatprep.subr.bf16.mxu0 %v8630_v0 }
 0xfd7   :  { %7473 = vmatpush3.bf16.msra.mxu0 %v9132_v45 }
 0xfd8   :  { %7474 = vmatprep.subr.bf16.mxu0 %v8630_v0 }
 0xfdb   :  { %7476 = vmatpush3.bf16.msra.mxu0 %v9136_v49 }
 0xfdc   :  { %7477 = vmatprep.subr.bf16.mxu0 %v8630_v0 }
 0xfdf   :  { %7479 = vmatpush3.bf16.msra.mxu0 %v9140_v53 }
 0xfe0   :  { %7480 = vmatprep.subr.bf16.mxu0 %v8630_v0 }
 0xfe3   :  { %7482 = vmatpush3.bf16.msra.mxu0 %v9144_v56 }
 0xfe4   :  { %7483 = vmatprep.subr.bf16.mxu0 %v8630_v0 }
 0xfe7   :  { %7485 = vmatpush3.bf16.msra.mxu0 %v9148_v59 }
 0xfe8   :  { %7510 = vmatprep.subr.bf16.mxu0 %v8630_v0 }
0x109d   :  { %v1913_v60 = vpop.f32.mrb[30].mxu0 }
0x109e   :  { %v1917_v61 = vadd.f32 %v1913_v60, %v1362_v58  ;;  %v6272_v63 = vpop.f32.mrb[31].mxu0  ;;  %v2318_v58 = vld [vmem:[#allocation8 + $0x150] sm:$0xff]  ;;  %v2319_v60 = vld [vmem:[#allocation8 + $0x158] sm:$0xff] }
0x109f   :  { %v2320_v63 = vld [vmem:[#allocation8 + $0x160] sm:$0xff] }
0x10a0   :  { %8369 = vtanh.f32 %v1917_v61  ;;  %v9456_v61 = vpack.c.bf16 %v2319_v60, %v2318_v58  ;;  %v2674_v58 = vld [vmem:[#allocation11 + $0x170] sm:$0xff]  ;;  %v2677_v60 = vld [vmem:[#allocation11 + $0x188] sm:$0xff] }
0x10aa   :  { %v9358_v2 = vpop.eup %8369 }
0x10ab   :  { %6306 = vmatmul.mubr.f32.vlgmr.msra.gmra.mrb[30].mxu1 %v9358_v2 }
0x10ac   :  { %7488 = vmatpush3.bf16.msra.mxu1 %v9120_v38  ;;  %6375 = vmatprep.mubr.msk.f32.mxu1 %vm8631_vm0, %v8632_v1 }
0x10ad   :  { %7489 = vmatprep.subr.bf16.mxu1 %v8630_v0 }
0x10b0   :  { %7491 = vmatpush3.bf16.msra.mxu1 %v9124_v37 }
0x10b1   :  { %7492 = vmatprep.subr.bf16.mxu1 %v8630_v0 }
0x10b4   :  { %7494 = vmatpush3.bf16.msra.mxu1 %v9128_v42 }
0x10b5   :  { %7495 = vmatprep.subr.bf16.mxu1 %v8630_v0 }
0x10b8   :  { %7497 = vmatpush3.bf16.msra.mxu1 %v9132_v45 }
0x10b9   :  { %7498 = vmatprep.subr.bf16.mxu1 %v8630_v0 }
0x10bc   :  { %7500 = vmatpush3.bf16.msra.mxu1 %v9136_v49 }
0x10bd   :  { %7501 = vmatprep.subr.bf16.mxu1 %v8630_v0 }
0x10c0   :  { %7503 = vmatpush3.bf16.msra.mxu1 %v9140_v53 }
0x10c1   :  { %7504 = vmatprep.subr.bf16.mxu1 %v8630_v0 }
0x10c4   :  { %7506 = vmatpush3.bf16.msra.mxu1 %v9144_v56 }
0x10c5   :  { %7507 = vmatprep.subr.bf16.mxu1 %v8630_v0 }
0x10c8   :  { %7509 = vmatpush3.bf16.msra.mxu1 %v9148_v59 }
0x10c9   :  { %7534 = vmatprep.subr.bf16.mxu1 %v8630_v0 }
0x117e   :  { %v1987_v19 = vpop.f32.mrb[30].mxu1 }
0x117f   :  { %v1991_v4 = vadd.f32 %v1987_v19, %v1367_v3  ;;  %v6307_v9 = vpop.f32.mrb[31].mxu1  ;;  %v2322_v19 = vld [vmem:[#allocation8 + $0x170] sm:$0xff] }
0x1181   :  { %8371 = vtanh.f32 %v1991_v4  ;;  %v2323_v4 = vld [vmem:[#allocation8 + $0x178] sm:$0xff] }
0x1182   :  { %v9464_v9 = vpack.c.bf16 %v2323_v4, %v2322_v19  ;;  %v2676_v4 = vld [vmem:[#allocation11 + $0x180] sm:$0xff] }
0x118b   :  { %v9381_v15 = vpop.eup %8371 }
0x118c   :  { %6341 = vmatmul.mubr.f32.vlgmr.msra.gmra.mrb[32].mxu0 %v9381_v15 }
0x118d   :  { %7512 = vmatpush3.bf16.msra.mxu0 %v9120_v38  ;;  %6410 = vmatprep.mubr.msk.f32.mxu0 %vm8631_vm0, %v8632_v1 }
0x118e   :  { %7513 = vmatprep.subr.bf16.mxu0 %v8630_v0 }
0x1191   :  { %7515 = vmatpush3.bf16.msra.mxu0 %v9124_v37 }
0x1192   :  { %7516 = vmatprep.subr.bf16.mxu0 %v8630_v0 }
0x1195   :  { %7518 = vmatpush3.bf16.msra.mxu0 %v9128_v42 }
0x1196   :  { %7519 = vmatprep.subr.bf16.mxu0 %v8630_v0 }
0x1199   :  { %7521 = vmatpush3.bf16.msra.mxu0 %v9132_v45 }
0x119a   :  { %7522 = vmatprep.subr.bf16.mxu0 %v8630_v0 }
0x119d   :  { %7524 = vmatpush3.bf16.msra.mxu0 %v9136_v49 }
0x119e   :  { %7525 = vmatprep.subr.bf16.mxu0 %v8630_v0 }
0x11a1   :  { %7527 = vmatpush3.bf16.msra.mxu0 %v9140_v53 }
0x11a2   :  { %7528 = vmatprep.subr.bf16.mxu0 %v8630_v0 }
0x11a5   :  { %7530 = vmatpush3.bf16.msra.mxu0 %v9144_v56 }
0x11a6   :  { %7531 = vmatprep.subr.bf16.mxu0 %v8630_v0 }
0x11a9   :  { %7533 = vmatpush3.bf16.msra.mxu0 %v9148_v59 }
0x125f   :  { %v2061_v28 = vpop.f32.mrb[32].mxu0 }
0x1260   :  { %v2065_v34 = vadd.f32 %v2061_v28, %v1372_v21  ;;  %v6342_v5 = vpop.f32.mrb[33].mxu0 }
0x1262   :  { %8373 = vtanh.f32 %v2065_v34 }
0x126c   :  { %v9403_v7 = vpop.eup %8373 }
0x126d   :  { %6376 = vmatmul.mubr.f32.vlgmr.msra.gmra.mrb[32].mxu1 %v9403_v7 }
0x126e   :  { %7536 = vmatpush3.bf16.msra.mxu1 %v9120_v38  ;;  %6445 = vmatprep.mubr.msk.f32.mxu1 %vm8631_vm0, %v8632_v1  ;;  %v2291_v38 = vld [vmem:[#allocation6 + $0x100] sm:$0xff] }
0x126f   :  { %7537 = vmatprep.subr.bf16.mxu1 %v8630_v0 }
0x1272   :  { %7539 = vmatpush3.bf16.msra.mxu1 %v9124_v37  ;;  %v2292_v37 = vld [vmem:[#allocation6 + $0x108] sm:$0xff] }
0x1273   :  { %7540 = vmatprep.subr.bf16.mxu1 %v8630_v0 }
0x1276   :  { %7542 = vmatpush3.bf16.msra.mxu1 %v9128_v42  ;;  %v7558_v42 = vpack.c.bf16 %v2292_v37, %v2291_v38 }
0x1277   :  { %7543 = vmatprep.subr.bf16.mxu1 %v8630_v0 }
0x1278   :  { %7559 = vmatprep.subr.bf16.mxu0 %v7558_v42 }
0x127a   :  { %7545 = vmatpush3.bf16.msra.mxu1 %v9132_v45  ;;  %v1377_v45 = vadd.f32 %v9190_v40, %v9213_v50  ;;  %v7570_v40 = vpack.c.bf16 %v2298_v16, %v2297_v14 }
0x127b   :  { %7546 = vmatprep.subr.bf16.mxu1 %v8630_v0 }
0x127e   :  { %7548 = vmatpush3.bf16.msra.mxu1 %v9136_v49 }
0x127f   :  { %7549 = vmatprep.subr.bf16.mxu1 %v8630_v0 }
0x1282   :  { %7551 = vmatpush3.bf16.msra.mxu1 %v9140_v53 }
0x1283   :  { %7552 = vmatprep.subr.bf16.mxu1 %v8630_v0 }
0x1286   :  { %7554 = vmatpush3.bf16.msra.mxu1 %v9144_v56  ;;  %v7562_v56 = vpack.c.bf16 %v2294_v8, %v2293_v46  ;;  %v1387_v8 = vadd.f32 %v9237_v62, %v9213_v50  ;;  %v2663_v62 = vld [vmem:[#allocation11 + $0x118] sm:$0xff] }
0x1287   :  { %7555 = vmatprep.subr.bf16.mxu1 %v8630_v0 }
0x128a   :  { %7557 = vmatpush3.bf16.msra.mxu1 %v9148_v59  ;;  %v7566_v59 = vpack.c.bf16 %v2296_v13, %v2295_v12 }
0x128b   :  { %7590 = vmatprep.subr.bf16.mxu1 %v8630_v0 }
0x1340   :  { %v2135_v49 = vpop.f32.mrb[32].mxu1 }
0x1341   :  { %v2139_v6 = vadd.f32 %v2135_v49, %v1377_v45  ;;  %v6377_v53 = vpop.f32.mrb[33].mxu1 }
0x1343   :  { %8375 = vtanh.f32 %v2139_v6 }
0x134d   :  { %v8376_v11 = vpop.eup %8375 }
0x134e   :  { %6411 = vmatmul.mubr.f32.vlgmr.msra.gmra.mrb[34].mxu0 %v8376_v11 }
0x134f   :  { %7561 = vmatpush3.bf16.msra.mxu0 %v7558_v42  ;;  %6480 = vmatprep.mubr.f32.mxu0 %v9216_v20  ;;  %v7582_v20 = vpack.c.bf16 %v2304_v30, %v2303_v10  ;;  %v2667_v10 = vld [vmem:[#allocation11 + $0x138] sm:$0xff] }
0x1350   :  { %7563 = vmatprep.subr.bf16.mxu0 %v7562_v56 }
0x1353   :  { %7565 = vmatpush3.bf16.msra.mxu0 %v7562_v56 }
0x1354   :  { %7567 = vmatprep.subr.bf16.mxu0 %v7566_v59 }
0x1357   :  { %7569 = vmatpush3.bf16.msra.mxu0 %v7566_v59  ;;  %v9511_v59 = vld [vmem:[#allocation9 + $0x2] ss:$0 sm:$0xff] }
0x1358   :  { %7571 = vmatprep.subr.bf16.mxu0 %v7570_v40 }
0x135b   :  { %7573 = vmatpush3.bf16.msra.mxu0 %v7570_v40 }
0x135c   :  { %7575 = vmatprep.subr.bf16.mxu0 %v7574_v23 }
0x135f   :  { %7577 = vmatpush3.bf16.msra.mxu0 %v7574_v23  ;;  %v2660_v23 = vld [vmem:[#allocation11 + $0x100] sm:$0xff] }
0x1360   :  { %7579 = vmatprep.subr.bf16.mxu0 %v7578_v29  ;;  %v7640_v30 = vpack.c.bf16 %v2662_v26, %v2660_v23  ;;  %v2690_v23 = vld [vmem:[#allocation11 + $0x1f0] sm:$0xff]  ;;  %v2555_v26 = vld [vmem:[#allocation11 + $0x8] sm:$0xff] }
0x1363   :  { %7581 = vmatpush3.bf16.msra.mxu0 %v7578_v29  ;;  %v2665_v29 = vld [vmem:[#allocation11 + $0x128] sm:$0xff] }
0x1364   :  { %7583 = vmatprep.subr.bf16.mxu0 %v7582_v20 }
0x1367   :  { %7585 = vmatpush3.bf16.msra.mxu0 %v7582_v20  ;;  %v7642_v20 = vpack.c.bf16 %v2667_v10, %v2665_v29  ;;  %v2557_v29 = vld [vmem:[#allocation11 + $0x18] sm:$0xff] }
0x1368   :  { %7587 = vmatprep.subr.bf16.mxu0 %v7586_v36 }
0x136b   :  { %7589 = vmatpush3.bf16.msra.mxu0 %v7586_v36  ;;  %v2669_v36 = vld [vmem:[#allocation11 + $0x148] sm:$0xff] }
0x136c   :  { %7614 = vmatprep.subr.bf16.mxu0 %v8630_v0 }
0x136e   :  { %6481 = vmatmul.mubr.f32.vlgmr.msra.gmra.mrb[36].mxu0 %v9243_v27  ;;  %v2310_v27 = vld [vmem:[#allocation8 + $0x110] sm:$0xff] }
0x136f   :  { %6483 = vmatprep.mubr.f32.mxu0 %v9266_v33  ;;  %7616 = vmatpush3.bf16.msra.mxu0 %v9436_v41  ;;  %v2311_v33 = vld [vmem:[#allocation8 + $0x118] sm:$0xff] }
0x1370   :  { %7617 = vmatprep.subr.bf16.mxu0 %v8630_v0 }
0x1372   :  { %6484 = vmatmul.mubr.f32.gmra.mrb[38].mxu0 %v9289_v39  ;;  %v9440_v39 = vpack.c.bf16 %v2311_v33, %v2310_v27  ;;  %v7646_v27 = vpack.c.bf16 %v2671_v25, %v2669_v36  ;;  %v2668_v33 = vld [vmem:[#allocation11 + $0x140] sm:$0xff] }
0x1373   :  { %6486 = vmatprep.mubr.f32.mxu0 %v9312_v48  ;;  %v2314_v48 = vld [vmem:[#allocation8 + $0x130] sm:$0xff] }
0x1374   :  { %7619 = vmatpush3.bf16.msra.mxu0 %v9440_v39  ;;  %v9448_v52 = vpack.c.bf16 %v2315_v51, %v2314_v48  ;;  %v2675_v48 = vld [vmem:[#allocation11 + $0x178] sm:$0xff]  ;;  %v7648_v51 = vpack.c.bf16 %v2670_v43, %v2668_v33  ;;  %v2556_v33 = vld [vmem:[#allocation11 + $0x10] sm:$0xff]  ;;  %v2559_v43 = vld [vmem:[#allocation11 + $0x28] sm:$0xff] }
0x1375   :  { %7620 = vmatprep.subr.bf16.mxu0 %v8630_v0 }
0x1376   :  { %6487 = vmatmul.mubr.f32.gmra.mrb[40].mxu0 %v9335_v57  ;;  %v9452_v57 = vpack.c.bf16 %v2317_v55, %v2316_v54  ;;  %v7650_v54 = vpack.c.bf16 %v2675_v48, %v2673_v44  ;;  %v2672_v55 = vld [vmem:[#allocation11 + $0x160] sm:$0xff]  ;;  %v2561_v44 = vld [vmem:[#allocation11 + $0x38] sm:$0xff] }
0x1377   :  { %6489 = vmatprep.mubr.f32.mxu0 %v9358_v2  ;;  %v2321_v2 = vld [vmem:[#allocation8 + $0x168] sm:$0xff] }
0x1378   :  { %7622 = vmatpush3.bf16.msra.mxu0 %v9444_v47  ;;  %v9460_v3 = vpack.c.bf16 %v2321_v2, %v2320_v63  ;;  %v2679_v63 = vld [vmem:[#allocation11 + $0x198] sm:$0xff]  ;;  %v7652_v2 = vpack.c.bf16 %v2674_v58, %v2672_v55  ;;  %v2560_v55 = vld [vmem:[#allocation11 + $0x30] sm:$0xff] }
0x1379   :  { %7623 = vmatprep.subr.bf16.mxu0 %v8630_v0  ;;  %v7654_v19 = vpack.c.bf16 %v2679_v63, %v2677_v60  ;;  %v2563_v60 = vld [vmem:[#allocation11 + $0x48] sm:$0xff]  ;;  %v2565_v63 = vld [vmem:[#allocation11 + $0x58] sm:$0xff] }
0x137a   :  { %6490 = vmatmul.mubr.f32.gmra.mrb[42].mxu0 %v9381_v15  ;;  %v1382_v15 = vadd.f32 %v9213_v50, %v9239_v18  ;;  %v2661_v50 = vld [vmem:[#allocation11 + $0x108] sm:$0xff] }
0x137b   :  { %6492 = vmatprep.mubr.f32.mxu0 %v9403_v7  ;;  %v7638_v24 = vpack.c.bf16 %v2663_v62, %v2661_v50  ;;  %v2691_v50 = vld [vmem:[#allocation11 + $0x1f8] sm:$0xff]  ;;  %v2688_v62 = vld [vmem:[#allocation11 + $0x1e0] sm:$0xff] }
0x137c   :  { %7625 = vmatpush3.bf16.msra.mxu0 %v9448_v52  ;;  %v7668_v10 = vpack.c.bf16 %v2690_v23, %v2688_v62  ;;  %v2574_v62 = vld [vmem:[#allocation11 + $0xa0] sm:$0xff]  ;;  %v2576_v23 = vld [vmem:[#allocation11 + $0xb0] sm:$0xff] }
0x137d   :  { %7626 = vmatprep.subr.bf16.mxu0 %v8630_v0 }
0x137e   :  { %6493 = vmatmul.mubr.f32.gmra.mrb[44].mxu0 %v8376_v11 }
0x1380   :  { %7628 = vmatpush3.bf16.msra.mxu0 %v9452_v57 }
0x1381   :  { %7629 = vmatprep.subr.bf16.mxu0 %v8630_v0 }
0x1384   :  { %7631 = vmatpush3.bf16.msra.mxu0 %v9456_v61 }
0x1385   :  { %7632 = vmatprep.subr.bf16.mxu0 %v8630_v0 }
0x1388   :  { %7634 = vmatpush3.bf16.msra.mxu0 %v9460_v3 }
0x1389   :  { %7635 = vmatprep.subr.bf16.mxu0 %v8630_v0 }
0x138c   :  { %7637 = vmatpush3.bf16.msra.mxu0 %v9464_v9 }
0x138d   :  { %7702 = vmatprep.subr.bf16.mxu0 %v8630_v0 }
0x1421   :  { %v2209_v21 = vpop.f32.mrb[34].mxu0 }
0x1422   :  { %v2213_v28 = vadd.f32 %v2209_v21, %v1382_v15  ;;  %v6412_v34 = vpop.f32.mrb[35].mxu0  ;;  %v2678_v15 = vld [vmem:[#allocation11 + $0x190] sm:$0xff] }
0x1423   :  { %v7656_v21 = vpack.c.bf16 %v2678_v15, %v2676_v4  ;;  %v2683_v34 = vld [vmem:[#allocation11 + $0x1b8] sm:$0xff]  ;;  %v2564_v4 = vld [vmem:[#allocation11 + $0x50] sm:$0xff]  ;;  %v2567_v15 = vld [vmem:[#allocation11 + $0x68] sm:$0xff] }
0x1424   :  { %8377 = vtanh.f32 %v2213_v28  ;;  %v2681_v28 = vld [vmem:[#allocation11 + $0x1a8] sm:$0xff] }
0x142e   :  { %v8378_v5 = vpop.eup %8377 }
0x142f   :  { %6446 = vmatmul.mubr.f32.vlgmr.msra.gmra.mrb[34].mxu1 %v8378_v5  ;;  %6495 = vmatprep.mubr.f32.mxu0 %v8378_v5  ;;  %v7658_v5 = vpack.c.bf16 %v2683_v34, %v2681_v28 }
0x1430   :  { %7592 = vmatpush3.bf16.msra.mxu1 %v9436_v41  ;;  %6530 = vmatprep.mubr.msk.f32.mxu1 %vm8631_vm0, %v8632_v1 }
0x1431   :  { %7593 = vmatprep.subr.bf16.mxu1 %v8630_v0 }
0x1434   :  { %7595 = vmatpush3.bf16.msra.mxu1 %v9440_v39 }
0x1435   :  { %7596 = vmatprep.subr.bf16.mxu1 %v8630_v0 }
0x1438   :  { %7598 = vmatpush3.bf16.msra.mxu1 %v9444_v47 }
0x1439   :  { %7599 = vmatprep.subr.bf16.mxu1 %v8630_v0 }
0x143c   :  { %7601 = vmatpush3.bf16.msra.mxu1 %v9448_v52 }
0x143d   :  { %7602 = vmatprep.subr.bf16.mxu1 %v8630_v0 }
0x1440   :  { %7604 = vmatpush3.bf16.msra.mxu1 %v9452_v57 }
0x1441   :  { %v9481_v18 = vpop.f32.mrb[36].mxu0  ;;  %7605 = vmatprep.subr.bf16.mxu1 %v8630_v0 }
0x1442   :  { %v2410_v7 = vpop.f32.mrb[37].mxu0  ;;  %v2416_v35 = vadd.f32 %v9481_v18, %v9511_v59  ;;  %v7678_v18 = vpack.c.bf16 %v2565_v63, %v2563_v60  ;;  %v2913_v60 = vld [vmem:[#allocation11 + $0x228] sm:$0xff]  ;;  %v2915_v63 = vld [vmem:[#allocation11 + $0x238] sm:$0xff] }
0x1443   :  { %v2411_v14 = vadd.f32 %v9511_v59, %v2410_v7  ;;  %v2680_v7 = vld [vmem:[#allocation11 + $0x1a0] sm:$0xff] }
0x1444   :  { %7607 = vmatpush3.bf16.msra.mxu1 %v9456_v61 }
0x1445   :  { %v9485_v38 = vpop.f32.mrb[38].mxu0  ;;  %7608 = vmatprep.subr.bf16.mxu1 %v8630_v0 }
0x1446   :  { %v9488_v37 = vpop.f32.mrb[39].mxu0 }
0x1448   :  { %7610 = vmatpush3.bf16.msra.mxu1 %v9460_v3 }
0x1449   :  { %v9491_v42 = vpop.f32.mrb[40].mxu0  ;;  %7611 = vmatprep.subr.bf16.mxu1 %v8630_v0 }
0x144a   :  { %v9494_v45 = vpop.f32.mrb[41].mxu0 }
0x144c   :  { %7613 = vmatpush3.bf16.msra.mxu1 %v9464_v9 }
0x144d   :  { %v9497_v49 = vpop.f32.mrb[42].mxu0  ;;  %7639 = vmatprep.subr.bf16.mxu1 %v7638_v24 }
0x144e   :  { %v9499_v6 = vpop.f32.mrb[43].mxu0 }
0x144f   :  { %6531 = vmatmul.mubr.f32.vlgmr.msra.gmra.mrb[36].mxu1 %v8632_v1 }
0x1450   :  { %2756 = vmatprep.mubr.f32.mxu1 %v8632_v1  ;;  %7641 = vmatpush1.bf16.msra.mxu1 %v7640_v30  ;;  %v7670_v30 = vpack.c.bf16 %v2557_v29, %v2555_v26  ;;  %v2581_v26 = vld [vmem:[#allocation11 + $0xd8] sm:$0xff]  ;;  %v7692_v29 = vpack.c.bf16 %v2576_v23, %v2574_v62  ;;  %v2926_v62 = vld [vmem:[#allocation11 + $0x290] sm:$0xff] }
0x1451   :  { %v9503_v53 = vpop.f32.mrb[44].mxu0  ;;  %7643 = vmatprep.subr.bf16.mxu1 %v7642_v20 }
0x1452   :  { %v9505_v46 = vpop.f32.mrb[45].mxu0 }
0x1454   :  { %7645 = vmatpush1.bf16.msra.mxu1 %v7644_v31 }
0x1455   :  { %7647 = vmatprep.subr.bf16.mxu1 %v7646_v27  ;;  %v2554_v27 = vld [vmem:[#allocation11] sm:$0xff] }
0x1456   :  { %v7672_v48 = vpack.c.bf16 %v2556_v33, %v2554_v27  ;;  %v2582_v33 = vld [vmem:[#allocation11 + $0xe0] sm:$0xff] }
0x1458   :  { %7649 = vmatpush1.bf16.msra.mxu1 %v7648_v51  ;;  %v7674_v51 = vpack.c.bf16 %v2561_v44, %v2559_v43  ;;  %v2584_v43 = vld [vmem:[#allocation11 + $0xf0] sm:$0xff]  ;;  %v2909_v44 = vld [vmem:[#allocation11 + $0x208] sm:$0xff] }
0x1459   :  { %7651 = vmatprep.subr.bf16.mxu1 %v7650_v54  ;;  %v2558_v54 = vld [vmem:[#allocation11 + $0x20] sm:$0xff] }
0x145c   :  { %7653 = vmatpush1.bf16.msra.mxu1 %v7652_v2  ;;  %v7676_v2 = vpack.c.bf16 %v2560_v55, %v2558_v54  ;;  %v2908_v55 = vld [vmem:[#allocation11 + $0x200] sm:$0xff] }
0x145d   :  { %7655 = vmatprep.subr.bf16.mxu1 %v7654_v19  ;;  %v2562_v19 = vld [vmem:[#allocation11 + $0x40] sm:$0xff] }
0x145e   :  { %v7680_v28 = vpack.c.bf16 %v2564_v4, %v2562_v19  ;;  %v2912_v19 = vld [vmem:[#allocation11 + $0x220] sm:$0xff]  ;;  %v2914_v4 = vld [vmem:[#allocation11 + $0x230] sm:$0xff] }
0x1460   :  { %7657 = vmatpush1.bf16.msra.mxu1 %v7656_v21  ;;  %v2569_v21 = vld [vmem:[#allocation11 + $0x78] sm:$0xff] }
0x1461   :  { %7659 = vmatprep.subr.bf16.mxu1 %v7658_v5  ;;  %v7682_v34 = vpack.c.bf16 %v2569_v21, %v2567_v15  ;;  %v2566_v5 = vld [vmem:[#allocation11 + $0x60] sm:$0xff]  ;;  %v2917_v15 = vld [vmem:[#allocation11 + $0x248] sm:$0xff]  ;;  %v2919_v21 = vld [vmem:[#allocation11 + $0x258] sm:$0xff] }
0x1502   :  { %v2283_v56 = vpop.f32.mrb[34].mxu1 }
0x1503   :  { %v2287_v11 = vadd.f32 %v2283_v56, %v1387_v8  ;;  %v6447_v12 = vpop.f32.mrb[35].mxu1  ;;  %v2682_v8 = vld [vmem:[#allocation11 + $0x1b0] sm:$0xff] }
0x1504   :  { %v7660_v56 = vpack.c.bf16 %v2682_v8, %v2680_v7  ;;  %v2687_v12 = vld [vmem:[#allocation11 + $0x1d8] sm:$0xff]  ;;  %v2568_v7 = vld [vmem:[#allocation11 + $0x70] sm:$0xff]  ;;  %v2571_v8 = vld [vmem:[#allocation11 + $0x88] sm:$0xff] }
0x1505   :  { %8379 = vtanh.f32 %v2287_v11  ;;  %v2685_v11 = vld [vmem:[#allocation11 + $0x1c8] sm:$0xff] }
0x1506   :  { %7661 = vmatpush1.bf16.msra.mxu1 %v7660_v56  ;;  %v2573_v56 = vld [vmem:[#allocation11 + $0x98] sm:$0xff] }
0x150f   :  { %v8380_v13 = vpop.eup %8379 }
0x1510   :  { %6496 = vmatmul.mubr.f32.gmra.mrb[46].mxu0 %v8380_v13  ;;  %v7662_v13 = vpack.c.bf16 %v2687_v12, %v2685_v11  ;;  %v7684_v11 = vpack.c.bf16 %v2568_v7, %v2566_v5  ;;  %v7686_v12 = vpack.c.bf16 %v2573_v56, %v2571_v8  ;;  %v2916_v5 = vld [vmem:[#allocation11 + $0x240] sm:$0xff]  ;;  %v2918_v7 = vld [vmem:[#allocation11 + $0x250] sm:$0xff]  ;;  %v2921_v8 = vld [vmem:[#allocation11 + $0x268] sm:$0xff] }
0x1511   :  { %6565 = vmatprep.mubr.msk.f32.mxu0 %vm8631_vm0, %v8632_v1  ;;  %v2923_v56 = vld [vmem:[#allocation11 + $0x278] sm:$0xff] }
0x1512   :  { %7663 = vmatprep.subr.bf16.mxu1 %v7662_v13  ;;  %v2570_v13 = vld [vmem:[#allocation11 + $0x80] sm:$0xff] }
0x1522   :  { %v2548_v16 = vpop.f32.mrb[36].mxu1 }
0x1523   :  { %v2552_v40 = vadd.f32 %v2548_v16, %v2411_v14  ;;  %v6532_v17 = vpop.f32.mrb[37].mxu1  ;;  %v2684_v14 = vld [vmem:[#allocation11 + $0x1c0] sm:$0xff]  ;;  %v2686_v16 = vld [vmem:[#allocation11 + $0x1d0] sm:$0xff] }
0x1524   :  { %v7664_v17 = vpack.c.bf16 %v2686_v16, %v2684_v14  ;;  %v2572_v14 = vld [vmem:[#allocation11 + $0x90] sm:$0xff]  ;;  %v2575_v16 = vld [vmem:[#allocation11 + $0xa8] sm:$0xff] }
0x1525   :  { %8381 = vtanh.f32 %v2552_v40  ;;  %v2689_v40 = vld [vmem:[#allocation11 + $0x1e8] sm:$0xff] }
0x1526   :  { %v7666_v24 = vpack.c.bf16 %v2691_v50, %v2689_v40  ;;  %7665 = vmatpush1.bf16.msra.mxu1 %v7664_v17  ;;  %v2577_v40 = vld [vmem:[#allocation11 + $0xb8] sm:$0xff]  ;;  %v7688_v17 = vpack.c.bf16 %v2572_v14, %v2570_v13  ;;  %v2920_v13 = vld [vmem:[#allocation11 + $0x260] sm:$0xff]  ;;  %v2922_v14 = vld [vmem:[#allocation11 + $0x270] sm:$0xff] }
0x1527   :  { %v7690_v50 = vpack.c.bf16 %v2577_v40, %v2575_v16  ;;  %v2925_v16 = vld [vmem:[#allocation11 + $0x288] sm:$0xff]  ;;  %v2927_v40 = vld [vmem:[#allocation11 + $0x298] sm:$0xff] }
0x1528   :  { %7667 = vmatprep.subr.bf16.mxu1 %v7666_v24  ;;  %v2579_v24 = vld [vmem:[#allocation11 + $0xc8] sm:$0xff] }
0x152a   :  { %7669 = vmatpush1.bf16.msra.mxu1 %v7668_v10  ;;  %v7694_v10 = vpack.c.bf16 %v2581_v26, %v2579_v24  ;;  %v2929_v24 = vld [vmem:[#allocation11 + $0x2a8] sm:$0xff]  ;;  %v2931_v26 = vld [vmem:[#allocation11 + $0x2b8] sm:$0xff] }
0x152b   :  { %7671 = vmatprep.subr.bf16.mxu1 %v7670_v30  ;;  %v2578_v30 = vld [vmem:[#allocation11 + $0xc0] sm:$0xff] }
0x152f   :  { %v9514_v22 = vpop.eup %8381 }
0x1530   :  { %6566 = vmatmul.mubr.f32.vlgmr.msra.gmra.mrb[48].mxu0 %v9514_v22 }
0x1531   :  { %7704 = vmatpush3.bf16.msra.mxu0 %v9436_v41  ;;  %6600 = vmatprep.mubr.msk.f32.mxu0 %vm8631_vm0, %v8632_v1 }
0x1532   :  { %7705 = vmatprep.subr.bf16.mxu0 %v8630_v0 }
0x1535   :  { %7707 = vmatpush3.bf16.msra.mxu0 %v9440_v39 }
0x1536   :  { %7708 = vmatprep.subr.bf16.mxu0 %v8630_v0 }
0x1539   :  { %7710 = vmatpush3.bf16.msra.mxu0 %v9444_v47 }
0x153a   :  { %7711 = vmatprep.subr.bf16.mxu0 %v8630_v0 }
0x153d   :  { %7713 = vmatpush3.bf16.msra.mxu0 %v9448_v52 }
0x153e   :  { %7714 = vmatprep.subr.bf16.mxu0 %v8630_v0 }
0x1541   :  { %7716 = vmatpush3.bf16.msra.mxu0 %v9452_v57 }
0x1542   :  { %7717 = vmatprep.subr.bf16.mxu0 %v8630_v0 }
0x1545   :  { %7719 = vmatpush3.bf16.msra.mxu0 %v9456_v61 }
0x1546   :  { %7720 = vmatprep.subr.bf16.mxu0 %v8630_v0 }
0x1549   :  { %7722 = vmatpush3.bf16.msra.mxu0 %v9460_v3 }
0x154a   :  { %7723 = vmatprep.subr.bf16.mxu0 %v8630_v0 }
0x154d   :  { %7725 = vmatpush3.bf16.msra.mxu0 %v9464_v9 }
0x154e   :  { %7758 = vmatprep.subr.bf16.mxu0 %v8630_v0 }
0x15e3   :  { %v9535_v20 = vpop.f32.mrb[46].mxu0 }
0x15e4   :  { %v9537_v32 = vpop.f32.mrb[47].mxu0 }
0x1603   :  { %v2653_v36 = vpop.f32.mrb[48].mxu0 }
0x1604   :  { %v2657_v25 = vadd.f32 %v2653_v36, %v2416_v35  ;;  %v6567_v31 = vpop.f32.mrb[49].mxu0  ;;  %v2580_v35 = vld [vmem:[#allocation11 + $0xd0] sm:$0xff]  ;;  %v2583_v36 = vld [vmem:[#allocation11 + $0xe8] sm:$0xff] }
0x1605   :  { %v7696_v31 = vpack.c.bf16 %v2580_v35, %v2578_v30  ;;  %v2930_v30 = vld [vmem:[#allocation11 + $0x2b0] sm:$0xff] }
0x1606   :  { %8383 = vtanh.f32 %v2657_v25  ;;  %v2585_v25 = vld [vmem:[#allocation11 + $0xf8] sm:$0xff] }
0x1607   :  { %v7698_v27 = vpack.c.bf16 %v2585_v25, %v2583_v36  ;;  %v2933_v36 = vld [vmem:[#allocation11 + $0x2c8] sm:$0xff]  ;;  %v2935_v25 = vld [vmem:[#allocation11 + $0x2d8] sm:$0xff] }
0x1610   :  { %v8384_v58 = vpop.eup %8383 }
0x1611   :  { %2757 = vmatmul.mubr.f32.vlgmr.msra.gmra.mrb[38].mxu1 %v8384_v58  ;;  %6601 = vmatmul.mubr.f32.vlgmr.msra.gmra.mrb[50].mxu0 %v8384_v58  ;;  %v2910_v58 = vld [vmem:[#allocation11 + $0x210] sm:$0xff] }
0x1612   :  { %7673 = vmatpush1.bf16.msra.mxu1 %v7672_v48  ;;  %2827 = vmatprep.mubr.f32.mxu1 %v8632_v1  ;;  %v2911_v48 = vld [vmem:[#allocation11 + $0x218] sm:$0xff] }
0x1613   :  { %7675 = vmatprep.subr.bf16.mxu1 %v7674_v51  ;;  %7760 = vmatpush3.bf16.msra.mxu0 %v9436_v41  ;;  %v7700_v51 = vpack.c.bf16 %v2584_v43, %v2582_v33  ;;  %v7726_v54 = vpack.c.bf16 %v2911_v48, %v2909_v44  ;;  %v2934_v33 = vld [vmem:[#allocation11 + $0x2d0] sm:$0xff]  ;;  %v2937_v43 = vld [vmem:[#allocation11 + $0x2e8] sm:$0xff]  ;;  %v2939_v44 = vld [vmem:[#allocation11 + $0x2f8] sm:$0xff] }
0x1614   :  { %7761 = vmatprep.subr.bf16.mxu0 %v8630_v0  ;;  %6635 = vmatprep.mubr.msk.f32.mxu0 %vm8631_vm0, %v8632_v1 }
0x1616   :  { %7677 = vmatpush1.bf16.msra.mxu1 %v7676_v2  ;;  %v7728_v2 = vpack.c.bf16 %v2910_v58, %v2908_v55  ;;  %v2938_v55 = vld [vmem:[#allocation11 + $0x2f0] sm:$0xff] }
0x1617   :  { %7679 = vmatprep.subr.bf16.mxu1 %v7678_v18  ;;  %7763 = vmatpush3.bf16.msra.mxu0 %v9440_v39  ;;  %v7730_v18 = vpack.c.bf16 %v2915_v63, %v2913_v60  ;;  %v3088_v60 = vld [vmem:[#allocation11 + $0x308] sm:$0xff]  ;;  %v3090_v63 = vld [vmem:[#allocation11 + $0x318] sm:$0xff] }
0x1618   :  { %7764 = vmatprep.subr.bf16.mxu0 %v8630_v0 }
0x161a   :  { %7681 = vmatpush1.bf16.msra.mxu1 %v7680_v28  ;;  %v7732_v28 = vpack.c.bf16 %v2914_v4, %v2912_v19 }
0x161b   :  { %7683 = vmatprep.subr.bf16.mxu1 %v7682_v34  ;;  %7766 = vmatpush3.bf16.msra.mxu0 %v9444_v47  ;;  %v7734_v34 = vpack.c.bf16 %v2919_v21, %v2917_v15  ;;  %v3087_v21 = vld [vmem:[#allocation11 + $0x300] sm:$0xff] }
0x161c   :  { %7767 = vmatprep.subr.bf16.mxu0 %v8630_v0 }
0x161e   :  { %7685 = vmatpush1.bf16.msra.mxu1 %v7684_v11  ;;  %v7736_v11 = vpack.c.bf16 %v2918_v7, %v2916_v5  ;;  %v3094_v5 = vld [vmem:[#allocation11 + $0x338] sm:$0xff] }
0x161f   :  { %7687 = vmatprep.subr.bf16.mxu1 %v7686_v12  ;;  %7769 = vmatpush3.bf16.msra.mxu0 %v9448_v52  ;;  %v7738_v12 = vpack.c.bf16 %v2923_v56, %v2921_v8  ;;  %v3091_v56 = vld [vmem:[#allocation11 + $0x320] sm:$0xff] }
0x1620   :  { %7770 = vmatprep.subr.bf16.mxu0 %v8630_v0 }
0x1622   :  { %7689 = vmatpush1.bf16.msra.mxu1 %v7688_v17  ;;  %v7742_v17 = vpack.c.bf16 %v2927_v40, %v2925_v16  ;;  %v3095_v40 = vld [vmem:[#allocation11 + $0x340] sm:$0xff] }
0x1623   :  { %7691 = vmatprep.subr.bf16.mxu1 %v7690_v50  ;;  %7772 = vmatpush3.bf16.msra.mxu0 %v9452_v57  ;;  %v2924_v50 = vld [vmem:[#allocation11 + $0x280] sm:$0xff] }
0x1624   :  { %7773 = vmatprep.subr.bf16.mxu0 %v8630_v0  ;;  %v7744_v23 = vpack.c.bf16 %v2926_v62, %v2924_v50  ;;  %v3102_v50 = vld [vmem:[#allocation11 + $0x378] sm:$0xff] }
0x1626   :  { %7693 = vmatpush1.bf16.msra.mxu1 %v7692_v29  ;;  %v7746_v29 = vpack.c.bf16 %v2931_v26, %v2929_v24  ;;  %v3099_v24 = vld [vmem:[#allocation11 + $0x360] sm:$0xff]  ;;  %v3101_v26 = vld [vmem:[#allocation11 + $0x370] sm:$0xff] }
0x1627   :  { %7695 = vmatprep.subr.bf16.mxu1 %v7694_v10  ;;  %7775 = vmatpush3.bf16.msra.mxu0 %v9456_v61  ;;  %v2928_v10 = vld [vmem:[#allocation11 + $0x2a0] sm:$0xff] }
0x1628   :  { %7776 = vmatprep.subr.bf16.mxu0 %v8630_v0  ;;  %v7748_v35 = vpack.c.bf16 %v2930_v30, %v2928_v10  ;;  %v3106_v10 = vld [vmem:[#allocation11 + $0x398] sm:$0xff]  ;;  %v7796_v30 = vpack.c.bf16 %v3101_v26, %v3099_v24 }
0x1629   :  { %v3277_v24 = vld [vmem:[#allocation11 + $0x458] sm:$0xff] }
0x162a   :  { %7697 = vmatpush1.bf16.msra.mxu1 %v7696_v31  ;;  %v2932_v31 = vld [vmem:[#allocation11 + $0x2c0] sm:$0xff] }
0x162b   :  { %7699 = vmatprep.subr.bf16.mxu1 %v7698_v27  ;;  %7778 = vmatpush3.bf16.msra.mxu0 %v9460_v3  ;;  %v7750_v27 = vpack.c.bf16 %v2935_v25, %v2933_v36  ;;  %v7752_v48 = vpack.c.bf16 %v2934_v33, %v2932_v31  ;;  %v3103_v36 = vld [vmem:[#allocation11 + $0x380] sm:$0xff]  ;;  %v3105_v25 = vld [vmem:[#allocation11 + $0x390] sm:$0xff]  ;;  %v3110_v33 = vld [vmem:[#allocation11 + $0x3b8] sm:$0xff] }
0x162c   :  { %7779 = vmatprep.subr.bf16.mxu0 %v8630_v0  ;;  %v7800_v31 = vpack.c.bf16 %v3105_v25, %v3103_v36 }
0x162e   :  { %7701 = vmatpush1.bf16.msra.mxu1 %v7700_v51  ;;  %v7754_v51 = vpack.c.bf16 %v2939_v44, %v2937_v43  ;;  %v3107_v44 = vld [vmem:[#allocation11 + $0x3a0] sm:$0xff] }
0x162f   :  { %7727 = vmatprep.subr.bf16.mxu1 %v7726_v54  ;;  %7781 = vmatpush3.bf16.msra.mxu0 %v9464_v9  ;;  %v2936_v54 = vld [vmem:[#allocation11 + $0x2e0] sm:$0xff] }
0x1630   :  { %7814 = vmatprep.subr.bf16.mxu0 %v8630_v0  ;;  %v7756_v58 = vpack.c.bf16 %v2938_v55, %v2936_v54  ;;  %v3112_v54 = vld [vmem:[#allocation11 + $0x3c8] sm:$0xff]  ;;  %v3114_v55 = vld [vmem:[#allocation11 + $0x3d8] sm:$0xff] }
0x1631   :  { %2828 = vmatmul.mubr.f32.vlgmr.msra.gmra.mrb[38].mxu1 %v9514_v22  ;;  %v7740_v22 = vpack.c.bf16 %v2922_v14, %v2920_v13  ;;  %v3096_v13 = vld [vmem:[#allocation11 + $0x348] sm:$0xff]  ;;  %v3098_v14 = vld [vmem:[#allocation11 + $0x358] sm:$0xff] }
0x1632   :  { %7729 = vmatpush1.bf16.msra.mxu1 %v7728_v2  ;;  %3004 = vmatprep.mubr.f32.mxu1 %v8632_v1  ;;  %v7782_v2 = vpack.c.bf16 %v3090_v63, %v3088_v60  ;;  %v7790_v16 = vpack.c.bf16 %v3098_v14, %v3096_v13  ;;  %v7806_v60 = vpack.c.bf16 %v3114_v55, %v3112_v54  ;;  %v3113_v63 = vld [vmem:[#allocation11 + $0x3d0] sm:$0xff]  ;;  %v3266_v13 = vld [vmem:[#allocation11 + $0x400] sm:$0xff] }
0x1633   :  { %7731 = vmatprep.subr.bf16.mxu1 %v7730_v18  ;;  %v2421_v18 = vadd.f32 %v9511_v59, %v9488_v37  ;;  %v3268_v14 = vld [vmem:[#allocation11 + $0x410] sm:$0xff] }
0x1634   :  { %v3284_v54 = vld [vmem:[#allocation11 + $0x490] sm:$0xff] }
0x1636   :  { %7733 = vmatpush1.bf16.msra.mxu1 %v7732_v28  ;;  %v3089_v28 = vld [vmem:[#allocation11 + $0x310] sm:$0xff] }
0x1637   :  { %7735 = vmatprep.subr.bf16.mxu1 %v7734_v34  ;;  %v3092_v34 = vld [vmem:[#allocation11 + $0x328] sm:$0xff]  ;;  %v7784_v7 = vpack.c.bf16 %v3089_v28, %v3087_v21  ;;  %v3117_v21 = vld [vmem:[#allocation11 + $0x3f0] sm:$0xff] }
0x1638   :  { %v7786_v8 = vpack.c.bf16 %v3094_v5, %v3092_v34  ;;  %v3267_v34 = vld [vmem:[#allocation11 + $0x408] sm:$0xff]  ;;  %v3269_v5 = vld [vmem:[#allocation11 + $0x418] sm:$0xff] }
0x163a   :  { %7737 = vmatpush1.bf16.msra.mxu1 %v7736_v11  ;;  %v3093_v11 = vld [vmem:[#allocation11 + $0x330] sm:$0xff] }
0x163b   :  { %7739 = vmatprep.subr.bf16.mxu1 %v7738_v12  ;;  %v7788_v37 = vpack.c.bf16 %v3093_v11, %v3091_v56 }
0x163e   :  { %7741 = vmatpush1.bf16.msra.mxu1 %v7740_v22  ;;  %v3097_v22 = vld [vmem:[#allocation11 + $0x350] sm:$0xff] }
0x163f   :  { %7743 = vmatprep.subr.bf16.mxu1 %v7742_v17  ;;  %v3100_v17 = vld [vmem:[#allocation11 + $0x368] sm:$0xff]  ;;  %v7792_v62 = vpack.c.bf16 %v3097_v22, %v3095_v40  ;;  %v7840_v40 = vpack.c.bf16 %v3268_v14, %v3266_v13 }
0x1640   :  { %v3446_v14 = vld [vmem:[#allocation11 + $0x508] sm:$0xff] }
0x1642   :  { %7745 = vmatpush1.bf16.msra.mxu1 %v7744_v23  ;;  %v7794_v23 = vpack.c.bf16 %v3102_v50, %v3100_v17  ;;  %v3270_v17 = vld [vmem:[#allocation11 + $0x420] sm:$0xff]  ;;  %v3272_v50 = vld [vmem:[#allocation11 + $0x430] sm:$0xff] }
0x1643   :  { %7747 = vmatprep.subr.bf16.mxu1 %v7746_v29  ;;  %v3104_v29 = vld [vmem:[#allocation11 + $0x388] sm:$0xff] }
0x1646   :  { %7749 = vmatpush1.bf16.msra.mxu1 %v7748_v35  ;;  %v7798_v35 = vpack.c.bf16 %v3106_v10, %v3104_v29  ;;  %v3274_v29 = vld [vmem:[#allocation11 + $0x440] sm:$0xff]  ;;  %v3276_v10 = vld [vmem:[#allocation11 + $0x450] sm:$0xff] }
0x1647   :  { %7751 = vmatprep.subr.bf16.mxu1 %v7750_v27  ;;  %v3108_v27 = vld [vmem:[#allocation11 + $0x3a8] sm:$0xff]  ;;  %v7848_v36 = vpack.c.bf16 %v3276_v10, %v3274_v29  ;;  %v3449_v10 = vld [vmem:[#allocation11 + $0x520] sm:$0xff] }
0x1648   :  { %v7802_v43 = vpack.c.bf16 %v3110_v33, %v3108_v27  ;;  %v3280_v27 = vld [vmem:[#allocation11 + $0x470] sm:$0xff]  ;;  %v3283_v33 = vld [vmem:[#allocation11 + $0x488] sm:$0xff] }
0x164a   :  { %7753 = vmatpush1.bf16.msra.mxu1 %v7752_v48  ;;  %v3109_v48 = vld [vmem:[#allocation11 + $0x3b0] sm:$0xff] }
0x164b   :  { %7755 = vmatprep.subr.bf16.mxu1 %v7754_v51  ;;  %v7804_v51 = vpack.c.bf16 %v3109_v48, %v3107_v44 }
0x164e   :  { %7757 = vmatpush1.bf16.msra.mxu1 %v7756_v58  ;;  %v3111_v58 = vld [vmem:[#allocation11 + $0x3c0] sm:$0xff] }
0x164f   :  { %7783 = vmatprep.subr.bf16.mxu1 %v7782_v2  ;;  %v3116_v2 = vld [vmem:[#allocation11 + $0x3e8] sm:$0xff] }
0x16e4   :  { %v2901_v19 = vpop.f32.mrb[50].mxu0 }
0x16e5   :  { %v2905_v4 = vadd.f32 %v2901_v19, %v2421_v18  ;;  %v6602_v15 = vpop.f32.mrb[51].mxu0  ;;  %v3118_v18 = vld [vmem:[#allocation11 + $0x3f8] sm:$0xff]  ;;  %v7808_v19 = vpack.c.bf16 %v3113_v63, %v3111_v58  ;;  %v3287_v58 = vld [vmem:[#allocation11 + $0x4a8] sm:$0xff] }
0x16e6   :  { %v3115_v15 = vld [vmem:[#allocation11 + $0x3e0] sm:$0xff] }
0x16e7   :  { %8385 = vtanh.f32 %v2905_v4  ;;  %v7810_v4 = vpack.c.bf16 %v3118_v18, %v3116_v2  ;;  %v7812_v28 = vpack.c.bf16 %v3117_v21, %v3115_v15  ;;  %v3286_v2 = vld [vmem:[#allocation11 + $0x4a0] sm:$0xff]  ;;  %v3288_v18 = vld [vmem:[#allocation11 + $0x4b0] sm:$0xff]  ;;  %v3293_v15 = vld [vmem:[#allocation11 + $0x4d8] sm:$0xff] }
0x16e8   :  { %v3290_v21 = vld [vmem:[#allocation11 + $0x4c0] sm:$0xff] }
0x16f1   :  { %v8386_v12 = vpop.eup %8385 }
0x16f2   :  { %3005 = vmatmul.mubr.f32.vlgmr.msra.gmra.mrb[38].mxu1 %v8386_v12  ;;  %6636 = vmatmul.mubr.f32.vlgmr.msra.gmra.mrb[52].mxu0 %v8386_v12 }
0x16f3   :  { %7785 = vmatpush1.bf16.msra.mxu1 %v7784_v7  ;;  %7816 = vmatpush3.bf16.msra.mxu0 %v9436_v41  ;;  %v7838_v7 = vpack.c.bf16 %v3269_v5, %v3267_v34  ;;  %v3292_v34 = vld [vmem:[#allocation11 + $0x4d0] sm:$0xff]  ;;  %v3295_v5 = vld [vmem:[#allocation11 + $0x4e8] sm:$0xff] }
0x16f4   :  { %7787 = vmatprep.subr.bf16.mxu1 %v7786_v8  ;;  %7817 = vmatprep.subr.bf16.mxu0 %v8630_v0  ;;  %v2426_v8 = vadd.f32 %v9485_v38, %v9511_v59  ;;  %v7844_v38 = vpack.c.bf16 %v3272_v50, %v3270_v17 }
0x16f5   :  { %3183 = vmatprep.mubr.f32.mxu1 %v8632_v1  ;;  %6670 = vmatprep.mubr.msk.f32.mxu0 %vm8631_vm0, %v8632_v1 }
0x16f7   :  { %7789 = vmatpush1.bf16.msra.mxu1 %v7788_v37  ;;  %7819 = vmatpush3.bf16.msra.mxu0 %v9440_v39  ;;  %v3271_v37 = vld [vmem:[#allocation11 + $0x428] sm:$0xff] }
0x16f8   :  { %7791 = vmatprep.subr.bf16.mxu1 %v7790_v16  ;;  %7820 = vmatprep.subr.bf16.mxu0 %v8630_v0  ;;  %v3273_v16 = vld [vmem:[#allocation11 + $0x438] sm:$0xff] }
0x16f9   :  { %v7842_v22 = vpack.c.bf16 %v3273_v16, %v3271_v37  ;;  %v3448_v37 = vld [vmem:[#allocation11 + $0x518] sm:$0xff] }
0x16fa   :  { %v7894_v16 = vpack.c.bf16 %v3448_v37, %v3446_v14  ;;  %v3476_v14 = vld [vmem:[#allocation11 + $0x5f8] sm:$0xff] }
0x16fb   :  { %7793 = vmatpush1.bf16.msra.mxu1 %v7792_v62  ;;  %7822 = vmatpush3.bf16.msra.mxu0 %v9444_v47 }
0x16fc   :  { %7795 = vmatprep.subr.bf16.mxu1 %v7794_v23  ;;  %7823 = vmatprep.subr.bf16.mxu0 %v8630_v0  ;;  %v3275_v23 = vld [vmem:[#allocation11 + $0x448] sm:$0xff] }
0x16fd   :  { %v7846_v26 = vpack.c.bf16 %v3277_v24, %v3275_v23  ;;  %v3447_v23 = vld [vmem:[#allocation11 + $0x510] sm:$0xff]  ;;  %v3450_v24 = vld [vmem:[#allocation11 + $0x528] sm:$0xff] }
0x16ff   :  { %7797 = vmatpush1.bf16.msra.mxu1 %v7796_v30  ;;  %7825 = vmatpush3.bf16.msra.mxu0 %v9448_v52  ;;  %v3279_v30 = vld [vmem:[#allocation11 + $0x468] sm:$0xff] }
0x1700   :  { %7799 = vmatprep.subr.bf16.mxu1 %v7798_v35  ;;  %7826 = vmatprep.subr.bf16.mxu0 %v8630_v0  ;;  %v3281_v35 = vld [vmem:[#allocation11 + $0x478] sm:$0xff] }
0x1701   :  { %v7850_v25 = vpack.c.bf16 %v3281_v35, %v3279_v30  ;;  %v3451_v30 = vld [vmem:[#allocation11 + $0x530] sm:$0xff] }
0x1703   :  { %7801 = vmatpush1.bf16.msra.mxu1 %v7800_v31  ;;  %7828 = vmatpush3.bf16.msra.mxu0 %v9452_v57  ;;  %v3278_v31 = vld [vmem:[#allocation11 + $0x460] sm:$0xff] }
0x1704   :  { %7829 = vmatprep.subr.bf16.mxu0 %v8630_v0  ;;  %7803 = vmatprep.subr.bf16.mxu1 %v7802_v43  ;;  %v3285_v43 = vld [vmem:[#allocation11 + $0x498] sm:$0xff]  ;;  %v7852_v44 = vpack.c.bf16 %v3280_v27, %v3278_v31  ;;  %v3453_v31 = vld [vmem:[#allocation11 + $0x540] sm:$0xff]  ;;  %v3455_v27 = vld [vmem:[#allocation11 + $0x550] sm:$0xff] }
0x1705   :  { %v7854_v48 = vpack.c.bf16 %v3285_v43, %v3283_v33  ;;  %v3458_v33 = vld [vmem:[#allocation11 + $0x568] sm:$0xff]  ;;  %v3460_v43 = vld [vmem:[#allocation11 + $0x578] sm:$0xff] }
0x1707   :  { %7831 = vmatpush3.bf16.msra.mxu0 %v9456_v61  ;;  %7805 = vmatpush1.bf16.msra.mxu1 %v7804_v51  ;;  %v3282_v51 = vld [vmem:[#allocation11 + $0x480] sm:$0xff] }
0x1708   :  { %7832 = vmatprep.subr.bf16.mxu0 %v8630_v0  ;;  %7807 = vmatprep.subr.bf16.mxu1 %v7806_v60  ;;  %v7856_v55 = vpack.c.bf16 %v3284_v54, %v3282_v51  ;;  %v3289_v60 = vld [vmem:[#allocation11 + $0x4b8] sm:$0xff]  ;;  %v3457_v51 = vld [vmem:[#allocation11 + $0x560] sm:$0xff]  ;;  %v3459_v54 = vld [vmem:[#allocation11 + $0x570] sm:$0xff] }
0x1709   :  { %v7858_v63 = vpack.c.bf16 %v3289_v60, %v3287_v58  ;;  %v3464_v58 = vld [vmem:[#allocation11 + $0x598] sm:$0xff]  ;;  %v7908_v60 = vpack.c.bf16 %v3459_v54, %v3457_v51  ;;  %v3632_v51 = vld [vmem:[#allocation11 + $0x640] sm:$0xff]  ;;  %v3634_v54 = vld [vmem:[#allocation11 + $0x650] sm:$0xff] }
0x170b   :  { %7834 = vmatpush3.bf16.msra.mxu0 %v9460_v3  ;;  %7809 = vmatpush1.bf16.msra.mxu1 %v7808_v19  ;;  %v7860_v19 = vpack.c.bf16 %v3288_v18, %v3286_v2  ;;  %v3461_v2 = vld [vmem:[#allocation11 + $0x580] sm:$0xff]  ;;  %v3463_v18 = vld [vmem:[#allocation11 + $0x590] sm:$0xff] }
0x170c   :  { %7835 = vmatprep.subr.bf16.mxu0 %v8630_v0  ;;  %7811 = vmatprep.subr.bf16.mxu1 %v7810_v4  ;;  %v3291_v4 = vld [vmem:[#allocation11 + $0x4c8] sm:$0xff] }
0x170f   :  { %7837 = vmatpush3.bf16.msra.mxu0 %v9464_v9  ;;  %7813 = vmatpush1.bf16.msra.mxu1 %v7812_v28  ;;  %v7862_v28 = vpack.c.bf16 %v3293_v15, %v3291_v4  ;;  %v3466_v4 = vld [vmem:[#allocation11 + $0x5a8] sm:$0xff]  ;;  %v3468_v15 = vld [vmem:[#allocation11 + $0x5b8] sm:$0xff] }
0x1710   :  { %7870 = vmatprep.subr.bf16.mxu0 %v8630_v0  ;;  %7839 = vmatprep.subr.bf16.mxu1 %v7838_v7  ;;  %v3297_v7 = vld [vmem:[#allocation11 + $0x4f8] sm:$0xff] }
0x17c5   :  { %v3080_v56 = vpop.f32.mrb[52].mxu0 }
0x17c6   :  { %v3084_v11 = vadd.f32 %v3080_v56, %v2426_v8  ;;  %v6637_v12 = vpop.f32.mrb[53].mxu0  ;;  %v7864_v8 = vpack.c.bf16 %v3292_v34, %v3290_v21  ;;  %v7866_v56 = vpack.c.bf16 %v3297_v7, %v3295_v5  ;;  %v7914_v21 = vpack.c.bf16 %v3468_v15, %v3466_v4  ;;  %v3467_v34 = vld [vmem:[#allocation11 + $0x5b0] sm:$0xff]  ;;  %v3470_v7 = vld [vmem:[#allocation11 + $0x5c8] sm:$0xff]  ;;  %v3643_v4 = vld [vmem:[#allocation11 + $0x698] sm:$0xff] }
0x17c7   :  { %v3296_v12 = vld [vmem:[#allocation11 + $0x4f0] sm:$0xff] }
0x17c8   :  { %8387 = vtanh.f32 %v3084_v11  ;;  %v3294_v11 = vld [vmem:[#allocation11 + $0x4e0] sm:$0xff] }
0x17c9   :  { %v7868_v13 = vpack.c.bf16 %v3296_v12, %v3294_v11  ;;  %v3471_v12 = vld [vmem:[#allocation11 + $0x5d0] sm:$0xff] }
0x17d2   :  { %v8388_v62 = vpop.eup %8387 }
0x17d3   :  { %3184 = vmatmul.mubr.f32.vlgmr.msra.gmra.mrb[38].mxu1 %v8388_v62  ;;  %6671 = vmatmul.mubr.f32.vlgmr.msra.gmra.mrb[54].mxu0 %v8388_v62  ;;  %v3445_v62 = vld [vmem:[#allocation11 + $0x500] sm:$0xff] }
0x17d4   :  { %7841 = vmatpush1.bf16.msra.mxu1 %v7840_v40  ;;  %7872 = vmatpush3.bf16.msra.mxu0 %v9436_v41  ;;  %v2431_v40 = vadd.f32 %v9511_v59, %v9494_v45  ;;  %v7900_v45 = vpack.c.bf16 %v3451_v30, %v3449_v10  ;;  %v3624_v30 = vld [vmem:[#allocation11 + $0x600] sm:$0xff] }
0x17d5   :  { %7843 = vmatprep.subr.bf16.mxu1 %v7842_v22  ;;  %7873 = vmatprep.subr.bf16.mxu0 %v8630_v0 }
0x17d6   :  { %3362 = vmatprep.mubr.f32.mxu1 %v8632_v1  ;;  %6705 = vmatprep.mubr.msk.f32.mxu0 %vm8631_vm0, %v8632_v1 }
0x17d8   :  { %7845 = vmatpush1.bf16.msra.mxu1 %v7844_v38  ;;  %7875 = vmatpush3.bf16.msra.mxu0 %v9440_v39  ;;  %v3452_v38 = vld [vmem:[#allocation11 + $0x538] sm:$0xff] }
0x17d9   :  { %7847 = vmatprep.subr.bf16.mxu1 %v7846_v26  ;;  %7876 = vmatprep.subr.bf16.mxu0 %v8630_v0  ;;  %v7896_v26 = vpack.c.bf16 %v3447_v23, %v3445_v62  ;;  %v7898_v29 = vpack.c.bf16 %v3452_v38, %v3450_v24  ;;  %v3627_v62 = vld [vmem:[#allocation11 + $0x618] sm:$0xff] }
0x17da   :  { %v9625_v24 = vld [vmem:[#allocation9 + $0x2] ss:$0 sm:$0xff] }
0x17db   :  { %v2436_v38 = vadd.f32 %v9625_v24, %v9491_v42 }
0x17dc   :  { %7849 = vmatpush1.bf16.msra.mxu1 %v7848_v36  ;;  %7878 = vmatpush3.bf16.msra.mxu0 %v9444_v47  ;;  %v3454_v36 = vld [vmem:[#allocation11 + $0x548] sm:$0xff] }
0x17dd   :  { %7851 = vmatprep.subr.bf16.mxu1 %v7850_v25  ;;  %7879 = vmatprep.subr.bf16.mxu0 %v8630_v0  ;;  %v3456_v25 = vld [vmem:[#allocation11 + $0x558] sm:$0xff] }
0x17de   :  { %v7902_v59 = vpack.c.bf16 %v3456_v25, %v3454_v36  ;;  %v3629_v36 = vld [vmem:[#allocation11 + $0x628] sm:$0xff]  ;;  %v3631_v25 = vld [vmem:[#allocation11 + $0x638] sm:$0xff] }
0x17e0   :  { %7853 = vmatpush1.bf16.msra.mxu1 %v7852_v44  ;;  %7881 = vmatpush3.bf16.msra.mxu0 %v9448_v52  ;;  %v7904_v44 = vpack.c.bf16 %v3455_v27, %v3453_v31  ;;  %v3628_v31 = vld [vmem:[#allocation11 + $0x620] sm:$0xff]  ;;  %v3630_v27 = vld [vmem:[#allocation11 + $0x630] sm:$0xff] }
0x17e1   :  { %7855 = vmatprep.subr.bf16.mxu1 %v7854_v48  ;;  %7882 = vmatprep.subr.bf16.mxu0 %v8630_v0  ;;  %v7906_v48 = vpack.c.bf16 %v3460_v43, %v3458_v33  ;;  %v3633_v43 = vld [vmem:[#allocation11 + $0x648] sm:$0xff]  ;;  %v7956_v42 = vpack.c.bf16 %v3630_v27, %v3628_v31  ;;  %v3803_v31 = vld [vmem:[#allocation11 + $0x700] sm:$0xff]  ;;  %v3805_v27 = vld [vmem:[#allocation11 + $0x710] sm:$0xff] }
0x17e4   :  { %7857 = vmatpush1.bf16.msra.mxu1 %v7856_v55  ;;  %7884 = vmatpush3.bf16.msra.mxu0 %v9452_v57  ;;  %v3462_v55 = vld [vmem:[#allocation11 + $0x588] sm:$0xff] }
0x17e5   :  { %7885 = vmatprep.subr.bf16.mxu0 %v8630_v0  ;;  %7859 = vmatprep.subr.bf16.mxu1 %v7858_v63  ;;  %v7910_v63 = vpack.c.bf16 %v3464_v58, %v3462_v55  ;;  %v3637_v55 = vld [vmem:[#allocation11 + $0x668] sm:$0xff]  ;;  %v3639_v58 = vld [vmem:[#allocation11 + $0x678] sm:$0xff] }
0x17e8   :  { %7887 = vmatpush3.bf16.msra.mxu0 %v9456_v61  ;;  %7861 = vmatpush1.bf16.msra.mxu1 %v7860_v19  ;;  %v7912_v19 = vpack.c.bf16 %v3463_v18, %v3461_v2  ;;  %v3636_v2 = vld [vmem:[#allocation11 + $0x660] sm:$0xff]  ;;  %v3638_v18 = vld [vmem:[#allocation11 + $0x670] sm:$0xff] }
0x17e9   :  { %7888 = vmatprep.subr.bf16.mxu0 %v8630_v0  ;;  %7863 = vmatprep.subr.bf16.mxu1 %v7862_v28  ;;  %v3465_v28 = vld [vmem:[#allocation11 + $0x5a0] sm:$0xff]  ;;  %v7964_v15 = vpack.c.bf16 %v3638_v18, %v3636_v2  ;;  %v3813_v2 = vld [vmem:[#allocation11 + $0x750] sm:$0xff]  ;;  %v3816_v18 = vld [vmem:[#allocation11 + $0x768] sm:$0xff] }
0x17ea   :  { %v7916_v5 = vpack.c.bf16 %v3467_v34, %v3465_v28  ;;  %v3640_v28 = vld [vmem:[#allocation11 + $0x680] sm:$0xff]  ;;  %v3642_v34 = vld [vmem:[#allocation11 + $0x690] sm:$0xff] }
0x17ec   :  { %7890 = vmatpush3.bf16.msra.mxu0 %v9460_v3  ;;  %7865 = vmatpush1.bf16.msra.mxu1 %v7864_v8  ;;  %v3472_v8 = vld [vmem:[#allocation11 + $0x5d8] sm:$0xff] }
0x17ed   :  { %7891 = vmatprep.subr.bf16.mxu0 %v8630_v0  ;;  %7867 = vmatprep.subr.bf16.mxu1 %v7866_v56  ;;  %v3469_v56 = vld [vmem:[#allocation11 + $0x5c0] sm:$0xff]  ;;  %v7918_v11 = vpack.c.bf16 %v3472_v8, %v3470_v7  ;;  %v3645_v7 = vld [vmem:[#allocation11 + $0x6a8] sm:$0xff]  ;;  %v3647_v8 = vld [vmem:[#allocation11 + $0x6b8] sm:$0xff] }
0x17ee   :  { %v7920_v37 = vpack.c.bf16 %v3471_v12, %v3469_v56  ;;  %v7970_v56 = vpack.c.bf16 %v3647_v8, %v3645_v7  ;;  %v3646_v12 = vld [vmem:[#allocation11 + $0x6b0] sm:$0xff] }
0x17f0   :  { %7893 = vmatpush3.bf16.msra.mxu0 %v9464_v9  ;;  %7869 = vmatpush1.bf16.msra.mxu1 %v7868_v13  ;;  %v3474_v13 = vld [vmem:[#allocation11 + $0x5e8] sm:$0xff] }
0x17f1   :  { %7926 = vmatprep.subr.bf16.mxu0 %v8630_v0  ;;  %7895 = vmatprep.subr.bf16.mxu1 %v7894_v16  ;;  %v7922_v16 = vpack.c.bf16 %v3476_v14, %v3474_v13  ;;  %v3649_v14 = vld [vmem:[#allocation11 + $0x6c8] sm:$0xff] }
0x18a6   :  { %v3259_v22 = vpop.f32.mrb[54].mxu0 }
0x18a7   :  { %v3263_v17 = vadd.f32 %v3259_v22, %v2431_v40  ;;  %v6672_v50 = vpop.f32.mrb[55].mxu0  ;;  %v3473_v40 = vld [vmem:[#allocation11 + $0x5e0] sm:$0xff]  ;;  %v3475_v22 = vld [vmem:[#allocation11 + $0x5f0] sm:$0xff] }
0x18a8   :  { %v3625_v50 = vld [vmem:[#allocation11 + $0x608] sm:$0xff] }
0x18a9   :  { %8389 = vtanh.f32 %v3263_v17  ;;  %v7924_v17 = vpack.c.bf16 %v3475_v22, %v3473_v40  ;;  %v7950_v23 = vpack.c.bf16 %v3627_v62, %v3625_v50  ;;  %v3650_v22 = vld [vmem:[#allocation11 + $0x6d0] sm:$0xff]  ;;  %v3655_v50 = vld [vmem:[#allocation11 + $0x6f8] sm:$0xff] }
0x18b3   :  { %v8390_v35 = vpop.eup %8389 }
0x18b4   :  { %3363 = vmatmul.mubr.f32.vlgmr.msra.gmra.mrb[38].mxu1 %v8390_v35  ;;  %6706 = vmatmul.mubr.f32.vlgmr.msra.gmra.mrb[56].mxu0 %v8390_v35  ;;  %v3626_v35 = vld [vmem:[#allocation11 + $0x610] sm:$0xff] }
0x18b5   :  { %7897 = vmatpush1.bf16.msra.mxu1 %v7896_v26  ;;  %7928 = vmatpush3.bf16.msra.mxu0 %v9436_v41 }
0x18b6   :  { %7899 = vmatprep.subr.bf16.mxu1 %v7898_v29  ;;  %7929 = vmatprep.subr.bf16.mxu0 %v8630_v0 }
0x18b7   :  { %3541 = vmatprep.mubr.f32.mxu1 %v8632_v1  ;;  %6740 = vmatprep.mubr.msk.f32.mxu0 %vm8631_vm0, %v8632_v1 }
0x18b9   :  { %7901 = vmatpush1.bf16.msra.mxu1 %v7900_v45  ;;  %7931 = vmatpush3.bf16.msra.mxu0 %v9440_v39  ;;  %v7952_v45 = vpack.c.bf16 %v3626_v35, %v3624_v30  ;;  %v3806_v30 = vld [vmem:[#allocation11 + $0x718] sm:$0xff] }
0x18ba   :  { %7903 = vmatprep.subr.bf16.mxu1 %v7902_v59  ;;  %7932 = vmatprep.subr.bf16.mxu0 %v8630_v0  ;;  %v7954_v59 = vpack.c.bf16 %v3631_v25, %v3629_v36  ;;  %v2441_v36 = vadd.f32 %v9625_v24, %v9499_v6 }
0x18bd   :  { %7905 = vmatpush1.bf16.msra.mxu1 %v7904_v44  ;;  %7934 = vmatpush3.bf16.msra.mxu0 %v9444_v47  ;;  %v3635_v44 = vld [vmem:[#allocation11 + $0x658] sm:$0xff] }
0x18be   :  { %7907 = vmatprep.subr.bf16.mxu1 %v7906_v48  ;;  %7935 = vmatprep.subr.bf16.mxu0 %v8630_v0  ;;  %v7958_v48 = vpack.c.bf16 %v3635_v44, %v3633_v43  ;;  %v3810_v43 = vld [vmem:[#allocation11 + $0x738] sm:$0xff]  ;;  %v8008_v44 = vpack.c.bf16 %v3805_v27, %v3803_v31  ;;  %v2446_v27 = vadd.f32 %v9625_v24, %v9497_v49 }
0x18c1   :  { %7909 = vmatpush1.bf16.msra.mxu1 %v7908_v60  ;;  %7937 = vmatpush3.bf16.msra.mxu0 %v9448_v52  ;;  %v7960_v60 = vpack.c.bf16 %v3634_v54, %v3632_v51  ;;  %v3809_v51 = vld [vmem:[#allocation11 + $0x730] sm:$0xff] }
0x18c2   :  { %7911 = vmatprep.subr.bf16.mxu1 %v7910_v63  ;;  %7938 = vmatprep.subr.bf16.mxu0 %v8630_v0  ;;  %v7962_v63 = vpack.c.bf16 %v3639_v58, %v3637_v55  ;;  %v3812_v55 = vld [vmem:[#allocation11 + $0x748] sm:$0xff]  ;;  %v3814_v58 = vld [vmem:[#allocation11 + $0x758] sm:$0xff] }
0x18c5   :  { %7913 = vmatpush1.bf16.msra.mxu1 %v7912_v19  ;;  %7940 = vmatpush3.bf16.msra.mxu0 %v9452_v57  ;;  %v3641_v19 = vld [vmem:[#allocation11 + $0x688] sm:$0xff] }
0x18c6   :  { %7941 = vmatprep.subr.bf16.mxu0 %v8630_v0  ;;  %7915 = vmatprep.subr.bf16.mxu1 %v7914_v21  ;;  %v7966_v21 = vpack.c.bf16 %v3643_v4, %v3641_v19  ;;  %v3818_v19 = vld [vmem:[#allocation11 + $0x778] sm:$0xff] }
0x18c9   :  { %7943 = vmatpush3.bf16.msra.mxu0 %v9456_v61  ;;  %7917 = vmatpush1.bf16.msra.mxu1 %v7916_v5  ;;  %v7968_v5 = vpack.c.bf16 %v3642_v34, %v3640_v28  ;;  %v3817_v28 = vld [vmem:[#allocation11 + $0x770] sm:$0xff]  ;;  %v3820_v34 = vld [vmem:[#allocation11 + $0x788] sm:$0xff] }
0x18ca   :  { %7944 = vmatprep.subr.bf16.mxu0 %v8630_v0  ;;  %7919 = vmatprep.subr.bf16.mxu1 %v7918_v11  ;;  %v3644_v11 = vld [vmem:[#allocation11 + $0x6a0] sm:$0xff] }
0x18cb   :  { %v7972_v13 = vpack.c.bf16 %v3646_v12, %v3644_v11  ;;  %v3821_v11 = vld [vmem:[#allocation11 + $0x790] sm:$0xff] }
0x18cd   :  { %7946 = vmatpush3.bf16.msra.mxu0 %v9460_v3  ;;  %7921 = vmatpush1.bf16.msra.mxu1 %v7920_v37  ;;  %v3651_v37 = vld [vmem:[#allocation11 + $0x6d8] sm:$0xff] }
0x18ce   :  { %7947 = vmatprep.subr.bf16.mxu0 %v8630_v0  ;;  %7923 = vmatprep.subr.bf16.mxu1 %v7922_v16  ;;  %v3648_v16 = vld [vmem:[#allocation11 + $0x6c0] sm:$0xff]  ;;  %v7974_v40 = vpack.c.bf16 %v3651_v37, %v3649_v14  ;;  %v3826_v14 = vld [vmem:[#allocation11 + $0x7b8] sm:$0xff] }
0x18cf   :  { %v7976_v62 = vpack.c.bf16 %v3650_v22, %v3648_v16  ;;  %v3823_v16 = vld [vmem:[#allocation11 + $0x7a0] sm:$0xff] }
0x18d1   :  { %7949 = vmatpush3.bf16.msra.mxu0 %v9464_v9  ;;  %7925 = vmatpush1.bf16.msra.mxu1 %v7924_v17  ;;  %v3653_v17 = vld [vmem:[#allocation11 + $0x6e8] sm:$0xff] }
0x18d2   :  { %7982 = vmatprep.subr.bf16.mxu0 %v8630_v0  ;;  %7951 = vmatprep.subr.bf16.mxu1 %v7950_v23  ;;  %v7978_v23 = vpack.c.bf16 %v3655_v50, %v3653_v17  ;;  %v3828_v17 = vld [vmem:[#allocation11 + $0x7c8] sm:$0xff]  ;;  %v3830_v50 = vld [vmem:[#allocation11 + $0x7d8] sm:$0xff] }
0x1987   :  { %v3438_v26 = vpop.f32.mrb[56].mxu0 }
0x1988   :  { %v3442_v29 = vadd.f32 %v3438_v26, %v2436_v38  ;;  %v6707_v10 = vpop.f32.mrb[57].mxu0  ;;  %v3652_v38 = vld [vmem:[#allocation11 + $0x6e0] sm:$0xff]  ;;  %v3654_v26 = vld [vmem:[#allocation11 + $0x6f0] sm:$0xff] }
0x1989   :  { %v3804_v10 = vld [vmem:[#allocation11 + $0x708] sm:$0xff] }
0x198a   :  { %8391 = vtanh.f32 %v3442_v29  ;;  %v7980_v29 = vpack.c.bf16 %v3654_v26, %v3652_v38  ;;  %v8006_v35 = vpack.c.bf16 %v3806_v30, %v3804_v10  ;;  %v3829_v38 = vld [vmem:[#allocation11 + $0x7d0] sm:$0xff]  ;;  %v3832_v26 = vld [vmem:[#allocation11 + $0x7e8] sm:$0xff] }
0x1994   :  { %v8392_v33 = vpop.eup %8391 }
0x1995   :  { %3542 = vmatmul.mubr.f32.vlgmr.msra.gmra.mrb[38].mxu1 %v8392_v33  ;;  %6741 = vmatmul.mubr.f32.vlgmr.msra.gmra.mrb[58].mxu0 %v8392_v33  ;;  %v3808_v33 = vld [vmem:[#allocation11 + $0x728] sm:$0xff] }
0x1996   :  { %7953 = vmatpush1.bf16.msra.mxu1 %v7952_v45  ;;  %7984 = vmatpush3.bf16.msra.mxu0 %v9436_v41 }
0x1997   :  { %7955 = vmatprep.subr.bf16.mxu1 %v7954_v59  ;;  %7985 = vmatprep.subr.bf16.mxu0 %v8630_v0 }
0x1998   :  { %3720 = vmatprep.mubr.f32.mxu1 %v8632_v1  ;;  %6775 = vmatprep.mubr.msk.f32.mxu0 %vm8631_vm0, %v8632_v1 }
0x199a   :  { %7957 = vmatpush1.bf16.msra.mxu1 %v7956_v42  ;;  %7987 = vmatpush3.bf16.msra.mxu0 %v9440_v39  ;;  %v8010_v42 = vpack.c.bf16 %v3810_v43, %v3808_v33 }
0x199b   :  { %7959 = vmatprep.subr.bf16.mxu1 %v7958_v48  ;;  %7988 = vmatprep.subr.bf16.mxu0 %v8630_v0  ;;  %v3807_v48 = vld [vmem:[#allocation11 + $0x720] sm:$0xff] }
0x199c   :  { %v8012_v6 = vpack.c.bf16 %v3809_v51, %v3807_v48  ;;  %v3984_v48 = vld [vmem:[#allocation11 + $0x810] sm:$0xff]  ;;  %v3987_v51 = vld [vmem:[#allocation11 + $0x828] sm:$0xff] }
0x199e   :  { %7961 = vmatpush1.bf16.msra.mxu1 %v7960_v60  ;;  %7990 = vmatpush3.bf16.msra.mxu0 %v9444_v47  ;;  %v8014_v60 = vpack.c.bf16 %v3814_v58, %v3812_v55 }
0x199f   :  { %7963 = vmatprep.subr.bf16.mxu1 %v7962_v63  ;;  %7991 = vmatprep.subr.bf16.mxu0 %v8630_v0  ;;  %v3811_v63 = vld [vmem:[#allocation11 + $0x740] sm:$0xff] }
0x19a0   :  { %v8016_v4 = vpack.c.bf16 %v3813_v2, %v3811_v63  ;;  %v3991_v2 = vld [vmem:[#allocation11 + $0x848] sm:$0xff] }
0x19a2   :  { %7965 = vmatpush1.bf16.msra.mxu1 %v7964_v15  ;;  %7993 = vmatpush3.bf16.msra.mxu0 %v9448_v52  ;;  %v8018_v15 = vpack.c.bf16 %v3818_v19, %v3816_v18  ;;  %v3993_v18 = vld [vmem:[#allocation11 + $0x858] sm:$0xff] }
0x19a3   :  { %7967 = vmatprep.subr.bf16.mxu1 %v7966_v21  ;;  %7994 = vmatprep.subr.bf16.mxu0 %v8630_v0  ;;  %v3815_v21 = vld [vmem:[#allocation11 + $0x760] sm:$0xff]  ;;  %v8070_v19 = vpack.c.bf16 %v3993_v18, %v3991_v2 }
0x19a4   :  { %v8020_v7 = vpack.c.bf16 %v3817_v28, %v3815_v21  ;;  %v3995_v21 = vld [vmem:[#allocation11 + $0x868] sm:$0xff]  ;;  %v3997_v28 = vld [vmem:[#allocation11 + $0x878] sm:$0xff]  ;;  %v4165_v18 = vld [vmem:[#allocation11 + $0x920] sm:$0xff] }
0x19a6   :  { %7969 = vmatpush1.bf16.msra.mxu1 %v7968_v5  ;;  %7996 = vmatpush3.bf16.msra.mxu0 %v9452_v57  ;;  %v3822_v5 = vld [vmem:[#allocation11 + $0x798] sm:$0xff] }
0x19a7   :  { %7997 = vmatprep.subr.bf16.mxu0 %v8630_v0  ;;  %7971 = vmatprep.subr.bf16.mxu1 %v7970_v56  ;;  %v8022_v8 = vpack.c.bf16 %v3822_v5, %v3820_v34  ;;  %v3819_v56 = vld [vmem:[#allocation11 + $0x780] sm:$0xff]  ;;  %v8074_v5 = vpack.c.bf16 %v3997_v28, %v3995_v21 }
0x19a8   :  { %v8024_v12 = vpack.c.bf16 %v3821_v11, %v3819_v56  ;;  %v3999_v56 = vld [vmem:[#allocation11 + $0x888] sm:$0xff]  ;;  %v4001_v11 = vld [vmem:[#allocation11 + $0x898] sm:$0xff]  ;;  %v4169_v28 = vld [vmem:[#allocation11 + $0x940] sm:$0xff] }
0x19aa   :  { %7999 = vmatpush3.bf16.msra.mxu0 %v9456_v61  ;;  %7973 = vmatpush1.bf16.msra.mxu1 %v7972_v13  ;;  %v3824_v13 = vld [vmem:[#allocation11 + $0x7a8] sm:$0xff] }
0x19ab   :  { %8000 = vmatprep.subr.bf16.mxu0 %v8630_v0  ;;  %7975 = vmatprep.subr.bf16.mxu1 %v7974_v40  ;;  %v8026_v37 = vpack.c.bf16 %v3826_v14, %v3824_v13  ;;  %v3825_v40 = vld [vmem:[#allocation11 + $0x7b0] sm:$0xff]  ;;  %v8078_v13 = vpack.c.bf16 %v4001_v11, %v3999_v56  ;;  %v3998_v14 = vld [vmem:[#allocation11 + $0x880] sm:$0xff] }
0x19ac   :  { %v8028_v22 = vpack.c.bf16 %v3825_v40, %v3823_v16  ;;  %v4003_v40 = vld [vmem:[#allocation11 + $0x8a8] sm:$0xff]  ;;  %v4173_v11 = vld [vmem:[#allocation11 + $0x960] sm:$0xff] }
0x19ae   :  { %8002 = vmatpush3.bf16.msra.mxu0 %v9460_v3  ;;  %7977 = vmatpush1.bf16.msra.mxu1 %v7976_v62  ;;  %v3827_v62 = vld [vmem:[#allocation11 + $0x7c0] sm:$0xff] }
0x19af   :  { %8003 = vmatprep.subr.bf16.mxu0 %v8630_v0  ;;  %7979 = vmatprep.subr.bf16.mxu1 %v7978_v23  ;;  %v8030_v23 = vpack.c.bf16 %v3830_v50, %v3828_v17  ;;  %v8032_v10 = vpack.c.bf16 %v3829_v38, %v3827_v62  ;;  %v4002_v50 = vld [vmem:[#allocation11 + $0x8a0] sm:$0xff]  ;;  %v4004_v62 = vld [vmem:[#allocation11 + $0x8b0] sm:$0xff]  ;;  %v4007_v38 = vld [vmem:[#allocation11 + $0x8c8] sm:$0xff] }
0x19b2   :  { %8005 = vmatpush3.bf16.msra.mxu0 %v9464_v9  ;;  %7981 = vmatpush1.bf16.msra.mxu1 %v7980_v29  ;;  %v3834_v29 = vld [vmem:[#allocation11 + $0x7f8] sm:$0xff] }
0x19b3   :  { %8038 = vmatprep.subr.bf16.mxu0 %v8630_v0  ;;  %8007 = vmatprep.subr.bf16.mxu1 %v8006_v35  ;;  %v8034_v30 = vpack.c.bf16 %v3834_v29, %v3832_v26  ;;  %v3831_v35 = vld [vmem:[#allocation11 + $0x7e0] sm:$0xff]  ;;  %v4009_v26 = vld [vmem:[#allocation11 + $0x8d8] sm:$0xff] }
0x19b4   :  { %v4006_v29 = vld [vmem:[#allocation11 + $0x8c0] sm:$0xff] }
0x1a68   :  { %v3617_v25 = vpop.f32.mrb[58].mxu0 }
0x1a69   :  { %v3621_v45 = vadd.f32 %v3617_v25, %v2441_v36  ;;  %v6742_v59 = vpop.f32.mrb[59].mxu0  ;;  %v3833_v36 = vld [vmem:[#allocation11 + $0x7f0] sm:$0xff] }
0x1a6a   :  { %v8036_v25 = vpack.c.bf16 %v3833_v36, %v3831_v35  ;;  %v3985_v59 = vld [vmem:[#allocation11 + $0x818] sm:$0xff]  ;;  %v4011_v35 = vld [vmem:[#allocation11 + $0x8e8] sm:$0xff] }
0x1a6b   :  { %8393 = vtanh.f32 %v3621_v45  ;;  %v3983_v45 = vld [vmem:[#allocation11 + $0x808] sm:$0xff]  ;;  %v4013_v36 = vld [vmem:[#allocation11 + $0x8f8] sm:$0xff] }
0x1a6c   :  { %v8062_v31 = vpack.c.bf16 %v3985_v59, %v3983_v45  ;;  %v8090_v45 = vpack.c.bf16 %v4013_v36, %v4011_v35  ;;  %v4010_v59 = vld [vmem:[#allocation11 + $0x8e0] sm:$0xff] }
0x1a6d   :  { %v4185_v35 = vld [vmem:[#allocation11 + $0x9c0] sm:$0xff] }
0x1a75   :  { %v8394_v54 = vpop.eup %8393 }
0x1a76   :  { %3721 = vmatmul.mubr.f32.vlgmr.msra.gmra.mrb[38].mxu1 %v8394_v54  ;;  %6776 = vmatmul.mubr.f32.vlgmr.msra.gmra.mrb[60].mxu0 %v8394_v54  ;;  %v3989_v54 = vld [vmem:[#allocation11 + $0x838] sm:$0xff] }
0x1a77   :  { %8009 = vmatpush1.bf16.msra.mxu1 %v8008_v44  ;;  %8040 = vmatpush3.bf16.msra.mxu0 %v9436_v41  ;;  %v8066_v58 = vpack.c.bf16 %v3989_v54, %v3987_v51 }
0x1a78   :  { %8011 = vmatprep.subr.bf16.mxu1 %v8010_v42  ;;  %8041 = vmatprep.subr.bf16.mxu0 %v8630_v0  ;;  %v3982_v42 = vld [vmem:[#allocation11 + $0x800] sm:$0xff] }
0x1a79   :  { %3899 = vmatprep.mubr.f32.mxu1 %v8632_v1  ;;  %6810 = vmatprep.mubr.msk.f32.mxu0 %vm8631_vm0, %v8632_v1  ;;  %v8064_v55 = vpack.c.bf16 %v3984_v48, %v3982_v42  ;;  %v2451_v42 = vadd.f32 %v9625_v24, %v9505_v46 }
0x1a7b   :  { %8013 = vmatpush1.bf16.msra.mxu1 %v8012_v6  ;;  %8043 = vmatpush3.bf16.msra.mxu0 %v9440_v39  ;;  %v3986_v6 = vld [vmem:[#allocation11 + $0x820] sm:$0xff] }
0x1a7c   :  { %8015 = vmatprep.subr.bf16.mxu1 %v8014_v60  ;;  %8044 = vmatprep.subr.bf16.mxu0 %v8630_v0  ;;  %v3988_v60 = vld [vmem:[#allocation11 + $0x830] sm:$0xff] }
0x1a7d   :  { %v8068_v49 = vpack.c.bf16 %v3988_v60, %v3986_v6  ;;  %v4166_v6 = vld [vmem:[#allocation11 + $0x928] sm:$0xff]  ;;  %v4168_v60 = vld [vmem:[#allocation11 + $0x938] sm:$0xff] }
0x1a7e   :  { %v8122_v2 = vpack.c.bf16 %v4168_v60, %v4166_v6  ;;  %v4340_v60 = vld [vmem:[#allocation11 + $0xa00] sm:$0xff] }
0x1a7f   :  { %8017 = vmatpush1.bf16.msra.mxu1 %v8016_v4  ;;  %8046 = vmatpush3.bf16.msra.mxu0 %v9444_v47  ;;  %v3990_v4 = vld [vmem:[#allocation11 + $0x840] sm:$0xff] }
0x1a80   :  { %8019 = vmatprep.subr.bf16.mxu1 %v8018_v15  ;;  %8047 = vmatprep.subr.bf16.mxu0 %v8630_v0  ;;  %v3992_v15 = vld [vmem:[#allocation11 + $0x850] sm:$0xff] }
0x1a81   :  { %v8072_v34 = vpack.c.bf16 %v3992_v15, %v3990_v4  ;;  %v4170_v4 = vld [vmem:[#allocation11 + $0x948] sm:$0xff]  ;;  %v4172_v15 = vld [vmem:[#allocation11 + $0x958] sm:$0xff] }
0x1a82   :  { %v8126_v21 = vpack.c.bf16 %v4172_v15, %v4170_v4  ;;  %v4344_v4 = vld [vmem:[#allocation11 + $0xa20] sm:$0xff]  ;;  %v4346_v15 = vld [vmem:[#allocation11 + $0xa30] sm:$0xff] }
0x1a83   :  { %8021 = vmatpush1.bf16.msra.mxu1 %v8020_v7  ;;  %8049 = vmatpush3.bf16.msra.mxu0 %v9448_v52  ;;  %v3994_v7 = vld [vmem:[#allocation11 + $0x860] sm:$0xff] }
0x1a84   :  { %8023 = vmatprep.subr.bf16.mxu1 %v8022_v8  ;;  %8050 = vmatprep.subr.bf16.mxu0 %v8630_v0  ;;  %v3996_v8 = vld [vmem:[#allocation11 + $0x870] sm:$0xff] }
0x1a87   :  { %8025 = vmatpush1.bf16.msra.mxu1 %v8024_v12  ;;  %8052 = vmatpush3.bf16.msra.mxu0 %v9452_v57  ;;  %v8076_v12 = vpack.c.bf16 %v3996_v8, %v3994_v7  ;;  %v4176_v7 = vld [vmem:[#allocation11 + $0x978] sm:$0xff] }
0x1a88   :  { %8053 = vmatprep.subr.bf16.mxu0 %v8630_v0  ;;  %8027 = vmatprep.subr.bf16.mxu1 %v8026_v37  ;;  %v4000_v37 = vld [vmem:[#allocation11 + $0x890] sm:$0xff] }
0x1a89   :  { %v8080_v16 = vpack.c.bf16 %v4000_v37, %v3998_v14  ;;  %v4180_v14 = vld [vmem:[#allocation11 + $0x998] sm:$0xff] }
0x1a8b   :  { %8055 = vmatpush3.bf16.msra.mxu0 %v9456_v61  ;;  %8029 = vmatpush1.bf16.msra.mxu1 %v8028_v22  ;;  %v4005_v22 = vld [vmem:[#allocation11 + $0x8b8] sm:$0xff] }
0x1a8c   :  { %8056 = vmatprep.subr.bf16.mxu0 %v8630_v0  ;;  %8031 = vmatprep.subr.bf16.mxu1 %v8030_v23  ;;  %v8082_v17 = vpack.c.bf16 %v4005_v22, %v4003_v40  ;;  %v8084_v23 = vpack.c.bf16 %v4004_v62, %v4002_v50  ;;  %v4177_v40 = vld [vmem:[#allocation11 + $0x980] sm:$0xff]  ;;  %v4179_v22 = vld [vmem:[#allocation11 + $0x990] sm:$0xff]  ;;  %v4182_v50 = vld [vmem:[#allocation11 + $0x9a8] sm:$0xff] }
0x1a8d   :  { %v4184_v62 = vld [vmem:[#allocation11 + $0x9b8] sm:$0xff] }
0x1a8f   :  { %8058 = vmatpush3.bf16.msra.mxu0 %v9460_v3  ;;  %8033 = vmatpush1.bf16.msra.mxu1 %v8032_v10  ;;  %v8086_v10 = vpack.c.bf16 %v4009_v26, %v4007_v38  ;;  %v4181_v38 = vld [vmem:[#allocation11 + $0x9a0] sm:$0xff]  ;;  %v4183_v26 = vld [vmem:[#allocation11 + $0x9b0] sm:$0xff] }
0x1a90   :  { %8059 = vmatprep.subr.bf16.mxu0 %v8630_v0  ;;  %8035 = vmatprep.subr.bf16.mxu1 %v8034_v30  ;;  %v4008_v30 = vld [vmem:[#allocation11 + $0x8d0] sm:$0xff] }
0x1a93   :  { %8061 = vmatpush3.bf16.msra.mxu0 %v9464_v9  ;;  %8037 = vmatpush1.bf16.msra.mxu1 %v8036_v25  ;;  %v8088_v25 = vpack.c.bf16 %v4008_v30, %v4006_v29  ;;  %v8140_v29 = vpack.c.bf16 %v4183_v26, %v4181_v38  ;;  %v4188_v30 = vld [vmem:[#allocation11 + $0x9d8] sm:$0xff] }
0x1a94   :  { %8094 = vmatprep.subr.bf16.mxu0 %v8630_v0  ;;  %8063 = vmatprep.subr.bf16.mxu1 %v8062_v31  ;;  %v4012_v31 = vld [vmem:[#allocation11 + $0x8f0] sm:$0xff]  ;;  %v4367_v26 = vld [vmem:[#allocation11 + $0xad8] sm:$0xff] }
0x1b49   :  { %v3796_v33 = vpop.f32.mrb[60].mxu0 }
0x1b4a   :  { %v3800_v43 = vadd.f32 %v3796_v33, %v2446_v27  ;;  %v6777_v44 = vpop.f32.mrb[61].mxu0  ;;  %v8092_v27 = vpack.c.bf16 %v4012_v31, %v4010_v59  ;;  %v4162_v33 = vld [vmem:[#allocation11 + $0x908] sm:$0xff]  ;;  %v4192_v59 = vld [vmem:[#allocation11 + $0x9f8] sm:$0xff] }
0x1b4c   :  { %8395 = vtanh.f32 %v3800_v43  ;;  %v4164_v43 = vld [vmem:[#allocation11 + $0x918] sm:$0xff] }
0x1b4d   :  { %v8118_v44 = vpack.c.bf16 %v4164_v43, %v4162_v33  ;;  %v4189_v33 = vld [vmem:[#allocation11 + $0x9e0] sm:$0xff]  ;;  %v4191_v43 = vld [vmem:[#allocation11 + $0x9f0] sm:$0xff] }
0x1b56   :  { %v8396_v63 = vpop.eup %8395 }
0x1b57   :  { %3900 = vmatmul.mubr.f32.vlgmr.msra.gmra.mrb[38].mxu1 %v8396_v63  ;;  %6811 = vmatmul.mubr.f32.vlgmr.msra.gmra.mrb[62].mxu0 %v8396_v63 }
0x1b58   :  { %8065 = vmatpush1.bf16.msra.mxu1 %v8064_v55  ;;  %8096 = vmatpush3.bf16.msra.mxu0 %v9436_v41  ;;  %v4161_v55 = vld [vmem:[#allocation11 + $0x900] sm:$0xff] }
0x1b59   :  { %8067 = vmatprep.subr.bf16.mxu1 %v8066_v58  ;;  %8097 = vmatprep.subr.bf16.mxu0 %v8630_v0  ;;  %v4163_v58 = vld [vmem:[#allocation11 + $0x910] sm:$0xff] }
0x1b5a   :  { %4078 = vmatprep.mubr.f32.mxu1 %v8632_v1  ;;  %6845 = vmatprep.mubr.msk.f32.mxu0 %vm8631_vm0, %v8632_v1  ;;  %v8120_v63 = vpack.c.bf16 %v4163_v58, %v4161_v55 }
0x1b5c   :  { %8069 = vmatpush1.bf16.msra.mxu1 %v8068_v49  ;;  %8099 = vmatpush3.bf16.msra.mxu0 %v9440_v39  ;;  %v4167_v49 = vld [vmem:[#allocation11 + $0x930] sm:$0xff] }
0x1b5d   :  { %8071 = vmatprep.subr.bf16.mxu1 %v8070_v19  ;;  %8100 = vmatprep.subr.bf16.mxu0 %v8630_v0  ;;  %v8124_v46 = vpack.c.bf16 %v4167_v49, %v4165_v18  ;;  %v4347_v18 = vld [vmem:[#allocation11 + $0xa38] sm:$0xff] }
0x1b60   :  { %8073 = vmatpush1.bf16.msra.mxu1 %v8072_v34  ;;  %8102 = vmatpush3.bf16.msra.mxu0 %v9444_v47  ;;  %v4171_v34 = vld [vmem:[#allocation11 + $0x950] sm:$0xff] }
0x1b61   :  { %8075 = vmatprep.subr.bf16.mxu1 %v8074_v5  ;;  %8103 = vmatprep.subr.bf16.mxu0 %v8630_v0  ;;  %v4174_v5 = vld [vmem:[#allocation11 + $0x968] sm:$0xff]  ;;  %v8128_v8 = vpack.c.bf16 %v4171_v34, %v4169_v28  ;;  %v4351_v28 = vld [vmem:[#allocation11 + $0xa58] sm:$0xff] }
0x1b62   :  { %v8130_v56 = vpack.c.bf16 %v4176_v7, %v4174_v5  ;;  %v4348_v5 = vld [vmem:[#allocation11 + $0xa40] sm:$0xff]  ;;  %v4350_v7 = vld [vmem:[#allocation11 + $0xa50] sm:$0xff] }
0x1b64   :  { %8077 = vmatpush1.bf16.msra.mxu1 %v8076_v12  ;;  %8105 = vmatpush3.bf16.msra.mxu0 %v9448_v52  ;;  %v4175_v12 = vld [vmem:[#allocation11 + $0x970] sm:$0xff] }
0x1b65   :  { %8079 = vmatprep.subr.bf16.mxu1 %v8078_v13  ;;  %8106 = vmatprep.subr.bf16.mxu0 %v8630_v0  ;;  %v4178_v13 = vld [vmem:[#allocation11 + $0x988] sm:$0xff]  ;;  %v8132_v37 = vpack.c.bf16 %v4175_v12, %v4173_v11  ;;  %v8184_v11 = vpack.c.bf16 %v4350_v7, %v4348_v5  ;;  %v4352_v12 = vld [vmem:[#allocation11 + $0xa60] sm:$0xff]  ;;  %v4538_v5 = vld [vmem:[#allocation11 + $0xb98] sm:$0xff] }
0x1b68   :  { %8081 = vmatpush1.bf16.msra.mxu1 %v8080_v16  ;;  %8108 = vmatpush3.bf16.msra.mxu0 %v9452_v57  ;;  %v8134_v16 = vpack.c.bf16 %v4180_v14, %v4178_v13  ;;  %v4354_v13 = vld [vmem:[#allocation11 + $0xa70] sm:$0xff]  ;;  %v4357_v14 = vld [vmem:[#allocation11 + $0xa88] sm:$0xff] }
0x1b69   :  { %8109 = vmatprep.subr.bf16.mxu0 %v8630_v0  ;;  %8083 = vmatprep.subr.bf16.mxu1 %v8082_v17  ;;  %v8136_v17 = vpack.c.bf16 %v4179_v22, %v4177_v40  ;;  %v4356_v22 = vld [vmem:[#allocation11 + $0xa80] sm:$0xff] }
0x1b6c   :  { %8111 = vmatpush3.bf16.msra.mxu0 %v9456_v61  ;;  %8085 = vmatpush1.bf16.msra.mxu1 %v8084_v23  ;;  %v8138_v23 = vpack.c.bf16 %v4184_v62, %v4182_v50  ;;  %v4360_v62 = vld [vmem:[#allocation11 + $0xaa0] sm:$0xff] }
0x1b6d   :  { %8112 = vmatprep.subr.bf16.mxu0 %v8630_v0  ;;  %8087 = vmatprep.subr.bf16.mxu1 %v8086_v10  ;;  %v4186_v10 = vld [vmem:[#allocation11 + $0x9c8] sm:$0xff] }
0x1b6e   :  { %v8142_v36 = vpack.c.bf16 %v4188_v30, %v4186_v10  ;;  %v4366_v10 = vld [vmem:[#allocation11 + $0xad0] sm:$0xff]  ;;  %v4369_v30 = vld [vmem:[#allocation11 + $0xae8] sm:$0xff] }
0x1b70   :  { %8114 = vmatpush3.bf16.msra.mxu0 %v9460_v3  ;;  %8089 = vmatpush1.bf16.msra.mxu1 %v8088_v25  ;;  %v4187_v25 = vld [vmem:[#allocation11 + $0x9d0] sm:$0xff] }
0x1b71   :  { %8115 = vmatprep.subr.bf16.mxu0 %v8630_v0  ;;  %8091 = vmatprep.subr.bf16.mxu1 %v8090_v45  ;;  %v4190_v45 = vld [vmem:[#allocation11 + $0x9e8] sm:$0xff]  ;;  %v8144_v31 = vpack.c.bf16 %v4187_v25, %v4185_v35  ;;  %v4371_v35 = vld [vmem:[#allocation11 + $0xaf8] sm:$0xff]  ;;  %v4370_v25 = vld [vmem:[#allocation11 + $0xaf0] sm:$0xff] }
0x1b74   :  { %8117 = vmatpush3.bf16.msra.mxu0 %v9464_v9  ;;  %8093 = vmatpush1.bf16.msra.mxu1 %v8092_v27  ;;  %v8146_v27 = vpack.c.bf16 %v4192_v59, %v4190_v45  ;;  %v4520_v45 = vld [vmem:[#allocation11 + $0xb08] sm:$0xff]  ;;  %v4522_v59 = vld [vmem:[#allocation11 + $0xb18] sm:$0xff] }
0x1b75   :  { %8150 = vmatprep.subr.bf16.mxu0 %v8630_v0  ;;  %8119 = vmatprep.subr.bf16.mxu1 %v8118_v44  ;;  %v8148_v44 = vpack.c.bf16 %v4191_v43, %v4189_v33 }
0x1c2a   :  { %v3975_v48 = vpop.f32.mrb[62].mxu0 }
0x1c2b   :  { %v3979_v51 = vadd.f32 %v3975_v48, %v2451_v42  ;;  %v6812_v54 = vpop.f32.mrb[63].mxu0  ;;  %v4341_v42 = vld [vmem:[#allocation11 + $0xa08] sm:$0xff]  ;;  %v4343_v48 = vld [vmem:[#allocation11 + $0xa18] sm:$0xff] }
0x1c2c   :  { %v2456_v54 = vadd.f32 %v9625_v24, %v9503_v53  ;;  %v8180_v53 = vpack.c.bf16 %v4346_v15, %v4344_v4  ;;  %v4532_v4 = vld [vmem:[#allocation11 + $0xb68] sm:$0xff]  ;;  %v4534_v15 = vld [vmem:[#allocation11 + $0xb78] sm:$0xff] }
0x1c2d   :  { %8397 = vtanh.f32 %v3979_v51  ;;  %v8174_v51 = vpack.c.bf16 %v4343_v48, %v4341_v42  ;;  %v4519_v42 = vld [vmem:[#allocation11 + $0xb00] sm:$0xff]  ;;  %v4521_v48 = vld [vmem:[#allocation11 + $0xb10] sm:$0xff] }
0x1c37   :  { %v8398_v19 = vpop.eup %8397 }
0x1c38   :  { %4079 = vmatmul.mubr.f32.vlgmr.msra.gmra.mrb[38].mxu1 %v8398_v19  ;;  %6846 = vmatmul.mubr.f32.vlgmr.msra.gmra.mrb[64].mxu0 %v8398_v19 }
0x1c39   :  { %8121 = vmatpush1.bf16.msra.mxu1 %v8120_v63  ;;  %8152 = vmatpush3.bf16.msra.mxu0 %v9436_v41  ;;  %v4342_v63 = vld [vmem:[#allocation11 + $0xa10] sm:$0xff] }
0x1c3a   :  { %8123 = vmatprep.subr.bf16.mxu1 %v8122_v2  ;;  %8153 = vmatprep.subr.bf16.mxu0 %v8630_v0  ;;  %v4345_v2 = vld [vmem:[#allocation11 + $0xa28] sm:$0xff]  ;;  %v8176_v49 = vpack.c.bf16 %v4342_v63, %v4340_v60  ;;  %v4525_v60 = vld [vmem:[#allocation11 + $0xb30] sm:$0xff] }
0x1c3b   :  { %4257 = vmatprep.mubr.f32.mxu1 %v8632_v1  ;;  %6880 = vmatprep.mubr.msk.f32.mxu0 %vm8631_vm0, %v8632_v1  ;;  %v8178_v19 = vpack.c.bf16 %v4347_v18, %v4345_v2  ;;  %v4528_v2 = vld [vmem:[#allocation11 + $0xb48] sm:$0xff]  ;;  %v4530_v18 = vld [vmem:[#allocation11 + $0xb58] sm:$0xff] }
0x1c3d   :  { %8125 = vmatpush1.bf16.msra.mxu1 %v8124_v46  ;;  %8155 = vmatpush3.bf16.msra.mxu0 %v9440_v39 }
0x1c3e   :  { %8127 = vmatprep.subr.bf16.mxu1 %v8126_v21  ;;  %8156 = vmatprep.subr.bf16.mxu0 %v8630_v0  ;;  %v4349_v21 = vld [vmem:[#allocation11 + $0xa48] sm:$0xff] }
0x1c3f   :  { %v8182_v34 = vpack.c.bf16 %v4351_v28, %v4349_v21  ;;  %v8242_v21 = vpack.c.bf16 %v4534_v15, %v4532_v4  ;;  %v4531_v28 = vld [vmem:[#allocation11 + $0xb60] sm:$0xff]  ;;  %v4654_v15 = vld [vmem:[#allocation14 + $0x50] sm:$0xff] }
0x1c41   :  { %8129 = vmatpush1.bf16.msra.mxu1 %v8128_v8  ;;  %8158 = vmatpush3.bf16.msra.mxu0 %v9444_v47  ;;  %v4353_v8 = vld [vmem:[#allocation11 + $0xa68] sm:$0xff] }
0x1c42   :  { %8131 = vmatprep.subr.bf16.mxu1 %v8130_v56  ;;  %8159 = vmatprep.subr.bf16.mxu0 %v8630_v0  ;;  %v4355_v56 = vld [vmem:[#allocation11 + $0xa78] sm:$0xff] }
0x1c45   :  { %8133 = vmatpush1.bf16.msra.mxu1 %v8132_v37  ;;  %8161 = vmatpush3.bf16.msra.mxu0 %v9448_v52  ;;  %v4359_v37 = vld [vmem:[#allocation11 + $0xa98] sm:$0xff] }
0x1c46   :  { %8135 = vmatprep.subr.bf16.mxu1 %v8134_v16  ;;  %8162 = vmatprep.subr.bf16.mxu0 %v8630_v0  ;;  %v8188_v16 = vpack.c.bf16 %v4354_v13, %v4352_v12  ;;  %v8190_v40 = vpack.c.bf16 %v4359_v37, %v4357_v14  ;;  %v4542_v12 = vld [vmem:[#allocation11 + $0xbb8] sm:$0xff]  ;;  %v4539_v14 = vld [vmem:[#allocation11 + $0xba0] sm:$0xff]  ;;  %v4541_v37 = vld [vmem:[#allocation11 + $0xbb0] sm:$0xff] }
0x1c49   :  { %8137 = vmatpush1.bf16.msra.mxu1 %v8136_v17  ;;  %8164 = vmatpush3.bf16.msra.mxu0 %v9452_v57  ;;  %v4358_v17 = vld [vmem:[#allocation11 + $0xa90] sm:$0xff] }
0x1c4a   :  { %8165 = vmatprep.subr.bf16.mxu0 %v8630_v0  ;;  %8139 = vmatprep.subr.bf16.mxu1 %v8138_v23  ;;  %v4362_v23 = vld [vmem:[#allocation11 + $0xab0] sm:$0xff] }
0x1c4b   :  { %v8196_v38 = vpack.c.bf16 %v4362_v23, %v4360_v62 }
0x1c4d   :  { %8167 = vmatpush3.bf16.msra.mxu0 %v9456_v61  ;;  %8141 = vmatpush1.bf16.msra.mxu1 %v8140_v29  ;;  %v4364_v29 = vld [vmem:[#allocation11 + $0xac0] sm:$0xff] }
0x1c4e   :  { %8168 = vmatprep.subr.bf16.mxu0 %v8630_v0  ;;  %8143 = vmatprep.subr.bf16.mxu1 %v8142_v36  ;;  %v8202_v36 = vpack.c.bf16 %v4371_v35, %v4369_v30  ;;  %v4645_v35 = vld [vmem:[#allocation14 + $0x8] sm:$0xff] }
0x1c51   :  { %8170 = vmatpush3.bf16.msra.mxu0 %v9460_v3  ;;  %8145 = vmatpush1.bf16.msra.mxu1 %v8144_v31  ;;  %v8230_v31 = vpack.c.bf16 %v4522_v59, %v4520_v45  ;;  %v4647_v45 = vld [vmem:[#allocation14 + $0x18] sm:$0xff]  ;;  %v4664_v59 = vld [vmem:[#allocation14 + $0xa0] sm:$0xff] }
0x1c52   :  { %8171 = vmatprep.subr.bf16.mxu0 %v8630_v0  ;;  %8147 = vmatprep.subr.bf16.mxu1 %v8146_v27  ;;  %v2461_v27 = vadd.f32 %v9625_v24, %v9537_v32  ;;  %v8238_v32 = vpack.c.bf16 %v4530_v18, %v4528_v2  ;;  %v4527_v24 = vld [vmem:[#allocation11 + $0xb40] sm:$0xff] }
0x1c53   :  { %v4652_v18 = vld [vmem:[#allocation14 + $0x40] sm:$0xff] }
0x1c55   :  { %8173 = vmatpush3.bf16.msra.mxu0 %v9464_v9  ;;  %8149 = vmatpush1.bf16.msra.mxu1 %v8148_v44 }
0x1c56   :  { %8206 = vmatprep.subr.bf16.mxu0 %v8630_v0  ;;  %8175 = vmatprep.subr.bf16.mxu1 %v8174_v51  ;;  %v4524_v51 = vld [vmem:[#allocation11 + $0xb28] sm:$0xff] }
0x1d0b   :  { %v4154_v55 = vpop.f32.mrb[64].mxu0 }
0x1d0c   :  { %v4158_v58 = vadd.f32 %v4154_v55, %v2456_v54  ;;  %v6847_v6 = vpop.f32.mrb[65].mxu0  ;;  %v4526_v54 = vld [vmem:[#allocation11 + $0xb38] sm:$0xff]  ;;  %v8232_v55 = vpack.c.bf16 %v4521_v48, %v4519_v42 }
0x1d0d   :  { %v4523_v6 = vld [vmem:[#allocation11 + $0xb20] sm:$0xff]  ;;  %v4666_v42 = vld [vmem:[#allocation14 + $0xb0] sm:$0xff] }
0x1d0e   :  { %8399 = vtanh.f32 %v4158_v58  ;;  %v8234_v58 = vpack.c.bf16 %v4526_v54, %v4524_v51  ;;  %v4667_v48 = vld [vmem:[#allocation14 + $0xb8] sm:$0xff] }
0x1d0f   :  { %v8274_v54 = vpack.c.bf16 %v4667_v48, %v4666_v42 }
0x1d18   :  { %v8400_v46 = vpop.eup %8399 }
0x1d19   :  { %4258 = vmatmul.mubr.f32.vlgmr.msra.gmra.mrb[38].mxu1 %v8400_v46  ;;  %6881 = vmatmul.mubr.f32.vlgmr.msra.gmra.mrb[66].mxu0 %v8400_v46 }
0x1d1a   :  { %8177 = vmatpush1.bf16.msra.mxu1 %v8176_v49  ;;  %8208 = vmatpush3.bf16.msra.mxu0 %v9436_v41  ;;  %v8186_v41 = vpack.c.bf16 %v4355_v56, %v4353_v8  ;;  %v8236_v49 = vpack.c.bf16 %v4525_v60, %v4523_v6  ;;  %v4535_v56 = vld [vmem:[#allocation11 + $0xb80] sm:$0xff]  ;;  %v4669_v60 = vld [vmem:[#allocation14 + $0xc8] sm:$0xff] }
0x1d1b   :  { %8179 = vmatprep.subr.bf16.mxu1 %v8178_v19  ;;  %8209 = vmatprep.subr.bf16.mxu0 %v8630_v0  ;;  %v4529_v19 = vld [vmem:[#allocation11 + $0xb50] sm:$0xff]  ;;  %v4668_v6 = vld [vmem:[#allocation14 + $0xc0] sm:$0xff] }
0x1d1c   :  { %4436 = vmatprep.mubr.f32.mxu1 %v8632_v1  ;;  %6915 = vmatprep.mubr.msk.f32.mxu0 %vm8631_vm0, %v8632_v1  ;;  %v8240_v46 = vpack.c.bf16 %v4529_v19, %v4527_v24  ;;  %v8278_v2 = vpack.c.bf16 %v4669_v60, %v4668_v6  ;;  %v4671_v24 = vld [vmem:[#allocation14 + $0xd8] sm:$0xff] }
0x1d1e   :  { %8181 = vmatpush1.bf16.msra.mxu1 %v8180_v53  ;;  %8211 = vmatpush3.bf16.msra.mxu0 %v9440_v39  ;;  %v8192_v39 = vpack.c.bf16 %v4358_v17, %v4356_v22  ;;  %v4533_v53 = vld [vmem:[#allocation11 + $0xb70] sm:$0xff]  ;;  %v4546_v22 = vld [vmem:[#allocation11 + $0xbd8] sm:$0xff]  ;;  %v4543_v17 = vld [vmem:[#allocation11 + $0xbc0] sm:$0xff] }
0x1d1f   :  { %8183 = vmatprep.subr.bf16.mxu1 %v8182_v34  ;;  %8212 = vmatprep.subr.bf16.mxu0 %v8630_v0  ;;  %v4536_v34 = vld [vmem:[#allocation11 + $0xb88] sm:$0xff]  ;;  %v8244_v7 = vpack.c.bf16 %v4533_v53, %v4531_v28  ;;  %v8406_v28 = vld [vmem:[#allocation9 + $0x2] ss:$0 sm:$0xff] }
0x1d20   :  { %v8246_v8 = vpack.c.bf16 %v4538_v5, %v4536_v34  ;;  %v2466_v53 = vadd.f32 %v8406_v28, %v9535_v20 }
0x1d22   :  { %8185 = vmatpush1.bf16.msra.mxu1 %v8184_v11  ;;  %8214 = vmatpush3.bf16.msra.mxu0 %v9444_v47  ;;  %v4361_v47 = vld [vmem:[#allocation11 + $0xaa8] sm:$0xff] }
0x1d23   :  { %8187 = vmatprep.subr.bf16.mxu1 %v8186_v41  ;;  %8215 = vmatprep.subr.bf16.mxu0 %v8630_v0  ;;  %v4540_v41 = vld [vmem:[#allocation11 + $0xba8] sm:$0xff] }
0x1d24   :  { %v8250_v13 = vpack.c.bf16 %v4542_v12, %v4540_v41  ;;  %v4656_v41 = vld [vmem:[#allocation14 + $0x60] sm:$0xff]  ;;  %v4657_v12 = vld [vmem:[#allocation14 + $0x68] sm:$0xff] }
0x1d26   :  { %8189 = vmatpush1.bf16.msra.mxu1 %v8188_v16  ;;  %8217 = vmatpush3.bf16.msra.mxu0 %v9448_v52  ;;  %v4363_v52 = vld [vmem:[#allocation11 + $0xab8] sm:$0xff]  ;;  %v8252_v16 = vpack.c.bf16 %v4541_v37, %v4539_v14 }
0x1d27   :  { %8191 = vmatprep.subr.bf16.mxu1 %v8190_v40  ;;  %8218 = vmatprep.subr.bf16.mxu0 %v8630_v0  ;;  %v8194_v50 = vpack.c.bf16 %v4363_v52, %v4361_v47  ;;  %v4544_v40 = vld [vmem:[#allocation11 + $0xbc8] sm:$0xff]  ;;  %v4545_v47 = vld [vmem:[#allocation11 + $0xbd0] sm:$0xff]  ;;  %v4675_v37 = vld [vmem:[#allocation14 + $0xf8] sm:$0xff] }
0x1d28   :  { %v4548_v52 = vld [vmem:[#allocation11 + $0xbe8] sm:$0xff]  ;;  %v8256_v62 = vpack.c.bf16 %v4545_v47, %v4543_v17  ;;  %v4674_v14 = vld [vmem:[#allocation14 + $0xf0] sm:$0xff]  ;;  %v4626_v17 = vlaneseq }
0x1d2a   :  { %8193 = vmatpush1.bf16.msra.mxu1 %v8192_v39  ;;  %8220 = vmatpush3.bf16.msra.mxu0 %v9452_v57  ;;  %v4365_v57 = vld [vmem:[#allocation11 + $0xac8] sm:$0xff]  ;;  %v8254_v39 = vpack.c.bf16 %v4546_v22, %v4544_v40  ;;  %v4658_v40 = vld [vmem:[#allocation14 + $0x70] sm:$0xff]  ;;  %v4659_v22 = vld [vmem:[#allocation14 + $0x78] sm:$0xff] }
0x1d2b   :  { %8221 = vmatprep.subr.bf16.mxu0 %v8630_v0  ;;  %8195 = vmatprep.subr.bf16.mxu1 %v8194_v50  ;;  %v4550_v50 = vld [vmem:[#allocation11 + $0xbf8] sm:$0xff]  ;;  %v8292_v20 = vpack.c.bf16 %v4659_v22, %v4658_v40 }
0x1d2c   :  { %v8258_v23 = vpack.c.bf16 %v4550_v50, %v4548_v52  ;;  %v4624_v52 = vld [vmem:[#allocation12] sm:$0x3] }
0x1d2e   :  { %8223 = vmatpush3.bf16.msra.mxu0 %v9456_v61  ;;  %8197 = vmatpush1.bf16.msra.mxu1 %v8196_v38  ;;  %v8198_v61 = vpack.c.bf16 %v4367_v26, %v4365_v57  ;;  %v4547_v38 = vld [vmem:[#allocation11 + $0xbe0] sm:$0xff]  ;;  %v4549_v57 = vld [vmem:[#allocation11 + $0xbf0] sm:$0xff] }
0x1d2f   :  { %8224 = vmatprep.subr.bf16.mxu0 %v8630_v0  ;;  %v8260_v26 = vpack.c.bf16 %v4549_v57, %v4547_v38 }
0x1d30   :  { %8199 = vmatprep.subr.bf16.mxu1 %v8198_v61  ;;  %v4661_v61 = vld [vmem:[#allocation14 + $0x88] sm:$0xff] }
0x1d32   :  { %8226 = vmatpush3.bf16.msra.mxu0 %v9460_v3  ;;  %v8200_v3 = vpack.c.bf16 %v4366_v10, %v4364_v29  ;;  %v4660_v29 = vld [vmem:[#allocation14 + $0x80] sm:$0xff] }
0x1d33   :  { %8227 = vmatprep.subr.bf16.mxu0 %v8630_v0  ;;  %v4368_v0 = vld [vmem:[#allocation11 + $0xae0] sm:$0xff]  ;;  %v8262_v30 = vpack.c.bf16 %v4661_v61, %v4660_v29 }
0x1d34   :  { %8201 = vmatpush1.bf16.msra.mxu1 %v8200_v3  ;;  %v4644_v10 = vld [vmem:[#allocation14] sm:$0xff]  ;;  %v4662_v3 = vld [vmem:[#allocation14 + $0x90] sm:$0xff] }
0x1d35   :  { %8203 = vmatprep.subr.bf16.mxu1 %v8202_v36  ;;  %v4663_v36 = vld [vmem:[#allocation14 + $0x98] sm:$0xff] }
0x1d36   :  { %8229 = vmatpush3.bf16.msra.mxu0 %v9464_v9  ;;  %v8204_v9 = vpack.c.bf16 %v4370_v25, %v4368_v0  ;;  %v8264_v0 = vpack.c.bf16 %v4645_v35, %v4644_v10  ;;  %v8266_v25 = vpack.c.bf16 %v4663_v36, %v4662_v3  ;;  %v4776_v36 = vld [vmem:[#allocation15] ss:$0 sm:$0xff] }
0x1d37   :  { %8263 = vmatprep.subr.bf16.mxu0 %v8262_v30 }
0x1d38   :  { %8205 = vmatpush1.bf16.msra.mxu1 %v8204_v9  ;;  %v4646_v9 = vld [vmem:[#allocation14 + $0x10] sm:$0xff] }
0x1d39   :  { %8231 = vmatprep.subr.bf16.mxu1 %v8230_v31  ;;  %v4665_v31 = vld [vmem:[#allocation14 + $0xa8] sm:$0xff] }
0x1dec   :  { %v4333_v33 = vpop.f32.mrb[66].mxu0 }
0x1ded   :  { %v4337_v43 = vadd.f32 %v4333_v33, %v2461_v27  ;;  %v6882_v44 = vpop.f32.mrb[67].mxu0  ;;  %v8268_v27 = vpack.c.bf16 %v4647_v45, %v4646_v9  ;;  %v8270_v33 = vpack.c.bf16 %v4665_v31, %v4664_v59 }
0x1dee   :  { %v4649_v44 = vld [vmem:[#allocation14 + $0x28] sm:$0xff] }
0x1def   :  { %8401 = vtanh.f32 %v4337_v43  ;;  %v4648_v43 = vld [vmem:[#allocation14 + $0x20] sm:$0xff] }
0x1df0   :  { %v8272_v51 = vpack.c.bf16 %v4649_v44, %v4648_v43 }
0x1df9   :  { %v8402_v63 = vpop.eup %8401 }
0x1dfa   :  { %4437 = vmatmul.mubr.f32.vlgmr.msra.gmra.mrb[38].mxu1 %v8402_v63  ;;  %6916 = vmatmul.mubr.f32.vlgmr.msra.gmra.mrb[68].mxu0 %v8402_v63 }
0x1dfb   :  { %8233 = vmatpush1.bf16.msra.mxu1 %v8232_v55  ;;  %4615 = vmatprep.mubr.f32.mxu1 %v8632_v1  ;;  %v4537_v1 = vld [vmem:[#allocation11 + $0xb90] sm:$0xff] }
0x1dfc   :  { %8235 = vmatprep.subr.bf16.mxu1 %v8234_v58  ;;  %v8248_v11 = vpack.c.bf16 %v4537_v1, %v4535_v56  ;;  %8265 = vmatpush3.bf16.msra.mxu0 %v8264_v0  ;;  %v4650_v55 = vld [vmem:[#allocation14 + $0x30] sm:$0xff]  ;;  %v4651_v58 = vld [vmem:[#allocation14 + $0x38] sm:$0xff]  ;;  %v4672_v56 = vld [vmem:[#allocation14 + $0xe0] sm:$0xff] }
0x1dfd   :  { %8267 = vmatprep.subr.bf16.mxu0 %v8266_v25  ;;  %v8276_v63 = vpack.c.bf16 %v4651_v58, %v4650_v55  ;;  %v4673_v1 = vld [vmem:[#allocation14 + $0xe8] sm:$0xff] }
0x1dff   :  { %8237 = vmatpush1.bf16.msra.mxu1 %v8236_v49  ;;  %v4653_v49 = vld [vmem:[#allocation14 + $0x48] sm:$0xff] }
0x1e00   :  { %8239 = vmatprep.subr.bf16.mxu1 %v8238_v32  ;;  %8269 = vmatpush3.bf16.msra.mxu0 %v8268_v27  ;;  %v4670_v32 = vld [vmem:[#allocation14 + $0xd0] sm:$0xff]  ;;  %v8280_v19 = vpack.c.bf16 %v4653_v49, %v4652_v18 }
0x1e01   :  { %8271 = vmatprep.subr.bf16.mxu0 %v8270_v33  ;;  %v8282_v4 = vpack.c.bf16 %v4671_v24, %v4670_v32 }
0x1e03   :  { %8241 = vmatpush1.bf16.msra.mxu1 %v8240_v46  ;;  %v4655_v46 = vld [vmem:[#allocation14 + $0x58] sm:$0xff] }
0x1e04   :  { %8243 = vmatprep.subr.bf16.mxu1 %v8242_v21  ;;  %8273 = vmatpush3.bf16.msra.mxu0 %v8272_v51  ;;  %v8284_v21 = vpack.c.bf16 %v4655_v46, %v4654_v15 }
0x1e05   :  { %8275 = vmatprep.subr.bf16.mxu0 %v8274_v54 }
0x1e07   :  { %8245 = vmatpush1.bf16.msra.mxu1 %v8244_v7 }
0x1e08   :  { %8247 = vmatprep.subr.bf16.mxu1 %v8246_v8  ;;  %8277 = vmatpush3.bf16.msra.mxu0 %v8276_v63 }
0x1e09   :  { %8279 = vmatprep.subr.bf16.mxu0 %v8278_v2 }
0x1e0b   :  { %8249 = vmatpush1.bf16.msra.mxu1 %v8248_v11  ;;  %v8286_v11 = vpack.c.bf16 %v4673_v1, %v4672_v56 }
0x1e0c   :  { %8251 = vmatprep.subr.bf16.mxu1 %v8250_v13  ;;  %8281 = vmatpush3.bf16.msra.mxu0 %v8280_v19  ;;  %v8288_v13 = vpack.c.bf16 %v4657_v12, %v4656_v41 }
0x1e0d   :  { %8283 = vmatprep.subr.bf16.mxu0 %v8282_v4 }
0x1e0f   :  { %8253 = vmatpush1.bf16.msra.mxu1 %v8252_v16  ;;  %v8290_v16 = vpack.c.bf16 %v4675_v37, %v4674_v14 }
0x1e10   :  { %8255 = vmatprep.subr.bf16.mxu1 %v8254_v39  ;;  %8285 = vmatpush3.bf16.msra.mxu0 %v8284_v21  ;;  %v4627_v39 = vshrl.u32 %v4626_v17, 7 }
0x1e11   :  { %8287 = vmatprep.subr.bf16.mxu0 %v8286_v11 }
0x1e12   :  { %v4628_v47 = vsub.s32 0, %v4627_v39  ;;  %v4632_v50 = vsub.s32 1, %v4627_v39 }
0x1e13   :  { %8257 = vmatpush1.bf16.msra.mxu1 %v8256_v62 }
0x1e14   :  { %8259 = vmatprep.subr.bf16.mxu1 %v8258_v23  ;;  %8289 = vmatpush3.bf16.msra.mxu0 %v8288_v13  ;;  %v4629_v62 = vrot.slane %v4624_v52, %v4628_v47  ;;  %v4633_v23 = vrot.slane %v4624_v52, %v4632_v50 }
0x1e15   :  { %8291 = vmatprep.subr.bf16.mxu0 %v8290_v16 }
0x1e17   :  { %8261 = vmatpush1.bf16.msra.mxu1 %v8260_v26 }
0x1e18   :  { %8293 = vmatpush3.bf16.msra.mxu0 %v8292_v20 }
0x1ecd   :  { %v4512_v34 = vpop.f32.mrb[68].mxu0 }
0x1ece   :  { %v4516_v5 = vadd.f32 %v4512_v34, %v2466_v53  ;;  %v6917_v7 = vpop.f32.mrb[69].mxu0 }
0x1ed0   :  { %8403 = vtanh.f32 %v4516_v5 }
0x1eda   :  { %v8404_v8 = vpop.eup %8403 }
0x1edb   :  { %4616 = vmatmul.mubr.f32.vlgmr.msra.gmra.mrb[38].mxu1 %v8404_v8 }
0x1fae   :  { %v4617_v38 = vpop.f32.mrb[38].mxu1 }
0x1faf   :  { %v4636_v57 = vadd.f32 %v4629_v62, %v4617_v38  ;;  %v4619_v26 = vpop.f32.mrb[39].mxu1 }
0x1fb0   :  { %v4637_v29 = vadd.f32 %v4633_v23, %v4619_v26 }
0x1fb1   :  { %v4640_v61 = vmul.f32 0.01, %v4636_v57  ;;  %vm4638_vm1 = vcmp.gt.f32.partialorder %v4636_v57, 0.0 }
0x1fb2   :  { %v4641_v10 = vmul.f32 0.01, %v4637_v29  ;;  %vm4639_vm2 = vcmp.gt.f32.partialorder %v4637_v29, 0.0 }
0x1fb3   :  { %v4642_v35 = vsel %vm4638_vm1, %v4636_v57, %v4640_v61 }
0x1fb4   :  { %v4643_v30 = vsel %vm4639_vm2, %v4637_v29, %v4641_v10 }
0x1fb5   :  { %4747 = vmatprep.mubr.f32.mxu0 %v4643_v30 }
0x1fb6   :  { %4748 = vmatmul.mubr.f32.vlgmr.msra.gmra.mrb[70].mxu0 %v4642_v35 }
0x2089   :  { %v5505_v3 = vpop.f32.mrb[70].mxu0 }
0x208a   :  { %v5506_v0 = vpop.f32.mrb[71].mxu0 }
0x208b   :  { %v5507_v25 = vadd.f32 %v5506_v0, %v5505_v3 }
0x208d   :  { %v4750_v9 = vadd.f32 %v5507_v25, %v4776_v36 }
0x208f   :  { %4753 = vst [vmem:[#allocation17] sm:$0xff] %v4750_v9 }
0x2090   :  { %8594 = shalt.err (!%p8591_p12)
}
0x2091   :  { %s8595_s16 = scalar_lea.hbm %s9755_s8, 128 }
0x2092   :  { %p8596_p13 = scmp.ne.s32.totalorder %s9755_s8, %s8595_s16  ;;  %p8599_p0 = scmp.lt.u32.totalorder %s8595_s16, %s9755_s8 }
0x2094   :  { %p8601_p1 = pnand %p8599_p0, %p8596_p13 }
0x2096   :  { %8604 = shalt.err (!%p8601_p1)
}
0x2097   :  { %4763 = dma.vmem_to_hbm [thread:$0]  %s4761_s18, 128, %s9755_s8, [#allocation5]  }
0x2098   :  { %8615 = dma.done.wait [#allocation5], 128  }
0x2099   :  { %8616 = vsyncadd [#allocation5], 4294967168 }
0x209a   :  { %4767 = vsyncpa [#allocation4], 1 }
0x209b   :  { %4768 = vsyncpa [#allocation7], 1 }
0x209c   :  { %4769 = vsyncpa [#allocation10], 1 }
0x209d   :  { %4770 = vsyncpa [#allocation13], 1 }
0x209e   :  { %4771 = vsyncpa [#allocation16], 1 }
0x209f   :  { %4772 = vsyncpa [#allocation5], 1 }

</bundles_post_ra>
